<compile_context>
chip_gen: v7x
topology: tpu7x:2x2x1
jax: 0.10.0
libtpu: 0.0.40
codegen_flags: <defaults>
</compile_context>

<pallas_src>
import functools

import numpy as np
import jax
import jax.numpy as jnp
from jax.experimental import pallas as pl
from jax.experimental.pallas import tpu as pltpu


# ----------------------------- Sym (host-side) -----------------------------
OBJ2SYM = {'cube': [0, 0, 1], 'sphere': [0, 1, 0], 'cylinder': [1, 0, 0]}
REL2SYM = {'front': [0, 0, 0, 1], 'behind': [0, 0, 1, 0],
           'left': [0, 1, 0, 0], 'right': [1, 0, 0, 0]}

SYM_DIM = 10        # true symbolic feature width
SYM_DIM_PAD = 128   # lane-aligned (zero padded)
HID_DIM = 300       # true hidden width of the MLP
HID_DIM_PAD = 384   # 3 * 128
EMB_DIM = 768       # CLIP embedding width (already 6 * 128)
L2_EPS = 1e-12      # matches torch.nn.functional.normalize default clamp


def sym_encode(texts_t, bsz, num_captions):
    # TODO(synk): string parsing (split + dict lookup) has no Pallas
    # equivalent; done on host.  Output is already zero-padded to 128 lanes.
    rows = np.zeros((bsz * num_captions, SYM_DIM_PAD), dtype=np.float32)
    i = 0
    for text_batch in texts_t:
        for text in text_batch:
            a, r, b = text.split()
            rows[i, :SYM_DIM] = OBJ2SYM[a] + REL2SYM[r] + OBJ2SYM[b]
            i += 1
    return jnp.asarray(rows)            # (bsz*num_captions, 128)


# ----------------------------- fused Pallas kernel --------------------------
def _fused_kernel(scale_ref, sym_ref, img_ref,
                  w1_ref, b1_ref, w2_ref, b2_ref, w3_ref, b3_ref,
                  wi_ref, bi_ref, o_ref, *, num_captions):
    n_text = sym_ref.shape[0]
    bsz = img_ref.shape[0]

    # ---- text branch: Linear(10,300)+ReLU, Linear(300,300)+ReLU, Linear(300,768)
    h = jnp.dot(sym_ref[...], w1_ref[...],
                preferred_element_type=jnp.float32) + b1_ref[...]
    h = jnp.maximum(h, 0.0)
    h = jnp.dot(h, w2_ref[...], preferred_element_type=jnp.float32) + b2_ref[...]
    h = jnp.maximum(h, 0.0)
    t = jnp.dot(h, w3_ref[...], preferred_element_type=jnp.float32) + b3_ref[...]
    # L2 row-normalize: rsqrt goes to the EUP; eps avoids 0/0 -> NaN.
    t = t * jax.lax.rsqrt(jnp.sum(t * t, axis=-1, keepdims=True) + L2_EPS)

    # ---- image branch: linear projection stand-in + L2 row-normalize
    f = jnp.dot(img_ref[...], wi_ref[...],
                preferred_element_type=jnp.float32) + bi_ref[...]
    f = f * jax.lax.rsqrt(jnp.sum(f * f, axis=-1, keepdims=True) + L2_EPS)

    # ---- logits: logit_scale.exp() * bmm(text (B,C,D), image (B,D,1)).squeeze(2)
    # Contract D on the MXU: M[i, k] = <t[i, :], f[k, :]> for all (i, k), then
    # select the block-diagonal entry M[b*num_captions + c, b].
    m = jax.lax.dot_general(t, f, (((1,), (1,)), ((), ())),
                            preferred_element_type=jnp.float32)   # (n_text, bsz)
    row = jax.lax.broadcasted_iota(jnp.int32, (n_text, bsz), 0)
    col = jax.lax.broadcasted_iota(jnp.int32, (n_text, bsz), 1)
    own = (row >= col * num_captions) & (row < (col + 1) * num_captions)
    picked = jnp.sum(jnp.where(own, m, 0.0), axis=-1, keepdims=True)  # (n_text, 1)
    o_ref[...] = scale_ref[0] * picked


def _full_spec(shape):
    nd = len(shape)
    return pl.BlockSpec(shape, lambda i, _nd=nd: (0,) * _nd)


def sym_mlp_fused_call(logit_scale_exp, sym_pad, img_pad,
                       w1, b1, w2, b2, w3, b3, wi, bi, num_captions):
    n_text = sym_pad.shape[0]
    bsz = img_pad.shape[0]
    img_dim = img_pad.shape[1]

    flops = (2 * n_text * (SYM_DIM_PAD * HID_DIM_PAD
                           + HID_DIM_PAD * HID_DIM_PAD
                           + HID_DIM_PAD * EMB_DIM
                           + EMB_DIM * bsz)
             + 2 * bsz * img_dim * EMB_DIM)
    bytes_accessed = 4 * (sym_pad.size + img_pad.size
                          + w1.size + b1.size + w2.size + b2.size
                          + w3.size + b3.size + wi.size + bi.size
                          + 1 + n_text)

    kernel = functools.partial(_fused_kernel, num_captions=num_captions)
    out = pl.pallas_call(
        kernel,
        grid=(1,),
        out_shape=jax.ShapeDtypeStruct((n_text, 1), jnp.float32),
        in_specs=[pl.BlockSpec(memory_space=pltpu.MemorySpace.SMEM),  # logit scale
                  _full_spec(sym_pad.shape), _full_spec(img_pad.shape),
                  _full_spec(w1.shape), _full_spec(b1.shape),
                  _full_spec(w2.shape), _full_spec(b2.shape),
                  _full_spec(w3.shape), _full_spec(b3.shape),
                  _full_spec(wi.shape), _full_spec(bi.shape)],
        out_specs=_full_spec((n_text, 1)),
        cost_estimate=pl.CostEstimate(flops=int(flops),
                                      transcendentals=int(n_text + bsz),
                                      bytes_accessed=int(bytes_accessed)),
    )(logit_scale_exp, sym_pad, img_pad, w1, b1, w2, b2, w3, b3, wi, bi)
    return out.reshape(bsz, num_captions)


# ----------------------------- parameter init ------------------------------
def _round_up(x, m):
    return ((x + m - 1) // m) * m


def _linear_init(kw, kb, fan_in, fan_out):
    bound = 1.0 / np.sqrt(fan_in)
    w = jax.random.uniform(kw, (fan_in, fan_out), jnp.float32, -bound, bound)
    b = jax.random.uniform(kb, (fan_out,), jnp.float32, -bound, bound)
    return w, b


def _pad_w(w, rows, cols):
    return jnp.pad(w, ((0, rows - w.shape[0]), (0, cols - w.shape[1])))


def _pad_b(b, cols):
    return jnp.pad(b, ((0, cols - b.shape[0]),)).reshape(1, cols)


def init_params(key, img_feat_dim):
    ks = jax.random.split(key, 8)
    w1, b1 = _linear_init(ks[0], ks[1], SYM_DIM, HID_DIM)
    w2, b2 = _linear_init(ks[2], ks[3], HID_DIM, HID_DIM)
    w3, b3 = _linear_init(ks[4], ks[5], HID_DIM, EMB_DIM)
    # TODO(synk): frozen CLIP ViT image encoder replaced by a single
    # deterministic linear projection stand-in (no checkpoint available).
    wi, bi = _linear_init(ks[6], ks[7], img_feat_dim, EMB_DIM)

    img_dim_pad = _round_up(img_feat_dim, 128)
    return {
        'w1': _pad_w(w1, SYM_DIM_PAD, HID_DIM_PAD), 'b1': _pad_b(b1, HID_DIM_PAD),
        'w2': _pad_w(w2, HID_DIM_PAD, HID_DIM_PAD), 'b2': _pad_b(b2, HID_DIM_PAD),
        'w3': _pad_w(w3, HID_DIM_PAD, EMB_DIM),     'b3': _pad_b(b3, EMB_DIM),
        'wi': _pad_w(wi, img_dim_pad, EMB_DIM),     'bi': _pad_b(bi, EMB_DIM),
        # CLIP init: logit_scale = log(1/0.07); forward applies .exp()
        'logit_scale': jnp.asarray([np.log(1.0 / 0.07)], dtype=jnp.float32),
    }


# ------------------------------- forward -----------------------------------
def sym_mlp_forward(batch_images, texts, params):
    texts_t = list(map(list, zip(*texts)))            # [bsz][num_captions]
    bsz = len(texts_t)
    num_captions = len(texts_t[0])

    sym_pad = sym_encode(texts_t, bsz, num_captions)  # (bsz*nc, 128)

    img_flat = batch_images.reshape(bsz, -1).astype(jnp.float32)
    pad = params['wi'].shape[0] - img_flat.shape[1]
    if pad:
        img_flat = jnp.pad(img_flat, ((0, 0), (0, pad)))

    scale_exp = jnp.exp(params['logit_scale'])        # logit_scale.exp(), (1,)

    return sym_mlp_fused_call(
        scale_exp, sym_pad, img_flat,
        params['w1'], params['b1'], params['w2'], params['b2'],
        params['w3'], params['b3'], params['wi'], params['bi'],
        num_captions)                                  # (bsz, num_captions)


# pure-JAX reference (same padded params; padding is mathematically inert)
def reference_forward(batch_images, texts, params):
    texts_t = list(map(list, zip(*texts)))
    bsz = len(texts_t)
    num_captions = len(texts_t[0])
    sym_pad = sym_encode(texts_t, bsz, num_captions)
    img = batch_images.reshape(bsz, -1).astype(jnp.float32)
    img = jnp.pad(img, ((0, 0), (0, params['wi'].shape[0] - img.shape[1])))
    h = jnp.maximum(sym_pad @ params['w1'] + params['b1'], 0.0)
    h = jnp.maximum(h @ params['w2'] + params['b2'], 0.0)
    t = h @ params['w3'] + params['b3']
    t = t / jnp.sqrt(jnp.sum(t * t, -1, keepdims=True) + L2_EPS)
    f = img @ params['wi'] + params['bi']
    f = f / jnp.sqrt(jnp.sum(f * f, -1, keepdims=True) + L2_EPS)
    t3 = t.reshape(bsz, num_captions, -1)
    return jnp.exp(params['logit_scale'])[0] * jnp.einsum('bcd,bd->bc', t3, f)


# --------------------------------- main -------------------------------------
if __name__ == "__main__":
    key = jax.random.PRNGKey(0)
    k_img, k_par = jax.random.split(key)

    bsz, num_captions = 2, 8
    C, H, W = 3, 16, 16
    params = init_params(k_par, img_feat_dim=C * H * W)

    objs = ['cube', 'sphere', 'cylinder']
    rels = ['front', 'behind', 'left', 'right']
    # texts arrive as num_captions tuples of length bsz (dataloader convention);
    # forward() transposes them, matching the PyTorch module.
    texts = []
    for c in range(num_captions):
        cap = []
        for b in range(bsz):
            i = c * bsz + b
            cap.append(f"{objs[i % 3]} {rels[i % 4]} {objs[(i + 1) % 3]}")
        texts.append(tuple(cap))

    batch_images = jax.random.normal(k_img, (bsz, C, H, W), jnp.float32)

    logits = sym_mlp_forward(batch_images, texts, params)
    jax.block_until_ready(logits)
    assert logits.shape == (bsz, num_captions), logits.shape
    assert bool(jnp.all(jnp.isfinite(logits)))

    ref = reference_forward(batch_images, texts, params)
    assert bool(jnp.allclose(logits, ref, rtol=5e-2, atol=5e-2)), (logits, ref)
    print("KERNEL_OK")
</pallas_src>

<mosaic_0001>
module attributes {stable_mosaic.version = 11 : i64} {
  func.func @_fused_kernel(%arg0: i32, %arg1: memref<1xf32, #tpu.memory_space<smem>>, %arg2: memref<16x128xf32, #tpu.memory_space<vmem>>, %arg3: memref<2x768xf32, #tpu.memory_space<vmem>>, %arg4: memref<128x384xf32, #tpu.memory_space<vmem>>, %arg5: memref<1x384xf32, #tpu.memory_space<vmem>>, %arg6: memref<384x384xf32, #tpu.memory_space<vmem>>, %arg7: memref<1x384xf32, #tpu.memory_space<vmem>>, %arg8: memref<384x768xf32, #tpu.memory_space<vmem>>, %arg9: memref<1x768xf32, #tpu.memory_space<vmem>>, %arg10: memref<768x768xf32, #tpu.memory_space<vmem>>, %arg11: memref<1x768xf32, #tpu.memory_space<vmem>>, %arg12: memref<16x1xf32, #tpu.memory_space<vmem>>) attributes {dimension_semantics = [#tpu.dimension_semantics<arbitrary>], iteration_bounds = array<i64: 1>, scalar_prefetch = 0 : i64, scratch_operands = 0 : i64, tpu.core_type = #tpu.core_type<tc>, window_params = [{transform_indices = @transform_0, window_bounds = array<i64: 1>}, {pipeline_mode = #tpu.pipeline_mode<synchronous>, transform_indices = @transform_1, window_bounds = array<i64: 16, 128>}, {pipeline_mode = #tpu.pipeline_mode<synchronous>, transform_indices = @transform_2, window_bounds = array<i64: 2, 768>}, {pipeline_mode = #tpu.pipeline_mode<synchronous>, transform_indices = @transform_3, window_bounds = array<i64: 128, 384>}, {pipeline_mode = #tpu.pipeline_mode<synchronous>, transform_indices = @transform_4, window_bounds = array<i64: 1, 384>}, {pipeline_mode = #tpu.pipeline_mode<synchronous>, transform_indices = @transform_5, window_bounds = array<i64: 384, 384>}, {pipeline_mode = #tpu.pipeline_mode<synchronous>, transform_indices = @transform_6, window_bounds = array<i64: 1, 384>}, {pipeline_mode = #tpu.pipeline_mode<synchronous>, transform_indices = @transform_7, window_bounds = array<i64: 384, 768>}, {pipeline_mode = #tpu.pipeline_mode<synchronous>, transform_indices = @transform_8, window_bounds = array<i64: 1, 768>}, {pipeline_mode = #tpu.pipeline_mode<synchronous>, transform_indices = @transform_9, window_bounds = array<i64: 768, 768>}, {pipeline_mode = #tpu.pipeline_mode<synchronous>, transform_indices = @transform_10, window_bounds = array<i64: 1, 768>}, {pipeline_mode = #tpu.pipeline_mode<synchronous>, transform_indices = @transform_11, window_bounds = array<i64: 16, 1>}]} {
    %c0 = arith.constant 0 : index
    %c0_0 = arith.constant 0 : index
    %0 = vector.load %arg2[%c0, %c0_0] : memref<16x128xf32, #tpu.memory_space<vmem>>, vector<16x128xf32>
    %c0_1 = arith.constant 0 : index
    %c0_2 = arith.constant 0 : index
    %1 = vector.load %arg4[%c0_1, %c0_2] : memref<128x384xf32, #tpu.memory_space<vmem>>, vector<128x384xf32>
    %cst = arith.constant dense<0.000000e+00> : vector<16x384xf32>
    %2 = tpu.matmul %0, %1, %cst {dimension_numbers = #tpu.dot_dimension_numbers<[1], [0], [0], [1], [0, 0, 1, 1], [], []>} : vector<16x128xf32>, vector<128x384xf32>, vector<16x384xf32> -> vector<16x384xf32>
    %c0_3 = arith.constant 0 : index
    %c0_4 = arith.constant 0 : index
    %3 = vector.load %arg5[%c0_3, %c0_4] : memref<1x384xf32, #tpu.memory_space<vmem>>, vector<1x384xf32>
    %4 = vector.broadcast %3 : vector<1x384xf32> to vector<16x384xf32>
    %5 = arith.addf %2, %4 : vector<16x384xf32>
    %cst_5 = arith.constant 0.000000e+00 : f32
    %6 = vector.broadcast %cst_5 : f32 to vector<16x384xf32>
    %7 = arith.maximumf %5, %6 : vector<16x384xf32>
    %c0_6 = arith.constant 0 : index
    %c0_7 = arith.constant 0 : index
    %8 = vector.load %arg6[%c0_6, %c0_7] : memref<384x384xf32, #tpu.memory_space<vmem>>, vector<384x384xf32>
    %cst_8 = arith.constant dense<0.000000e+00> : vector<16x384xf32>
    %9 = tpu.matmul %7, %8, %cst_8 {dimension_numbers = #tpu.dot_dimension_numbers<[1], [0], [0], [1], [0, 0, 1, 1], [], []>} : vector<16x384xf32>, vector<384x384xf32>, vector<16x384xf32> -> vector<16x384xf32>
    %c0_9 = arith.constant 0 : index
    %c0_10 = arith.constant 0 : index
    %10 = vector.load %arg7[%c0_9, %c0_10] : memref<1x384xf32, #tpu.memory_space<vmem>>, vector<1x384xf32>
    %11 = vector.broadcast %10 : vector<1x384xf32> to vector<16x384xf32>
    %12 = arith.addf %9, %11 : vector<16x384xf32>
    %cst_11 = arith.constant 0.000000e+00 : f32
    %13 = vector.broadcast %cst_11 : f32 to vector<16x384xf32>
    %14 = arith.maximumf %12, %13 : vector<16x384xf32>
    %c0_12 = arith.constant 0 : index
    %c0_13 = arith.constant 0 : index
    %15 = vector.load %arg8[%c0_12, %c0_13] : memref<384x768xf32, #tpu.memory_space<vmem>>, vector<384x768xf32>
    %cst_14 = arith.constant dense<0.000000e+00> : vector<16x768xf32>
    %16 = tpu.matmul %14, %15, %cst_14 {dimension_numbers = #tpu.dot_dimension_numbers<[1], [0], [0], [1], [0, 0, 1, 1], [], []>} : vector<16x384xf32>, vector<384x768xf32>, vector<16x768xf32> -> vector<16x768xf32>
    %c0_15 = arith.constant 0 : index
    %c0_16 = arith.constant 0 : index
    %17 = vector.load %arg9[%c0_15, %c0_16] : memref<1x768xf32, #tpu.memory_space<vmem>>, vector<1x768xf32>
    %18 = vector.broadcast %17 : vector<1x768xf32> to vector<16x768xf32>
    %19 = arith.addf %16, %18 : vector<16x768xf32>
    %20 = arith.mulf %19, %19 : vector<16x768xf32>
    %cst_17 = arith.constant dense<0.000000e+00> : vector<16xf32>
    %21 = vector.multi_reduction <add>, %20, %cst_17 [1] : vector<16x768xf32> to vector<16xf32>
    %22 = vector.shape_cast %21 : vector<16xf32> to vector<16x1xf32>
    %cst_18 = arith.constant 9.99999996E-13 : f32
    %23 = vector.broadcast %cst_18 : f32 to vector<16x1xf32>
    %24 = arith.addf %22, %23 : vector<16x1xf32>
    %25 = math.rsqrt %24 : vector<16x1xf32>
    %26 = vector.broadcast %25 : vector<16x1xf32> to vector<16x768xf32>
    %27 = arith.mulf %19, %26 : vector<16x768xf32>
    %c0_19 = arith.constant 0 : index
    %c0_20 = arith.constant 0 : index
    %28 = vector.load %arg3[%c0_19, %c0_20] : memref<2x768xf32, #tpu.memory_space<vmem>>, vector<2x768xf32>
    %c0_21 = arith.constant 0 : index
    %c0_22 = arith.constant 0 : index
    %29 = vector.load %arg10[%c0_21, %c0_22] : memref<768x768xf32, #tpu.memory_space<vmem>>, vector<768x768xf32>
    %cst_23 = arith.constant dense<0.000000e+00> : vector<2x768xf32>
    %30 = tpu.matmul %28, %29, %cst_23 {dimension_numbers = #tpu.dot_dimension_numbers<[1], [0], [0], [1], [0, 0, 1, 1], [], []>} : vector<2x768xf32>, vector<768x768xf32>, vector<2x768xf32> -> vector<2x768xf32>
    %c0_24 = arith.constant 0 : index
    %c0_25 = arith.constant 0 : index
    %31 = vector.load %arg11[%c0_24, %c0_25] : memref<1x768xf32, #tpu.memory_space<vmem>>, vector<1x768xf32>
    %32 = vector.broadcast %31 : vector<1x768xf32> to vector<2x768xf32>
    %33 = arith.addf %30, %32 : vector<2x768xf32>
    %34 = arith.mulf %33, %33 : vector<2x768xf32>
    %cst_26 = arith.constant dense<0.000000e+00> : vector<2xf32>
    %35 = vector.multi_reduction <add>, %34, %cst_26 [1] : vector<2x768xf32> to vector<2xf32>
    %36 = vector.shape_cast %35 : vector<2xf32> to vector<2x1xf32>
    %cst_27 = arith.constant 9.99999996E-13 : f32
    %37 = vector.broadcast %cst_27 : f32 to vector<2x1xf32>
    %38 = arith.addf %36, %37 : vector<2x1xf32>
    %39 = math.rsqrt %38 : vector<2x1xf32>
    %40 = vector.broadcast %39 : vector<2x1xf32> to vector<2x768xf32>
    %41 = arith.mulf %33, %40 : vector<2x768xf32>
    %cst_28 = arith.constant dense<0.000000e+00> : vector<16x2xf32>
    %42 = tpu.matmul %27, %41, %cst_28 {dimension_numbers = #tpu.dot_dimension_numbers<[1], [1], [0], [0], [0, 0, 1, 0], [], []>} : vector<16x768xf32>, vector<2x768xf32>, vector<16x2xf32> -> vector<16x2xf32>
    %43 = tpu.iota {dimensions = array<i32: 0>} : vector<16x2xi32>
    %44 = tpu.iota {dimensions = array<i32: 1>} : vector<16x2xi32>
    %c8_i32 = arith.constant 8 : i32
    %45 = vector.broadcast %c8_i32 : i32 to vector<16x2xi32>
    %46 = arith.muli %44, %45 : vector<16x2xi32>
    %47 = arith.cmpi sge, %43, %46 : vector<16x2xi32>
    %c1_i32 = arith.constant 1 : i32
    %48 = vector.broadcast %c1_i32 : i32 to vector<16x2xi32>
    %49 = arith.addi %44, %48 : vector<16x2xi32>
    %c8_i32_29 = arith.constant 8 : i32
    %50 = vector.broadcast %c8_i32_29 : i32 to vector<16x2xi32>
    %51 = arith.muli %49, %50 : vector<16x2xi32>
    %52 = arith.cmpi slt, %43, %51 : vector<16x2xi32>
    %53 = arith.andi %47, %52 : vector<16x2xi1>
    %cst_30 = arith.constant 0.000000e+00 : f32
    %54 = vector.broadcast %cst_30 : f32 to vector<16x2xf32>
    %55 = arith.select %53, %42, %54 : vector<16x2xi1>, vector<16x2xf32>
    %cst_31 = arith.constant dense<0.000000e+00> : vector<16xf32>
    %56 = vector.multi_reduction <add>, %55, %cst_31 [1] : vector<16x2xf32> to vector<16xf32>
    %57 = vector.shape_cast %56 : vector<16xf32> to vector<16x1xf32>
    %c0_32 = arith.constant 0 : index
    %58 = memref.load %arg1[%c0_32] : memref<1xf32, #tpu.memory_space<smem>>
    %59 = vector.broadcast %58 : f32 to vector<16x1xf32>
    %60 = arith.mulf %59, %57 : vector<16x1xf32>
    %c0_33 = arith.constant 0 : index
    %c0_34 = arith.constant 0 : index
    %61 = vector.load %arg12[%c0_33, %c0_34] : memref<16x1xf32, #tpu.memory_space<vmem>>, vector<16x1xf32>
    tpu.vector_store %arg12[%c0_33, %c0_34], %60 {strides = array<i32>} : memref<16x1xf32, #tpu.memory_space<vmem>>, vector<16x1xf32>,
    return
  }
  func.func @transform_0(%arg0: i32) -> i32 {
    %c0_i32 = arith.constant 0 : i32
    %c0_i32_0 = arith.constant 0 : i32
    return %c0_i32 : i32
  }
  func.func @transform_1(%arg0: i32) -> (i32, i32) {
    %c0_i32 = arith.constant 0 : i32
    %c0_i32_0 = arith.constant 0 : i32
    %c0_i32_1 = arith.constant 0 : i32
    return %c0_i32, %c0_i32_0 : i32, i32
  }
  func.func @transform_2(%arg0: i32) -> (i32, i32) {
    %c0_i32 = arith.constant 0 : i32
    %c0_i32_0 = arith.constant 0 : i32
    %c0_i32_1 = arith.constant 0 : i32
    return %c0_i32, %c0_i32_0 : i32, i32
  }
  func.func @transform_3(%arg0: i32) -> (i32, i32) {
    %c0_i32 = arith.constant 0 : i32
    %c0_i32_0 = arith.constant 0 : i32
    %c0_i32_1 = arith.constant 0 : i32
    return %c0_i32, %c0_i32_0 : i32, i32
  }
  func.func @transform_4(%arg0: i32) -> (i32, i32) {
    %c0_i32 = arith.constant 0 : i32
    %c0_i32_0 = arith.constant 0 : i32
    %c0_i32_1 = arith.constant 0 : i32
    return %c0_i32, %c0_i32_0 : i32, i32
  }
  func.func @transform_5(%arg0: i32) -> (i32, i32) {
    %c0_i32 = arith.constant 0 : i32
    %c0_i32_0 = arith.constant 0 : i32
    %c0_i32_1 = arith.constant 0 : i32
    return %c0_i32, %c0_i32_0 : i32, i32
  }
  func.func @transform_6(%arg0: i32) -> (i32, i32) {
    %c0_i32 = arith.constant 0 : i32
    %c0_i32_0 = arith.constant 0 : i32
    %c0_i32_1 = arith.constant 0 : i32
    return %c0_i32, %c0_i32_0 : i32, i32
  }
  func.func @transform_7(%arg0: i32) -> (i32, i32) {
    %c0_i32 = arith.constant 0 : i32
    %c0_i32_0 = arith.constant 0 : i32
    %c0_i32_1 = arith.constant 0 : i32
    return %c0_i32, %c0_i32_0 : i32, i32
  }
  func.func @transform_8(%arg0: i32) -> (i32, i32) {
    %c0_i32 = arith.constant 0 : i32
    %c0_i32_0 = arith.constant 0 : i32
    %c0_i32_1 = arith.constant 0 : i32
    return %c0_i32, %c0_i32_0 : i32, i32
  }
  func.func @transform_9(%arg0: i32) -> (i32, i32) {
    %c0_i32 = arith.constant 0 : i32
    %c0_i32_0 = arith.constant 0 : i32
    %c0_i32_1 = arith.constant 0 : i32
    return %c0_i32, %c0_i32_0 : i32, i32
  }
  func.func @transform_10(%arg0: i32) -> (i32, i32) {
    %c0_i32 = arith.constant 0 : i32
    %c0_i32_0 = arith.constant 0 : i32
    %c0_i32_1 = arith.constant 0 : i32
    return %c0_i32, %c0_i32_0 : i32, i32
  }
  func.func @transform_11(%arg0: i32) -> (i32, i32) {
    %c0_i32 = arith.constant 0 : i32
    %c0_i32_0 = arith.constant 0 : i32
    %c0_i32_1 = arith.constant 0 : i32
    return %c0_i32, %c0_i32_0 : i32, i32
  }
}

</mosaic_0001>

<bundles_post_ra>
// kernel: tpu_custom_call.1
= control target key start
LH: loop header
LB: loop body
LE: loop exit
PB: predicated region body
PF: predicated region fallthrough
CT: control target
= control target key end

     0   :  { %17 = vsyncpa [#allocation4], 0  ;;  %s5304_s0 = inlined_call_operand.<no memory space> [shape: f32[1], index: 0, kind: input, shape index: {}]   ;;  %s5305_s1 = inlined_call_operand.hbm [shape: f32[16,128], index: 1, kind: input, shape index: {}]   ;;  %s5306_s2 = inlined_call_operand.hbm [shape: f32[2,768], index: 2, kind: input, shape index: {}]   ;;  %s5307_s3 = inlined_call_operand.hbm [shape: f32[128,384], index: 3, kind: input, shape index: {}]   ;;  %s5308_s4 = inlined_call_operand.hbm [shape: f32[1,384], index: 4, kind: input, shape index: {}]   ;;  %s5309_s5 = inlined_call_operand.hbm [shape: f32[384,384], index: 5, kind: input, shape index: {}]   ;;  %s5310_s6 = inlined_call_operand.hbm [shape: f32[1,384], index: 6, kind: input, shape index: {}]   ;;  %s5311_s7 = inlined_call_operand.hbm [shape: f32[384,768], index: 7, kind: input, shape index: {}]   ;;  %s5312_s8 = inlined_call_operand.hbm [shape: f32[1,768], index: 8, kind: input, shape index: {}]   ;;  %s5313_s9 = inlined_call_operand.hbm [shape: f32[768,768], index: 9, kind: input, shape index: {}]   ;;  %s5314_s10 = inlined_call_operand.hbm [shape: f32[1,768], index: 10, kind: input, shape index: {}]   ;;  %s5315_s11 = inlined_call_operand.vmem [shape: f32[16,1], index: 11, kind: output, shape index: {}]  }
   0x1   :  { %18 = vsyncpa [#allocation6], 0 }
   0x2   :  { %19 = vsyncpa [#allocation9], 0 }
   0x3   :  { %20 = vsyncpa [#allocation12], 0 }
   0x4   :  { %21 = vsyncpa [#allocation15], 0 }
   0x5   :  { %22 = vsyncpa [#allocation18], 0  ;;  %s4809_s17 = smov [#allocation5]   ;;  %s4810_s19 = smov [#allocation8]  }
   0x6   :  { %s43_s18 = sshll.u32 %s4809_s17, 4  ;;  %s65_s20 = sshll.u32 %s4810_s19, 4  ;;  %s44_s18 = int_to_ptr.vmem [resolvable:$true] %s43_s18  ;;  %s66_s20 = int_to_ptr.vmem [resolvable:$true] %s65_s20 }
   0x7   :  { %s4577_s23 = scalar_lea.hbm %s5306_s2, 192 }
   0x8   :  { %p4578_p0 = scmp.ne.s32.totalorder %s5306_s2, %s4577_s23  ;;  %p4581_p1 = scmp.lt.u32.totalorder %s4577_s23, %s5306_s2 }
   0xa   :  { %p4583_p2 = pnand %p4581_p1, %p4578_p0 }
   0xc   :  { %4586 = shalt.err (!%p4583_p2)
}
   0xd   :  { %s4587_s28 = scalar_lea.vmem %s44_s18, 192  ;;  %p4592_p4 = scmp.lt.s32.totalorder %s44_s18, %s44_s18 }
   0xe   :  { %p4588_p3 = scmp.ne.s32.totalorder %s44_s18, %s4587_s28  ;;  %p4593_p5 = scmp.lt.s32.totalorder %s4587_s28, %s4587_s28 }
  0x10   :  { %p4594_p6 = por %p4593_p5, %p4592_p4 }
  0x12   :  { %p4595_p7 = pnand %p4594_p6, %p4588_p3 }
  0x14   :  { %4598 = shalt.err (!%p4595_p7)
}
  0x15   :  { %46 = dma.hbm_to_vmem [thread:$0]  %s5306_s2, 192, %s44_s18, [#allocation6]  }
  0x16   :  { %s4599_s14 = scalar_lea.hbm %s5308_s4, 48 }
  0x17   :  { %p4600_p8 = scmp.ne.s32.totalorder %s5308_s4, %s4599_s14  ;;  %p4603_p9 = scmp.lt.u32.totalorder %s4599_s14, %s5308_s4 }
  0x19   :  { %p4605_p10 = pnand %p4603_p9, %p4600_p8 }
  0x1b   :  { %4608 = shalt.err (!%p4605_p10)
}
  0x1c   :  { %s4609_s21 = scalar_lea.vmem %s66_s20, 48  ;;  %s4613_s22 = scalar_lea.vmem %s66_s20, 64 }
  0x1d   :  { %p4610_p11 = scmp.ne.s32.totalorder %s66_s20, %s4609_s21  ;;  %p4614_p12 = scmp.lt.s32.totalorder %s66_s20, %s66_s20 }
  0x1e   :  { %p4615_p13 = scmp.lt.s32.totalorder %s4613_s22, %s4609_s21 }
  0x20   :  { %p4616_p0 = por %p4615_p13, %p4614_p12 }
  0x22   :  { %p4617_p1 = pnand %p4616_p0, %p4610_p11 }
  0x24   :  { %4620 = shalt.err (!%p4617_p1)
}
  0x25   :  { %68 = dma.hbm_to_vmem [thread:$0]  %s5308_s4, 48, %s66_s20, [#allocation9]  }
  0x26   :  { %s4811_s23 = smov [#allocation11]   ;;  %s4812_s25 = smov [#allocation14]  }
  0x27   :  { %s87_s24 = sshll.u32 %s4811_s23, 4  ;;  %s109_s26 = sshll.u32 %s4812_s25, 4  ;;  %s88_s24 = int_to_ptr.vmem [resolvable:$true] %s87_s24  ;;  %s110_s26 = int_to_ptr.vmem [resolvable:$true] %s109_s26 }
  0x28   :  { %s4621_s29 = scalar_lea.hbm %s5310_s6, 48 }
  0x29   :  { %p4622_p2 = scmp.ne.s32.totalorder %s5310_s6, %s4621_s29  ;;  %p4625_p3 = scmp.lt.u32.totalorder %s4621_s29, %s5310_s6 }
  0x2b   :  { %p4627_p4 = pnand %p4625_p3, %p4622_p2 }
  0x2d   :  { %4630 = shalt.err (!%p4627_p4)
}
  0x2e   :  { %s4631_s4 = scalar_lea.vmem %s88_s24, 48  ;;  %s4635_s20 = scalar_lea.vmem %s88_s24, 64 }
  0x2f   :  { %p4632_p5 = scmp.ne.s32.totalorder %s88_s24, %s4631_s4  ;;  %p4636_p6 = scmp.lt.s32.totalorder %s88_s24, %s88_s24 }
  0x30   :  { %p4637_p7 = scmp.lt.s32.totalorder %s4635_s20, %s4631_s4 }
  0x32   :  { %p4638_p8 = por %p4637_p7, %p4636_p6 }
  0x34   :  { %p4639_p9 = pnand %p4638_p8, %p4632_p5 }
  0x36   :  { %4642 = shalt.err (!%p4639_p9)
}
  0x37   :  { %90 = dma.hbm_to_vmem [thread:$0]  %s5310_s6, 48, %s88_s24, [#allocation12]  }
  0x38   :  { %s4643_s21 = scalar_lea.hbm %s5312_s8, 96 }
  0x39   :  { %p4644_p10 = scmp.ne.s32.totalorder %s5312_s8, %s4643_s21  ;;  %p4647_p11 = scmp.lt.u32.totalorder %s4643_s21, %s5312_s8 }
  0x3b   :  { %p4649_p12 = pnand %p4647_p11, %p4644_p10 }
  0x3d   :  { %4652 = shalt.err (!%p4649_p12)
}
  0x3e   :  { %s4653_s25 = scalar_lea.vmem %s110_s26, 96  ;;  %p4658_p0 = scmp.lt.s32.totalorder %s110_s26, %s110_s26 }
  0x3f   :  { %p4654_p13 = scmp.ne.s32.totalorder %s110_s26, %s4653_s25  ;;  %p4659_p1 = scmp.lt.s32.totalorder %s4653_s25, %s4653_s25 }
  0x41   :  { %p4660_p2 = por %p4659_p1, %p4658_p0 }
  0x43   :  { %p4661_p3 = pnand %p4660_p2, %p4654_p13 }
  0x45   :  { %4664 = shalt.err (!%p4661_p3)
}
  0x46   :  { %112 = dma.hbm_to_vmem [thread:$0]  %s5312_s8, 96, %s110_s26, [#allocation15]  }
  0x47   :  { %s4813_s27 = smov [#allocation3]   ;;  %s4665_s12 = scalar_lea.hbm %s5305_s1, 256 }
  0x48   :  { %s30_s28 = sshll.u32 %s4813_s27, 4  ;;  %p4666_p4 = scmp.ne.s32.totalorder %s5305_s1, %s4665_s12  ;;  %s31_s28 = int_to_ptr.vmem [resolvable:$true] %s30_s28 }
  0x49   :  { %p4669_p5 = scmp.lt.u32.totalorder %s4665_s12, %s5305_s1 }
  0x4b   :  { %p4671_p6 = pnand %p4669_p5, %p4666_p4 }
  0x4d   :  { %4674 = shalt.err (!%p4671_p6)
}
  0x4e   :  { %s4675_s15 = scalar_lea.vmem %s31_s28, 256  ;;  %p4680_p8 = scmp.lt.s32.totalorder %s31_s28, %s31_s28 }
  0x4f   :  { %p4676_p7 = scmp.ne.s32.totalorder %s31_s28, %s4675_s15  ;;  %p4681_p9 = scmp.lt.s32.totalorder %s4675_s15, %s4675_s15 }
  0x51   :  { %p4682_p10 = por %p4681_p9, %p4680_p8 }
  0x53   :  { %p4683_p11 = pnand %p4682_p10, %p4676_p7 }
  0x55   :  { %4686 = shalt.err (!%p4683_p11)
}
  0x56   :  { %s4814_s8 = smov 128   ;;  %s4815_s26 = smov 8  }
  0x57   :  { %36 = dma.hbm_to_vmem [thread:$0]  %s5305_s1, 256, %s31_s28, [#allocation4], %s4814_s8, %s4814_s8, %s4815_s26  }
  0x58   :  { %s4816_s19 = smov [#allocation7]   ;;  %s4687_s18 = scalar_lea.hbm %s5307_s3, 6144 }
  0x59   :  { %s52_s21 = sshll.u32 %s4816_s19, 4  ;;  %p4688_p12 = scmp.ne.s32.totalorder %s5307_s3, %s4687_s18  ;;  %s53_s21 = int_to_ptr.vmem [resolvable:$true] %s52_s21 }
  0x5a   :  { %p4691_p13 = scmp.lt.u32.totalorder %s4687_s18, %s5307_s3 }
  0x5c   :  { %p4693_p0 = pnand %p4691_p13, %p4688_p12 }
  0x5e   :  { %4696 = shalt.err (!%p4693_p0)
}
  0x5f   :  { %s4697_s27 = scalar_lea.vmem %s53_s21, 6144  ;;  %p4702_p2 = scmp.lt.s32.totalorder %s53_s21, %s53_s21 }
  0x60   :  { %p4698_p1 = scmp.ne.s32.totalorder %s53_s21, %s4697_s27  ;;  %p4703_p3 = scmp.lt.s32.totalorder %s4697_s27, %s4697_s27 }
  0x62   :  { %p4704_p4 = por %p4703_p3, %p4702_p2 }
  0x64   :  { %p4705_p5 = pnand %p4704_p4, %p4698_p1 }
  0x66   :  { %4708 = shalt.err (!%p4705_p5)
}
  0x67   :  { %s4817_s1 = smov 384   ;;  %s4818_s28 = smov 24  }
  0x68   :  { %58 = dma.hbm_to_vmem [thread:$0]  %s5307_s3, 6144, %s53_s21, [#allocation6], %s4817_s1, %s4817_s1, %s4818_s28  }
  0x69   :  { %s4819_s12 = smov [#allocation10]   ;;  %s4820_s14 = smov [#allocation13]  }
  0x6a   :  { %s74_s13 = sshll.u32 %s4819_s12, 4  ;;  %s96_s4 = sshll.u32 %s4820_s14, 4  ;;  %s75_s13 = int_to_ptr.vmem [resolvable:$true] %s74_s13  ;;  %s4959_s4 = int_to_ptr.vmem [resolvable:$true] %s96_s4 }
  0x6b   :  { %s4709_s8 = scalar_lea.hbm %s5309_s5, 18432 }
  0x6c   :  { %p4710_p6 = scmp.ne.s32.totalorder %s5309_s5, %s4709_s8  ;;  %p4713_p7 = scmp.lt.u32.totalorder %s4709_s8, %s5309_s5 }
  0x6e   :  { %p4715_p8 = pnand %p4713_p7, %p4710_p6 }
  0x70   :  { %4718 = shalt.err (!%p4715_p8)
}
  0x71   :  { %s4719_s3 = scalar_lea.vmem %s75_s13, 18432  ;;  %p4724_p10 = scmp.lt.s32.totalorder %s75_s13, %s75_s13 }
  0x72   :  { %p4720_p9 = scmp.ne.s32.totalorder %s75_s13, %s4719_s3  ;;  %p4725_p11 = scmp.lt.s32.totalorder %s4719_s3, %s4719_s3 }
  0x74   :  { %p4726_p12 = por %p4725_p11, %p4724_p10 }
  0x76   :  { %p4727_p13 = pnand %p4726_p12, %p4720_p9 }
  0x78   :  { %4730 = shalt.err (!%p4727_p13)
}
  0x79   :  { %80 = dma.hbm_to_vmem [thread:$0]  %s5309_s5, 18432, %s75_s13, [#allocation9], %s4817_s1, %s4817_s1, %s4818_s28  }
  0x7a   :  { %s4731_s23 = scalar_lea.hbm %s5311_s7, 36864 }
  0x7b   :  { %p4732_p0 = scmp.ne.s32.totalorder %s5311_s7, %s4731_s23  ;;  %p4735_p1 = scmp.lt.u32.totalorder %s4731_s23, %s5311_s7 }
  0x7d   :  { %p4737_p2 = pnand %p4735_p1, %p4732_p0 }
  0x7f   :  { %4740 = shalt.err (!%p4737_p2)
}
  0x80   :  { %s4741_s29 = scalar_lea.vmem %s4959_s4, 36864  ;;  %p4746_p4 = scmp.lt.s32.totalorder %s4959_s4, %s4959_s4 }
  0x81   :  { %p4742_p3 = scmp.ne.s32.totalorder %s4959_s4, %s4741_s29  ;;  %p4747_p5 = scmp.lt.s32.totalorder %s4741_s29, %s4741_s29 }
  0x83   :  { %p4748_p6 = por %p4747_p5, %p4746_p4 }
  0x85   :  { %p4749_p7 = pnand %p4748_p6, %p4742_p3 }
  0x87   :  { %4752 = shalt.err (!%p4749_p7)
}
  0x88   :  { %s4821_s5 = smov 768   ;;  %s4822_s1 = smov 48  }
  0x89   :  { %102 = dma.hbm_to_vmem [thread:$0]  %s5311_s7, 36864, %s4959_s4, [#allocation12], %s4821_s5, %s4821_s5, %s4822_s1  }
  0x8a   :  { %s4823_s12 = smov [#allocation16]   ;;  %s4824_s14 = smov [#allocation17]  }
  0x8b   :  { %s118_s13 = sshll.u32 %s4823_s12, 4  ;;  %s131_s20 = sshll.u32 %s4824_s14, 4  ;;  %s119_s13 = int_to_ptr.vmem [resolvable:$true] %s118_s13  ;;  %s132_s20 = int_to_ptr.vmem [resolvable:$true] %s131_s20 }
  0x8c   :  { %s4753_s26 = scalar_lea.hbm %s5313_s9, 73728 }
  0x8d   :  { %p4754_p8 = scmp.ne.s32.totalorder %s5313_s9, %s4753_s26  ;;  %p4757_p9 = scmp.lt.u32.totalorder %s4753_s26, %s5313_s9 }
  0x8f   :  { %p4759_p10 = pnand %p4757_p9, %p4754_p8 }
  0x91   :  { %4762 = shalt.err (!%p4759_p10)
}
  0x92   :  { %s4763_s7 = scalar_lea.vmem %s119_s13, 73728  ;;  %p4768_p12 = scmp.lt.s32.totalorder %s119_s13, %s119_s13 }
  0x93   :  { %p4764_p11 = scmp.ne.s32.totalorder %s119_s13, %s4763_s7  ;;  %p4769_p13 = scmp.lt.s32.totalorder %s4763_s7, %s4763_s7 }
  0x95   :  { %p4770_p0 = por %p4769_p13, %p4768_p12 }
  0x97   :  { %p4771_p1 = pnand %p4770_p0, %p4764_p11 }
  0x99   :  { %4774 = shalt.err (!%p4771_p1)
}
  0x9a   :  { %124 = dma.hbm_to_vmem [thread:$0]  %s5313_s9, 73728, %s119_s13, [#allocation15], %s4821_s5, %s4821_s5, %s4822_s1  }
  0x9b   :  { %s4775_s18 = scalar_lea.hbm %s5314_s10, 96 }
  0x9c   :  { %p4776_p2 = scmp.ne.s32.totalorder %s5314_s10, %s4775_s18  ;;  %p4779_p3 = scmp.lt.u32.totalorder %s4775_s18, %s5314_s10 }
  0x9e   :  { %p4781_p4 = pnand %p4779_p3, %p4776_p2 }
  0xa0   :  { %4784 = shalt.err (!%p4781_p4)
}
  0xa1   :  { %s4785_s27 = scalar_lea.vmem %s132_s20, 96  ;;  %p4790_p6 = scmp.lt.s32.totalorder %s132_s20, %s132_s20 }
  0xa2   :  { %p4786_p5 = scmp.ne.s32.totalorder %s132_s20, %s4785_s27  ;;  %p4791_p7 = scmp.lt.s32.totalorder %s4785_s27, %s4785_s27 }
  0xa4   :  { %p4792_p8 = por %p4791_p7, %p4790_p6 }
  0xa6   :  { %p4793_p9 = pnand %p4792_p8, %p4786_p5 }
  0xa8   :  { %4796 = shalt.err (!%p4793_p9)
}
  0xa9   :  { %134 = dma.hbm_to_vmem [thread:$0]  %s5314_s10, 96, %s132_s20, [#allocation18]  }
  0xaa   :  { %4797 = dma.done.wait [#allocation4], 256  }
  0xab   :  { %4798 = vsyncadd [#allocation4], 4294967040 }
  0xac   :  { %4799 = dma.done.wait [#allocation6], 6336  }
  0xad   :  { %4800 = vsyncadd [#allocation6], 4294960960 }
  0xae   :  { %4801 = dma.done.wait [#allocation9], 18480  }
  0xaf   :  { %4802 = vsyncadd [#allocation9], 4294948816 }
  0xb0   :  { %4803 = dma.done.wait [#allocation12], 36912  }
  0xb1   :  { %4804 = vsyncadd [#allocation12], 4294930384 }
  0xb2   :  { %4805 = dma.done.wait [#allocation15], 73824  }
  0xb3   :  { %4806 = vsyncadd [#allocation15], 4294893472 }
  0xb4   :  { %4807 = dma.done.wait [#allocation18], 96  }
  0xb5   :  { %4808 = vsyncadd [#allocation18], 4294967200  ;;  %v4825_v0 = vmov 0.0   ;;  %v168_v1 = vld [vmem:[#allocation7 + $0x8] sm:$0xff]  ;;  %v171_v2 = vld [vmem:[#allocation7 + $0x20] sm:$0xff]  ;;  %vm2973_vm0 = vcmask 1041408  }
  0xb6   :  { %296 = vmatprep.mubr.f32.mxu0 %v4825_v0  ;;  %v167_v3 = vld [vmem:[#allocation7] sm:$0xff]  ;;  %v3405_v4 = vpack.c.bf16 %v171_v2, %v168_v1  ;;  %v170_v5 = vld [vmem:[#allocation7 + $0x18] sm:$0xff]  ;;  %v169_v6 = vld [vmem:[#allocation7 + $0x10] sm:$0xff]  ;;  %vm3236_vm6 = vcmask 15360   ;;  %vm3247_vm8 = vcmask 7168  }
  0xb7   :  { %v172_v7 = vld [vmem:[#allocation7 + $0x28] sm:$0xff]  ;;  %v3407_v8 = vpack.c.bf16 %v170_v5, %v167_v3  ;;  %v174_v10 = vld [vmem:[#allocation7 + $0x38] sm:$0xff]  ;;  %v177_v11 = vld [vmem:[#allocation7 + $0x50] sm:$0xff] }
  0xb8   :  { %v3437_v9 = vpack.c.bf16 %v172_v7, %v169_v6  ;;  %v173_v12 = vld [vmem:[#allocation7 + $0x30] sm:$0xff]  ;;  %3406 = vmatprep.subr.bf16.mxu0 %v3405_v4  ;;  %v3409_v13 = vpack.c.bf16 %v177_v11, %v174_v10  ;;  %v176_v14 = vld [vmem:[#allocation7 + $0x48] sm:$0xff]  ;;  %v175_v15 = vld [vmem:[#allocation7 + $0x40] sm:$0xff] }
  0xb9   :  { %v178_v16 = vld [vmem:[#allocation7 + $0x58] sm:$0xff]  ;;  %3408 = vmatpush1.bf16.msra.mxu0 %v3407_v8  ;;  %v3411_v17 = vpack.c.bf16 %v176_v14, %v173_v12  ;;  %v180_v19 = vld [vmem:[#allocation7 + $0x68] sm:$0xff]  ;;  %v183_v20 = vld [vmem:[#allocation7 + $0x80] sm:$0xff] }
  0xba   :  { %3438 = vmatprep.subr.bf16.mxu1 %v3437_v9  ;;  %v3441_v18 = vpack.c.bf16 %v178_v16, %v175_v15  ;;  %v179_v21 = vld [vmem:[#allocation7 + $0x60] sm:$0xff]  ;;  %3410 = vmatprep.subr.bf16.mxu0 %v3409_v13  ;;  %v3413_v22 = vpack.c.bf16 %v183_v20, %v180_v19  ;;  %v182_v23 = vld [vmem:[#allocation7 + $0x78] sm:$0xff]  ;;  %v181_v24 = vld [vmem:[#allocation7 + $0x70] sm:$0xff] }
  0xbb   :  { %3440 = vmatpush3.bf16.msra.mxu1 %v3437_v9  ;;  %v184_v25 = vld [vmem:[#allocation7 + $0x88] sm:$0xff]  ;;  %v186_v27 = vld [vmem:[#allocation7 + $0x98] sm:$0xff]  ;;  %v189_v28 = vld [vmem:[#allocation7 + $0xb0] sm:$0xff]  ;;  %v3415_v31 = vpack.c.bf16 %v182_v23, %v179_v21 }
  0xbc   :  { %3442 = vmatprep.subr.bf16.mxu1 %v3441_v18  ;;  %v3445_v26 = vpack.c.bf16 %v184_v25, %v181_v24  ;;  %v187_v29 = vld [vmem:[#allocation7 + $0xa0] sm:$0xff]  ;;  %v190_v30 = vld [vmem:[#allocation7 + $0xb8] sm:$0xff]  ;;  %v3417_v32 = vpack.c.bf16 %v189_v28, %v186_v27  ;;  %v185_v33 = vld [vmem:[#allocation7 + $0x90] sm:$0xff] }
  0xbd   :  { %3412 = vmatpush1.bf16.msra.mxu0 %v3411_v17  ;;  %v188_v34 = vld [vmem:[#allocation7 + $0xa8] sm:$0xff]  ;;  %v3449_v35 = vpack.c.bf16 %v190_v30, %v187_v29  ;;  %v195_v37 = vld [vmem:[#allocation7 + $0xe0] sm:$0xff]  ;;  %v193_v38 = vld [vmem:[#allocation7 + $0xd0] sm:$0xff] }
  0xbe   :  { %3414 = vmatprep.subr.bf16.mxu0 %v3413_v22  ;;  %v192_v36 = vld [vmem:[#allocation7 + $0xc8] sm:$0xff]  ;;  %v3419_v40 = vpack.c.bf16 %v188_v34, %v185_v33  ;;  %v191_v42 = vld [vmem:[#allocation7 + $0xc0] sm:$0xff]  ;;  %v194_v43 = vld [vmem:[#allocation7 + $0xd8] sm:$0xff] }
  0xbf   :  { %3444 = vmatpush3.bf16.msra.mxu1 %v3441_v18  ;;  %v196_v39 = vld [vmem:[#allocation7 + $0xe8] sm:$0xff]  ;;  %v3421_v41 = vpack.c.bf16 %v195_v37, %v192_v36  ;;  %v198_v45 = vld [vmem:[#allocation7 + $0xf8] sm:$0xff]  ;;  %v201_v46 = vld [vmem:[#allocation7 + $0x110] sm:$0xff]  ;;  %v3423_v49 = vpack.c.bf16 %v194_v43, %v191_v42 }
  0xc0   :  { %3446 = vmatprep.subr.bf16.mxu1 %v3445_v26  ;;  %v3453_v44 = vpack.c.bf16 %v196_v39, %v193_v38  ;;  %v199_v47 = vld [vmem:[#allocation7 + $0x100] sm:$0xff]  ;;  %v202_v48 = vld [vmem:[#allocation7 + $0x118] sm:$0xff]  ;;  %v3425_v50 = vpack.c.bf16 %v201_v46, %v198_v45  ;;  %v197_v51 = vld [vmem:[#allocation7 + $0xf0] sm:$0xff] }
  0xc1   :  { %3416 = vmatpush1.bf16.msra.mxu0 %v3415_v31  ;;  %v200_v52 = vld [vmem:[#allocation7 + $0x108] sm:$0xff]  ;;  %v3457_v54 = vpack.c.bf16 %v202_v48, %v199_v47  ;;  %v207_v56 = vld [vmem:[#allocation7 + $0x140] sm:$0xff]  ;;  %v205_v57 = vld [vmem:[#allocation7 + $0x130] sm:$0xff] }
  0xc2   :  { %3418 = vmatprep.subr.bf16.mxu0 %v3417_v32  ;;  %v165_v53 = vld [vmem:[#allocation3] sm:$0xff]  ;;  %v3427_v59 = vpack.c.bf16 %v200_v52, %v197_v51  ;;  %v206_v62 = vld [vmem:[#allocation7 + $0x138] sm:$0xff]  ;;  %v213_v2 = vld [vmem:[#allocation7 + $0x170] sm:$0xff] }
  0xc3   :  { %3448 = vmatpush3.bf16.msra.mxu1 %v3445_v26  ;;  %v204_v55 = vld [vmem:[#allocation7 + $0x128] sm:$0xff]  ;;  %3367 = vmatprep.mubr.f32.mxu1 %v165_v53  ;;  %v203_v61 = vld [vmem:[#allocation7 + $0x120] sm:$0xff]  ;;  %v210_v1 = vld [vmem:[#allocation7 + $0x158] sm:$0xff] }
  0xc4   :  { %3450 = vmatprep.subr.bf16.mxu1 %v3449_v35  ;;  %v208_v58 = vld [vmem:[#allocation7 + $0x148] sm:$0xff]  ;;  %v3429_v60 = vpack.c.bf16 %v207_v56, %v204_v55  ;;  %v211_v3 = vld [vmem:[#allocation7 + $0x160] sm:$0xff]  ;;  %v214_v4 = vld [vmem:[#allocation7 + $0x178] sm:$0xff]  ;;  %v3431_v5 = vpack.c.bf16 %v206_v62, %v203_v61  ;;  %v3433_v6 = vpack.c.bf16 %v213_v2, %v210_v1 }
  0xc5   :  { %3420 = vmatpush1.bf16.msra.mxu0 %v3419_v40  ;;  %v3461_v63 = vpack.c.bf16 %v208_v58, %v205_v57  ;;  %v209_v7 = vld [vmem:[#allocation7 + $0x150] sm:$0xff]  ;;  %v212_v8 = vld [vmem:[#allocation7 + $0x168] sm:$0xff]  ;;  %v3465_v9 = vpack.c.bf16 %v214_v4, %v211_v3  ;;  %v393_v15 = vld [vmem:[#allocation10 + $0x18] sm:$0xff] }
  0xc6   :  { %3422 = vmatprep.subr.bf16.mxu0 %v3421_v41  ;;  %v391_v10 = vld [vmem:[#allocation10 + $0x8] sm:$0xff]  ;;  %v394_v11 = vld [vmem:[#allocation10 + $0x20] sm:$0xff]  ;;  %v3435_v12 = vpack.c.bf16 %v212_v8, %v209_v7  ;;  %v397_v18 = vld [vmem:[#allocation10 + $0x38] sm:$0xff] }
  0xc7   :  { %3452 = vmatpush3.bf16.msra.mxu1 %v3449_v35  ;;  %v487_v13 = vld [vmem:[#allocation10 + $0x308] sm:$0xff]  ;;  %v390_v14 = vld [vmem:[#allocation10] sm:$0xff]  ;;  %v3469_v17 = vpack.c.bf16 %v394_v11, %v391_v10  ;;  %v489_v21 = vld [vmem:[#allocation10 + $0x318] sm:$0xff] }
  0xc8   :  { %3454 = vmatprep.subr.bf16.mxu1 %v3453_v44  ;;  %v490_v16 = vld [vmem:[#allocation10 + $0x320] sm:$0xff]  ;;  %v400_v22 = vld [vmem:[#allocation10 + $0x50] sm:$0xff]  ;;  %v493_v23 = vld [vmem:[#allocation10 + $0x338] sm:$0xff]  ;;  %v3471_v26 = vpack.c.bf16 %v393_v15, %v390_v14 }
  0xc9   :  { %3424 = vmatpush1.bf16.msra.mxu0 %v3423_v49  ;;  %v3533_v19 = vpack.c.bf16 %v490_v16, %v487_v13  ;;  %v486_v20 = vld [vmem:[#allocation10 + $0x300] sm:$0xff]  ;;  %v496_v24 = vld [vmem:[#allocation10 + $0x350] sm:$0xff]  ;;  %v166_v25 = vld [vmem:[#allocation3 + $0x8] sm:$0xff]  ;;  %v3473_v30 = vpack.c.bf16 %v400_v22, %v397_v18 }
  0xca   :  { %3426 = vmatprep.subr.bf16.mxu0 %v3425_v50  ;;  %v396_v27 = vld [vmem:[#allocation10 + $0x30] sm:$0xff]  ;;  %v399_v28 = vld [vmem:[#allocation10 + $0x48] sm:$0xff]  ;;  %v3535_v29 = vpack.c.bf16 %v489_v21, %v486_v20  ;;  %v3537_v32 = vpack.c.bf16 %v496_v24, %v493_v23  ;;  %v406_v35 = vld [vmem:[#allocation10 + $0x80] sm:$0xff] }
  0xcb   :  { %3456 = vmatpush3.bf16.msra.mxu1 %v3453_v44  ;;  %v403_v31 = vld [vmem:[#allocation10 + $0x68] sm:$0xff]  ;;  %v492_v33 = vld [vmem:[#allocation10 + $0x330] sm:$0xff]  ;;  %v502_v37 = vld [vmem:[#allocation10 + $0x380] sm:$0xff]  ;;  %v3475_v38 = vpack.c.bf16 %v399_v28, %v396_v27 }
  0xcc   :  { %3458 = vmatprep.subr.bf16.mxu1 %v3457_v54  ;;  %v495_v34 = vld [vmem:[#allocation10 + $0x348] sm:$0xff]  ;;  %v402_v39 = vld [vmem:[#allocation10 + $0x60] sm:$0xff]  ;;  %v405_v40 = vld [vmem:[#allocation10 + $0x78] sm:$0xff]  ;;  %v3477_v42 = vpack.c.bf16 %v406_v35, %v403_v31 }
  0xcd   :  { %3428 = vmatpush1.bf16.msra.mxu0 %v3427_v59  ;;  %v499_v36 = vld [vmem:[#allocation10 + $0x368] sm:$0xff]  ;;  %v3539_v41 = vpack.c.bf16 %v495_v34, %v492_v33  ;;  %v409_v43 = vld [vmem:[#allocation10 + $0x98] sm:$0xff]  ;;  %v498_v45 = vld [vmem:[#allocation10 + $0x360] sm:$0xff]  ;;  %v3479_v50 = vpack.c.bf16 %v405_v40, %v402_v39 }
  0xce   :  { %3430 = vmatprep.subr.bf16.mxu0 %v3429_v60  ;;  %v3541_v44 = vpack.c.bf16 %v502_v37, %v499_v36  ;;  %v501_v46 = vld [vmem:[#allocation10 + $0x378] sm:$0xff]  ;;  %v412_v47 = vld [vmem:[#allocation10 + $0xb0] sm:$0xff]  ;;  %v411_v52 = vld [vmem:[#allocation10 + $0xa8] sm:$0xff] }
  0xcf   :  { %3460 = vmatpush3.bf16.msra.mxu1 %v3457_v54  ;;  %v505_v48 = vld [vmem:[#allocation10 + $0x398] sm:$0xff]  ;;  %v508_v49 = vld [vmem:[#allocation10 + $0x3b0] sm:$0xff]  ;;  %v3481_v54 = vpack.c.bf16 %v412_v47, %v409_v43  ;;  %v415_v55 = vld [vmem:[#allocation10 + $0xc8] sm:$0xff] }
  0xd0   :  { %3462 = vmatprep.subr.bf16.mxu1 %v3461_v63  ;;  %v408_v51 = vld [vmem:[#allocation10 + $0x90] sm:$0xff]  ;;  %v3545_v56 = vpack.c.bf16 %v508_v49, %v505_v48  ;;  %v507_v58 = vld [vmem:[#allocation10 + $0x3a8] sm:$0xff]  ;;  %v418_v59 = vld [vmem:[#allocation10 + $0xe0] sm:$0xff] }
  0xd1   :  { %3432 = vmatpush1.bf16.msra.mxu0 %v3431_v5  ;;  %v504_v57 = vld [vmem:[#allocation10 + $0x390] sm:$0xff]  ;;  %v511_v60 = vld [vmem:[#allocation10 + $0x3c8] sm:$0xff]  ;;  %v514_v61 = vld [vmem:[#allocation10 + $0x3e0] sm:$0xff]  ;;  %v3483_v62 = vpack.c.bf16 %v411_v52, %v408_v51  ;;  %v3485_v3 = vpack.c.bf16 %v418_v59, %v415_v55 }
  0xd2   :  { %3434 = vmatprep.subr.bf16.mxu0 %v3433_v6  ;;  %v417_v1 = vld [vmem:[#allocation10 + $0xd8] sm:$0xff]  ;;  %v3547_v2 = vpack.c.bf16 %v507_v58, %v504_v57  ;;  %v3549_v5 = vpack.c.bf16 %v514_v61, %v511_v60  ;;  %v510_v6 = vld [vmem:[#allocation10 + $0x3c0] sm:$0xff]  ;;  %v424_v8 = vld [vmem:[#allocation10 + $0x110] sm:$0xff] }
  0xd3   :  { %3464 = vmatpush3.bf16.msra.mxu1 %v3461_v63  ;;  %v414_v63 = vld [vmem:[#allocation10 + $0xc0] sm:$0xff]  ;;  %v421_v4 = vld [vmem:[#allocation10 + $0xf8] sm:$0xff]  ;;  %v520_v10 = vld [vmem:[#allocation10 + $0x410] sm:$0xff] }
  0xd4   :  { %3466 = vmatprep.subr.bf16.mxu1 %v3465_v9  ;;  %v513_v7 = vld [vmem:[#allocation10 + $0x3d8] sm:$0xff]  ;;  %v3487_v11 = vpack.c.bf16 %v417_v1, %v414_v63  ;;  %v3489_v14 = vpack.c.bf16 %v424_v8, %v421_v4  ;;  %v423_v15 = vld [vmem:[#allocation10 + $0x108] sm:$0xff]  ;;  %v430_v20 = vld [vmem:[#allocation10 + $0x140] sm:$0xff] }
  0xd5   :  { %3436 = vmatpush1.bf16.msra.mxu0 %v3435_v12  ;;  %v420_v12 = vld [vmem:[#allocation10 + $0xf0] sm:$0xff]  ;;  %v3551_v13 = vpack.c.bf16 %v513_v7, %v510_v6  ;;  %v519_v18 = vld [vmem:[#allocation10 + $0x408] sm:$0xff]  ;;  %v426_v24 = vld [vmem:[#allocation10 + $0x120] sm:$0xff] }
  0xd6   :  { %3534 = vmatprep.subr.bf16.mxu0 %v3533_v19  ;;  %v427_v19 = vld [vmem:[#allocation10 + $0x128] sm:$0xff]  ;;  %v3491_v21 = vpack.c.bf16 %v423_v15, %v420_v12  ;;  %v436_v27 = vld [vmem:[#allocation10 + $0x170] sm:$0xff]  ;;  %v442_v33 = vld [vmem:[#allocation10 + $0x1a0] sm:$0xff] }
  0xd7   :  { %3468 = vmatpush3.bf16.msra.mxu1 %v3465_v9  ;;  %v517_v9 = vld [vmem:[#allocation10 + $0x3f8] sm:$0xff]  ;;  %v3493_v23 = vpack.c.bf16 %v430_v20, %v427_v19  ;;  %v435_v31 = vld [vmem:[#allocation10 + $0x168] sm:$0xff]  ;;  %v438_v36 = vld [vmem:[#allocation10 + $0x180] sm:$0xff] }
  0xd8   :  { %3470 = vmatprep.subr.bf16.mxu1 %v3469_v17  ;;  %297 = vmatmul.mubr.f32.vlgmr.msra.gmra.mrb[0].mxu0 %v165_v53  ;;  %v3543_v53 = vpack.c.bf16 %v501_v46, %v498_v45  ;;  %v3553_v16 = vpack.c.bf16 %v520_v10, %v517_v9  ;;  %v516_v17 = vld [vmem:[#allocation10 + $0x3f0] sm:$0xff]  ;;  %v441_v37 = vld [vmem:[#allocation10 + $0x198] sm:$0xff]  ;;  %v447_v43 = vld [vmem:[#allocation10 + $0x1c8] sm:$0xff] }
  0xd9   :  { %302 = vmatprep.mubr.f32.mxu0 %v4825_v0  ;;  %3536 = vmatpush1.bf16.msra.mxu0 %v3535_v29  ;;  %v3555_v22 = vpack.c.bf16 %v519_v18, %v516_v17  ;;  %v448_v39 = vld [vmem:[#allocation10 + $0x1d0] sm:$0xff]  ;;  %v3503_v40 = vpack.c.bf16 %v441_v37, %v438_v36  ;;  %v454_v45 = vld [vmem:[#allocation10 + $0x200] sm:$0xff]  ;;  %v453_v49 = vld [vmem:[#allocation10 + $0x1f8] sm:$0xff]  ;;  %v217_v36 = vlaneseq }
  0xda   :  { %3368 = vmatmul.mubr.f32.vlgmr.msra.gmra.mrb[0].mxu1 %v166_v25  ;;  %3538 = vmatprep.subr.bf16.mxu0 %v3537_v32  ;;  %v439_v32 = vld [vmem:[#allocation10 + $0x188] sm:$0xff]  ;;  %v450_v48 = vld [vmem:[#allocation10 + $0x1e0] sm:$0xff]  ;;  %v460_v51 = vld [vmem:[#allocation10 + $0x230] sm:$0xff] }
  0xdb   :  { %3472 = vmatpush1.bf16.msra.mxu1 %v3471_v26  ;;  %v433_v26 = vld [vmem:[#allocation10 + $0x158] sm:$0xff]  ;;  %v3501_v35 = vpack.c.bf16 %v442_v33, %v439_v32  ;;  %v3511_v52 = vpack.c.bf16 %v453_v49, %v450_v48  ;;  %v459_v55 = vld [vmem:[#allocation10 + $0x228] sm:$0xff]  ;;  %v466_v57 = vld [vmem:[#allocation10 + $0x260] sm:$0xff]  ;;  %v5018_v37 = vshrl.u32 %v217_v36, 7 }
  0xdc   :  { %3474 = vmatprep.subr.bf16.mxu1 %v3473_v30  ;;  %303 = vmatmul.mubr.f32.gmra.mrb[2].mxu0 %v166_v25  ;;  %v429_v25 = vld [vmem:[#allocation10 + $0x138] sm:$0xff]  ;;  %v3497_v29 = vpack.c.bf16 %v436_v27, %v433_v26  ;;  %v432_v30 = vld [vmem:[#allocation10 + $0x150] sm:$0xff]  ;;  %v462_v60 = vld [vmem:[#allocation10 + $0x240] sm:$0xff] }
  0xdd   :  { %692 = vmatprep.mubr.f32.mxu0 %v4825_v0  ;;  %3540 = vmatpush1.bf16.msra.mxu0 %v3539_v41  ;;  %v3495_v28 = vpack.c.bf16 %v429_v25, %v426_v24  ;;  %v3499_v34 = vpack.c.bf16 %v435_v31, %v432_v30  ;;  %v465_v61 = vld [vmem:[#allocation10 + $0x258] sm:$0xff]  ;;  %v472_v63 = vld [vmem:[#allocation10 + $0x290] sm:$0xff]  ;;  %v471_v4 = vld [vmem:[#allocation10 + $0x288] sm:$0xff] }
  0xde   :  { %3542 = vmatprep.subr.bf16.mxu0 %v3541_v44  ;;  %v451_v44 = vld [vmem:[#allocation10 + $0x1e8] sm:$0xff]  ;;  %v3519_v1 = vpack.c.bf16 %v465_v61, %v462_v60  ;;  %v478_v6 = vld [vmem:[#allocation10 + $0x2c0] sm:$0xff]  ;;  %v477_v10 = vld [vmem:[#allocation10 + $0x2b8] sm:$0xff] }
  0xdf   :  { %3476 = vmatpush1.bf16.msra.mxu1 %v3475_v38  ;;  %v445_v38 = vld [vmem:[#allocation10 + $0x1b8] sm:$0xff]  ;;  %v3509_v47 = vpack.c.bf16 %v454_v45, %v451_v44  ;;  %v474_v9 = vld [vmem:[#allocation10 + $0x2a0] sm:$0xff]  ;;  %v523_v12 = vld [vmem:[#allocation10 + $0x428] sm:$0xff] }
  0xe0   :  { %3478 = vmatprep.subr.bf16.mxu1 %v3477_v42  ;;  %v3505_v41 = vpack.c.bf16 %v448_v39, %v445_v38  ;;  %v444_v42 = vld [vmem:[#allocation10 + $0x1b0] sm:$0xff]  ;;  %v481_v15 = vld [vmem:[#allocation10 + $0x2d8] sm:$0xff]  ;;  %v522_v17 = vld [vmem:[#allocation10 + $0x420] sm:$0xff]  ;;  %v5021_v38 = vsub.s32 0, %v5018_v37 }
  0xe1   :  { %3544 = vmatpush1.bf16.msra.mxu0 %v3543_v53  ;;  %v3507_v46 = vpack.c.bf16 %v447_v43, %v444_v42  ;;  %v525_v19 = vld [vmem:[#allocation10 + $0x438] sm:$0xff]  ;;  %v480_v20 = vld [vmem:[#allocation10 + $0x2d0] sm:$0xff]  ;;  %v443_v31 = vld [vmem:[#allocation10 + $0x1a8] sm:$0xff] }
  0xe2   :  { %3546 = vmatprep.subr.bf16.mxu0 %v3545_v56  ;;  %v463_v56 = vld [vmem:[#allocation10 + $0x248] sm:$0xff]  ;;  %v529_v24 = vld [vmem:[#allocation10 + $0x458] sm:$0xff]  ;;  %v532_v25 = vld [vmem:[#allocation10 + $0x470] sm:$0xff] }
  0xe3   :  { %3480 = vmatpush1.bf16.msra.mxu1 %v3479_v50  ;;  %v457_v50 = vld [vmem:[#allocation10 + $0x218] sm:$0xff]  ;;  %v3517_v59 = vpack.c.bf16 %v466_v57, %v463_v56  ;;  %v3561_v26 = vpack.c.bf16 %v532_v25, %v529_v24  ;;  %v528_v27 = vld [vmem:[#allocation10 + $0x450] sm:$0xff]  ;;  %v869_v56 = vld [vmem:[#allocation13 + $0x40] sm:$0xff] }
  0xe4   :  { %3482 = vmatprep.subr.bf16.mxu1 %v3481_v54  ;;  %v3513_v53 = vpack.c.bf16 %v460_v51, %v457_v50  ;;  %v456_v54 = vld [vmem:[#allocation10 + $0x210] sm:$0xff]  ;;  %v864_v33 = vld [vmem:[#allocation13 + $0x18] sm:$0xff]  ;;  %v395_v50 = vld [vmem:[#allocation10 + $0x28] sm:$0xff] }
  0xe5   :  { %3548 = vmatpush1.bf16.msra.mxu0 %v3547_v2  ;;  %v3515_v58 = vpack.c.bf16 %v459_v55, %v456_v54  ;;  %v215_v39 = vld [vmem:[#allocation8] sm:$0x7]  ;;  %v446_v51 = vld [vmem:[#allocation10 + $0x1c0] sm:$0xff]  ;;  %v863_v55 = vld [vmem:[#allocation13 + $0x10] sm:$0xff] }
  0xe6   :  { %3550 = vmatprep.subr.bf16.mxu0 %v3549_v5  ;;  %v475_v5 = vld [vmem:[#allocation10 + $0x2a8] sm:$0xff]  ;;  %v220_v42 = vrot.slane %v215_v39, %v5021_v38  ;;  %v458_v24 = vld [vmem:[#allocation10 + $0x220] sm:$0xff] }
  0xe7   :  { %3484 = vmatpush1.bf16.msra.mxu1 %v3483_v62  ;;  %v469_v62 = vld [vmem:[#allocation10 + $0x278] sm:$0xff]  ;;  %v3525_v8 = vpack.c.bf16 %v478_v6, %v475_v5  ;;  %v882_v60 = vld [vmem:[#allocation13 + $0xa8] sm:$0xff]  ;;  %v398_v6 = vld [vmem:[#allocation10 + $0x40] sm:$0xff] }
  0xe8   :  { %3486 = vmatprep.subr.bf16.mxu1 %v3485_v3  ;;  %v3521_v2 = vpack.c.bf16 %v472_v63, %v469_v62  ;;  %v468_v3 = vld [vmem:[#allocation10 + $0x270] sm:$0xff] }
  0xe9   :  { %3552 = vmatpush1.bf16.msra.mxu0 %v3551_v13  ;;  %v3523_v7 = vpack.c.bf16 %v471_v4, %v468_v3  ;;  %v526_v13 = vld [vmem:[#allocation10 + $0x440] sm:$0xff] }
  0xea   :  { %3554 = vmatprep.subr.bf16.mxu0 %v3553_v16  ;;  %v484_v16 = vld [vmem:[#allocation10 + $0x2f0] sm:$0xff] }
  0xeb   :  { %3488 = vmatpush1.bf16.msra.mxu1 %v3487_v11  ;;  %v3527_v11 = vpack.c.bf16 %v477_v10, %v474_v9  ;;  %v3529_v18 = vpack.c.bf16 %v484_v16, %v481_v15  ;;  %v3727_v9 = vpack.c.bf16 %v869_v56, %v863_v55  ;;  %v473_v56 = vld [vmem:[#allocation10 + $0x298] sm:$0xff] }
  0xec   :  { %3490 = vmatprep.subr.bf16.mxu1 %v3489_v14  ;;  %v3557_v14 = vpack.c.bf16 %v526_v13, %v523_v12  ;;  %v875_v13 = vld [vmem:[#allocation13 + $0x70] sm:$0xff] }
  0xed   :  { %3556 = vmatpush1.bf16.msra.mxu0 %v3555_v22  ;;  %v3559_v22 = vpack.c.bf16 %v525_v19, %v522_v17  ;;  %v888_v17 = vld [vmem:[#allocation13 + $0xd8] sm:$0xff] }
  0xee   :  { %3558 = vmatprep.subr.bf16.mxu0 %v3557_v14  ;;  %v881_v14 = vld [vmem:[#allocation13 + $0xa0] sm:$0xff] }
  0xef   :  { %3492 = vmatpush1.bf16.msra.mxu1 %v3491_v21  ;;  %v483_v21 = vld [vmem:[#allocation10 + $0x2e8] sm:$0xff]  ;;  %v3731_v25 = vpack.c.bf16 %v881_v14, %v875_v13  ;;  %v923_v13 = vld [vmem:[#allocation13 + $0x1f0] sm:$0xff] }
  0xf0   :  { %3494 = vmatprep.subr.bf16.mxu1 %v3493_v23  ;;  %v3531_v23 = vpack.c.bf16 %v483_v21, %v480_v20  ;;  %v929_v14 = vld [vmem:[#allocation13 + $0x220] sm:$0xff] }
  0xf1   :  { %3560 = vmatpush1.bf16.msra.mxu0 %v3559_v22  ;;  %v404_v22 = vld [vmem:[#allocation10 + $0x70] sm:$0xff] }
  0xf2   :  { %3562 = vmatprep.subr.bf16.mxu0 %v3561_v26  ;;  %v461_v26 = vld [vmem:[#allocation10 + $0x238] sm:$0xff] }
  0xf3   :  { %3496 = vmatpush1.bf16.msra.mxu1 %v3495_v28  ;;  %v531_v28 = vld [vmem:[#allocation10 + $0x468] sm:$0xff] }
  0xf4   :  { %3498 = vmatprep.subr.bf16.mxu1 %v3497_v29  ;;  %v440_v29 = vld [vmem:[#allocation10 + $0x190] sm:$0xff]  ;;  %v3563_v30 = vpack.c.bf16 %v531_v28, %v528_v27 }
  0xf5   :  { %v3565_v32 = vpack.c.bf16 %v443_v31, %v440_v29  ;;  %v887_v28 = vld [vmem:[#allocation13 + $0xd0] sm:$0xff]  ;;  %v893_v29 = vld [vmem:[#allocation13 + $0x100] sm:$0xff]  ;;  %v906_v31 = vld [vmem:[#allocation13 + $0x168] sm:$0xff] }
  0xf6   :  { %3564 = vmatpush1.bf16.msra.mxu0 %v3563_v30  ;;  %v900_v30 = vld [vmem:[#allocation13 + $0x138] sm:$0xff] }
  0xf7   :  { %3500 = vmatpush1.bf16.msra.mxu1 %v3499_v34  ;;  %v870_v34 = vld [vmem:[#allocation13 + $0x48] sm:$0xff] }
  0xf8   :  { %3502 = vmatprep.subr.bf16.mxu1 %v3501_v35  ;;  %v3725_v35 = vpack.c.bf16 %v870_v34, %v864_v33  ;;  %v3577_v33 = vpack.c.bf16 %v461_v26, %v458_v24  ;;  %v410_v34 = vld [vmem:[#allocation10 + $0xa0] sm:$0xff]  ;;  %v485_v26 = vld [vmem:[#allocation10 + $0x2f8] sm:$0xff] }
  0xf9   :  { %v482_v24 = vld [vmem:[#allocation10 + $0x2e0] sm:$0xff] }
  0xfa   :  { %3726 = vmatprep.subr.bf16.mxu0 %v3725_v35  ;;  %v413_v35 = vld [vmem:[#allocation10 + $0xb8] sm:$0xff] }
  0xfb   :  { %3504 = vmatpush1.bf16.msra.mxu1 %v3503_v40  ;;  %v5024_v40 = vsub.s32 1, %v5018_v37 }
  0xfc   :  { %3506 = vmatprep.subr.bf16.mxu1 %v3505_v41  ;;  %v5027_v41 = vsub.s32 2, %v5018_v37 }
  0xfd   :  { %v224_v43 = vrot.slane %v215_v39, %v5024_v40 }
  0xfe   :  { %v228_v44 = vrot.slane %v215_v39, %v5027_v41  ;;  %v464_v39 = vld [vmem:[#allocation10 + $0x250] sm:$0xff] }
  0xff   :  { %3508 = vmatpush1.bf16.msra.mxu1 %v3507_v46  ;;  %v392_v46 = vld [vmem:[#allocation10 + $0x10] sm:$0xff] }
 0x100   :  { %3510 = vmatprep.subr.bf16.mxu1 %v3509_v47  ;;  %v3567_v63 = vpack.c.bf16 %v395_v50, %v392_v46  ;;  %v905_v46 = vld [vmem:[#allocation13 + $0x160] sm:$0xff]  ;;  %v3579_v50 = vpack.c.bf16 %v413_v35, %v410_v34  ;;  %v437_v35 = vld [vmem:[#allocation10 + $0x178] sm:$0xff] }
 0x101   :  { %v434_v34 = vld [vmem:[#allocation10 + $0x160] sm:$0xff] }
 0x103   :  { %3512 = vmatpush1.bf16.msra.mxu1 %v3511_v52  ;;  %v449_v52 = vld [vmem:[#allocation10 + $0x1d8] sm:$0xff] }
 0x104   :  { %3514 = vmatprep.subr.bf16.mxu1 %v3513_v53 }
 0x107   :  { %3516 = vmatpush1.bf16.msra.mxu1 %v3515_v58 }
 0x108   :  { %3518 = vmatprep.subr.bf16.mxu1 %v3517_v59  ;;  %v876_v59 = vld [vmem:[#allocation13 + $0x78] sm:$0xff] }
 0x109   :  { %v3729_v12 = vpack.c.bf16 %v882_v60, %v876_v59  ;;  %v911_v60 = vld [vmem:[#allocation13 + $0x190] sm:$0xff] }
 0x10b   :  { %3520 = vmatpush1.bf16.msra.mxu1 %v3519_v1  ;;  %v3569_v1 = vpack.c.bf16 %v449_v52, %v446_v51  ;;  %v416_v52 = vld [vmem:[#allocation10 + $0xd0] sm:$0xff] }
 0x10c   :  { %3522 = vmatprep.subr.bf16.mxu1 %v3521_v2 }
 0x10f   :  { %3524 = vmatpush1.bf16.msra.mxu1 %v3523_v7  ;;  %v401_v7 = vld [vmem:[#allocation10 + $0x58] sm:$0xff] }
 0x110   :  { %3526 = vmatprep.subr.bf16.mxu1 %v3525_v8  ;;  %v452_v8 = vld [vmem:[#allocation10 + $0x1f0] sm:$0xff]  ;;  %v3571_v20 = vpack.c.bf16 %v401_v7, %v398_v6  ;;  %v422_v6 = vld [vmem:[#allocation10 + $0x100] sm:$0xff]  ;;  %v425_v7 = vld [vmem:[#allocation10 + $0x118] sm:$0xff] }
 0x113   :  { %3528 = vmatpush1.bf16.msra.mxu1 %v3527_v11  ;;  %v455_v11 = vld [vmem:[#allocation10 + $0x208] sm:$0xff] }
 0x114   :  { %3530 = vmatprep.subr.bf16.mxu1 %v3529_v18  ;;  %v894_v18 = vld [vmem:[#allocation13 + $0x108] sm:$0xff]  ;;  %v3573_v21 = vpack.c.bf16 %v455_v11, %v452_v8 }
 0x115   :  { %v3733_v27 = vpack.c.bf16 %v894_v18, %v888_v17  ;;  %v476_v8 = vld [vmem:[#allocation10 + $0x2b0] sm:$0xff]  ;;  %v479_v11 = vld [vmem:[#allocation10 + $0x2c8] sm:$0xff]  ;;  %v936_v17 = vld [vmem:[#allocation13 + $0x258] sm:$0xff] }
 0x116   :  { %v942_v18 = vld [vmem:[#allocation13 + $0x288] sm:$0xff] }
 0x117   :  { %3532 = vmatpush1.bf16.msra.mxu1 %v3531_v23  ;;  %v407_v23 = vld [vmem:[#allocation10 + $0x88] sm:$0xff] }
 0x118   :  { %3566 = vmatprep.subr.bf16.mxu1 %v3565_v32  ;;  %v3575_v32 = vpack.c.bf16 %v407_v23, %v404_v22  ;;  %v428_v22 = vld [vmem:[#allocation10 + $0x130] sm:$0xff]  ;;  %v431_v23 = vld [vmem:[#allocation10 + $0x148] sm:$0xff] }
 0x1ab   :  { %v298_v45 = vpop.f32.mrb[0].mxu0 }
 0x1ac   :  { %v5032_v47 = vadd.f32 %v298_v45, %v220_v42  ;;  %v300_v48 = vpop.f32.mrb[1].mxu0  ;;  %v899_v45 = vld [vmem:[#allocation13 + $0x130] sm:$0xff] }
 0x1ad   :  { %v3369_v49 = vpop.f32.mrb[0].mxu1  ;;  %v301_v53 = vadd.f32 %v300_v48, %v224_v43  ;;  %v912_v48 = vld [vmem:[#allocation13 + $0x198] sm:$0xff]  ;;  %v3739_v55 = vpack.c.bf16 %v905_v46, %v899_v45  ;;  %v947_v45 = vld [vmem:[#allocation13 + $0x2b0] sm:$0xff]  ;;  %v953_v46 = vld [vmem:[#allocation13 + $0x2e0] sm:$0xff] }
 0x1ae   :  { %v375_v54 = vpop.f32.mrb[1].mxu1  ;;  %v5034_v57 = vadd.f32 %v3369_v49, %v228_v44  ;;  %v384_v2 = vmax.f32 %v5032_v47, 0.0  ;;  %v918_v49 = vld [vmem:[#allocation13 + $0x1c8] sm:$0xff]  ;;  %v996_v47 = vld [vmem:[#allocation13 + $0x438] sm:$0xff] }
 0x1af   :  { %v5036_v58 = vadd.f32 %v375_v54, %v228_v44  ;;  %v385_v61 = vmax.f32 %v301_v53, 0.0  ;;  %v304_v62 = vpop.f32.mrb[2].mxu0  ;;  %v3737_v44 = vpack.c.bf16 %v906_v31, %v900_v30  ;;  %v419_v53 = vld [vmem:[#allocation10 + $0xe8] sm:$0xff]  ;;  %v470_v54 = vld [vmem:[#allocation10 + $0x280] sm:$0xff]  ;;  %v3741_v59 = vpack.c.bf16 %v918_v49, %v912_v48 }
 0x1b0   :  { %v5039_v3 = vadd.f32 %v304_v62, %v220_v42  ;;  %v306_v5 = vpop.f32.mrb[3].mxu0  ;;  %v389_v15 = vmax.f32 %v5034_v57, 0.0  ;;  %v3735_v42 = vpack.c.bf16 %v893_v29, %v887_v28  ;;  %v924_v62 = vld [vmem:[#allocation13 + $0x1f8] sm:$0xff]  ;;  %v935_v28 = vld [vmem:[#allocation13 + $0x250] sm:$0xff]  ;;  %v941_v29 = vld [vmem:[#allocation13 + $0x280] sm:$0xff] }
 0x1b1   :  { %v386_v4 = vmax.f32 %v5036_v58, 0.0  ;;  %v5042_v10 = vadd.f32 %v306_v5, %v224_v43  ;;  %615 = vmatprep.mubr.f32.mxu1 %v385_v61  ;;  %v467_v43 = vld [vmem:[#allocation10 + $0x268] sm:$0xff]  ;;  %v3585_v5 = vpack.c.bf16 %v473_v56, %v470_v54  ;;  %v948_v30 = vld [vmem:[#allocation13 + $0x2b8] sm:$0xff]  ;;  %v959_v56 = vld [vmem:[#allocation13 + $0x310] sm:$0xff] }
 0x1b2   :  { %v387_v16 = vmax.f32 %v5039_v3, 0.0  ;;  %616 = vmatmul.mubr.f32.vlgmr.msra.gmra.mrb[2].mxu1 %v384_v2  ;;  %v3581_v51 = vpack.c.bf16 %v467_v43, %v464_v39  ;;  %v954_v31 = vld [vmem:[#allocation13 + $0x2e8] sm:$0xff]  ;;  %v960_v48 = vld [vmem:[#allocation13 + $0x318] sm:$0xff] }
 0x1b3   :  { %693 = vmatmul.mubr.f32.vlgmr.msra.gmra.mrb[4].mxu0 %v386_v4  ;;  %v388_v19 = vmax.f32 %v5042_v10, 0.0  ;;  %3568 = vmatpush3.bf16.msra.mxu1 %v3567_v63  ;;  %v930_v63 = vld [vmem:[#allocation13 + $0x228] sm:$0xff]  ;;  %v497_v54 = vld [vmem:[#allocation10 + $0x358] sm:$0xff] }
 0x1b4   :  { %698 = vmatprep.mubr.f32.mxu0 %v4825_v0  ;;  %3570 = vmatprep.subr.bf16.mxu1 %v3569_v1  ;;  %v3583_v1 = vpack.c.bf16 %v419_v53, %v416_v52  ;;  %v488_v39 = vld [vmem:[#allocation10 + $0x310] sm:$0xff]  ;;  %v491_v43 = vld [vmem:[#allocation10 + $0x328] sm:$0xff]  ;;  %v494_v52 = vld [vmem:[#allocation10 + $0x340] sm:$0xff]  ;;  %v3755_v53 = vpack.c.bf16 %v953_v46, %v947_v45 }
 0x1b5   :  { %3728 = vmatpush1.bf16.msra.mxu0 %v3727_v9  ;;  %621 = vmatprep.mubr.f32.mxu1 %v388_v19  ;;  %v966_v49 = vld [vmem:[#allocation13 + $0x348] sm:$0xff]  ;;  %v521_v58 = vld [vmem:[#allocation10 + $0x418] sm:$0xff]  ;;  %v1025_v45 = vld [vmem:[#allocation13 + $0x520] sm:$0xff] }
 0x1b6   :  { %3730 = vmatprep.subr.bf16.mxu0 %v3729_v12  ;;  %622 = vmatmul.mubr.f32.gmra.mrb[4].mxu1 %v387_v16  ;;  %v3745_v12 = vpack.c.bf16 %v930_v63, %v924_v62  ;;  %v3601_v62 = vpack.c.bf16 %v497_v54, %v494_v52  ;;  %v500_v63 = vld [vmem:[#allocation10 + $0x370] sm:$0xff] }
 0x1b7   :  { %699 = vmatmul.mubr.f32.gmra.mrb[6].mxu0 %v389_v15  ;;  %3572 = vmatpush3.bf16.msra.mxu1 %v3571_v20  ;;  %v3587_v20 = vpack.c.bf16 %v425_v7, %v422_v6  ;;  %v971_v7 = vld [vmem:[#allocation13 + $0x370] sm:$0xff]  ;;  %v862_v52 = vld [vmem:[#allocation13 + $0x8] sm:$0xff] }
 0x1b8   :  { %769 = vmatprep.mubr.f32.mxu1 %v385_v61  ;;  %3574 = vmatprep.subr.bf16.mxu1 %v3573_v21  ;;  %v917_v61 = vld [vmem:[#allocation13 + $0x1c0] sm:$0xff]  ;;  %v3589_v21 = vpack.c.bf16 %v479_v11, %v476_v8  ;;  %v990_v11 = vld [vmem:[#allocation13 + $0x408] sm:$0xff] }
 0x1b9   :  { %3732 = vmatpush1.bf16.msra.mxu0 %v3731_v25  ;;  %v3743_v9 = vpack.c.bf16 %v917_v61, %v911_v60  ;;  %v3747_v25 = vpack.c.bf16 %v929_v14, %v923_v13  ;;  %v972_v60 = vld [vmem:[#allocation13 + $0x378] sm:$0xff]  ;;  %v978_v61 = vld [vmem:[#allocation13 + $0x3a8] sm:$0xff]  ;;  %v977_v8 = vld [vmem:[#allocation13 + $0x3a0] sm:$0xff] }
 0x1ba   :  { %3734 = vmatprep.subr.bf16.mxu0 %v3733_v27  ;;  %v3749_v27 = vpack.c.bf16 %v942_v18, %v936_v17  ;;  %v3761_v6 = vpack.c.bf16 %v978_v61, %v972_v60  ;;  %v506_v13 = vld [vmem:[#allocation10 + $0x3a0] sm:$0xff]  ;;  %v3763_v14 = vpack.c.bf16 %v977_v8, %v971_v7  ;;  %v509_v17 = vld [vmem:[#allocation10 + $0x3b8] sm:$0xff] }
 0x1bb   :  { %3576 = vmatpush3.bf16.msra.mxu1 %v3575_v32  ;;  %v3591_v32 = vpack.c.bf16 %v431_v23, %v428_v22  ;;  %v3609_v10 = vpack.c.bf16 %v509_v17, %v506_v13  ;;  %v515_v23 = vld [vmem:[#allocation10 + $0x3e8] sm:$0xff]  ;;  %v880_v60 = vld [vmem:[#allocation13 + $0x98] sm:$0xff] }
 0x1bc   :  { %3578 = vmatprep.subr.bf16.mxu1 %v3577_v33  ;;  %v3593_v33 = vpack.c.bf16 %v485_v26, %v482_v24  ;;  %v1001_v26 = vld [vmem:[#allocation13 + $0x460] sm:$0xff]  ;;  %v904_v13 = vld [vmem:[#allocation13 + $0x158] sm:$0xff] }
 0x1bd   :  { %3736 = vmatpush1.bf16.msra.mxu0 %v3735_v42  ;;  %v3751_v42 = vpack.c.bf16 %v941_v29, %v935_v28  ;;  %v1014_v28 = vld [vmem:[#allocation13 + $0x4c8] sm:$0xff] }
 0x1be   :  { %3738 = vmatprep.subr.bf16.mxu0 %v3737_v44  ;;  %v3753_v44 = vpack.c.bf16 %v954_v31, %v948_v30  ;;  %v1007_v30 = vld [vmem:[#allocation13 + $0x490] sm:$0xff]  ;;  %v1013_v31 = vld [vmem:[#allocation13 + $0x4c0] sm:$0xff] }
 0x1bf   :  { %3580 = vmatpush3.bf16.msra.mxu1 %v3579_v50  ;;  %v3595_v50 = vpack.c.bf16 %v437_v35, %v434_v34  ;;  %v524_v35 = vld [vmem:[#allocation10 + $0x430] sm:$0xff] }
 0x1c0   :  { %3582 = vmatprep.subr.bf16.mxu1 %v3581_v51  ;;  %v3597_v51 = vpack.c.bf16 %v491_v43, %v488_v39  ;;  %v3775_v39 = vpack.c.bf16 %v1013_v31, %v1007_v30  ;;  %v946_v30 = vld [vmem:[#allocation13 + $0x2a8] sm:$0xff]  ;;  %v952_v31 = vld [vmem:[#allocation13 + $0x2d8] sm:$0xff] }
 0x1c1   :  { %3740 = vmatpush1.bf16.msra.mxu0 %v3739_v55  ;;  %v3757_v55 = vpack.c.bf16 %v966_v49, %v960_v48  ;;  %v530_v49 = vld [vmem:[#allocation10 + $0x460] sm:$0xff] }
 0x1c2   :  { %3742 = vmatprep.subr.bf16.mxu0 %v3741_v59  ;;  %v965_v59 = vld [vmem:[#allocation13 + $0x340] sm:$0xff] }
 0x1c3   :  { %3584 = vmatpush3.bf16.msra.mxu1 %v3583_v1  ;;  %v3759_v1 = vpack.c.bf16 %v965_v59, %v959_v56  ;;  %v867_v56 = vld [vmem:[#allocation13 + $0x30] sm:$0xff]  ;;  %v874_v59 = vld [vmem:[#allocation13 + $0x68] sm:$0xff] }
 0x1c4   :  { %3586 = vmatprep.subr.bf16.mxu1 %v3585_v5  ;;  %v503_v5 = vld [vmem:[#allocation10 + $0x388] sm:$0xff] }
 0x1c5   :  { %3744 = vmatpush1.bf16.msra.mxu0 %v3743_v9  ;;  %v984_v9 = vld [vmem:[#allocation13 + $0x3d8] sm:$0xff] }
 0x1c6   :  { %3746 = vmatprep.subr.bf16.mxu0 %v3745_v12  ;;  %v3605_v12 = vpack.c.bf16 %v503_v5, %v500_v63  ;;  %v3765_v18 = vpack.c.bf16 %v990_v11, %v984_v9  ;;  %v873_v63 = vld [vmem:[#allocation13 + $0x60] sm:$0xff]  ;;  %v886_v5 = vld [vmem:[#allocation13 + $0xc8] sm:$0xff]  ;;  %v891_v11 = vld [vmem:[#allocation13 + $0xf0] sm:$0xff] }
 0x1c7   :  { %3588 = vmatpush3.bf16.msra.mxu1 %v3587_v20  ;;  %v983_v20 = vld [vmem:[#allocation13 + $0x3d0] sm:$0xff]  ;;  %v885_v9 = vld [vmem:[#allocation13 + $0xc0] sm:$0xff] }
 0x1c8   :  { %3590 = vmatprep.subr.bf16.mxu1 %v3589_v21  ;;  %v989_v21 = vld [vmem:[#allocation13 + $0x400] sm:$0xff] }
 0x1c9   :  { %3748 = vmatpush1.bf16.msra.mxu0 %v3747_v25  ;;  %v3767_v22 = vpack.c.bf16 %v989_v21, %v983_v20  ;;  %v995_v25 = vld [vmem:[#allocation13 + $0x430] sm:$0xff]  ;;  %v910_v21 = vld [vmem:[#allocation13 + $0x188] sm:$0xff] }
 0x1ca   :  { %3750 = vmatprep.subr.bf16.mxu0 %v3749_v27  ;;  %v1008_v27 = vld [vmem:[#allocation13 + $0x498] sm:$0xff]  ;;  %v3771_v29 = vpack.c.bf16 %v1001_v26, %v995_v25  ;;  %v903_v20 = vld [vmem:[#allocation13 + $0x150] sm:$0xff]  ;;  %v921_v25 = vld [vmem:[#allocation13 + $0x1e0] sm:$0xff] }
 0x1cb   :  { %3592 = vmatpush3.bf16.msra.mxu1 %v3591_v32  ;;  %v1020_v32 = vld [vmem:[#allocation13 + $0x4f8] sm:$0xff]  ;;  %v927_v26 = vld [vmem:[#allocation13 + $0x210] sm:$0xff] }
 0x1cc   :  { %3594 = vmatprep.subr.bf16.mxu1 %v3593_v33  ;;  %v1026_v33 = vld [vmem:[#allocation13 + $0x528] sm:$0xff] }
 0x1cd   :  { %3752 = vmatpush1.bf16.msra.mxu0 %v3751_v42  ;;  %v527_v42 = vld [vmem:[#allocation10 + $0x448] sm:$0xff]  ;;  %v3777_v43 = vpack.c.bf16 %v1026_v33, %v1020_v32 }
 0x1ce   :  { %3754 = vmatprep.subr.bf16.mxu0 %v3753_v44  ;;  %v1019_v44 = vld [vmem:[#allocation13 + $0x4f0] sm:$0xff]  ;;  %v3621_v46 = vpack.c.bf16 %v527_v42, %v524_v35  ;;  %v1038_v32 = vld [vmem:[#allocation13 + $0x588] sm:$0xff]  ;;  %v1037_v35 = vld [vmem:[#allocation13 + $0x580] sm:$0xff] }
 0x1cf   :  { %3596 = vmatpush3.bf16.msra.mxu1 %v3595_v50  ;;  %v3779_v48 = vpack.c.bf16 %v1025_v45, %v1019_v44  ;;  %v533_v50 = vld [vmem:[#allocation10 + $0x478] sm:$0xff]  ;;  %v945_v44 = vld [vmem:[#allocation13 + $0x2a0] sm:$0xff] }
 0x1d0   :  { %3598 = vmatprep.subr.bf16.mxu1 %v3597_v51  ;;  %v951_v45 = vld [vmem:[#allocation13 + $0x2d0] sm:$0xff] }
 0x1d1   :  { %3756 = vmatpush1.bf16.msra.mxu0 %v3755_v53  ;;  %v868_v53 = vld [vmem:[#allocation13 + $0x38] sm:$0xff] }
 0x1d2   :  { %3758 = vmatprep.subr.bf16.mxu0 %v3757_v55  ;;  %770 = vmatmul.mubr.f32.vlgmr.msra.gmra.mrb[6].mxu1 %v384_v2  ;;  %v1002_v2 = vld [vmem:[#allocation13 + $0x468] sm:$0xff]  ;;  %v3629_v54 = vpack.c.bf16 %v868_v53, %v862_v52  ;;  %v861_v55 = vld [vmem:[#allocation13] sm:$0xff]  ;;  %v1043_v52 = vld [vmem:[#allocation13 + $0x5b0] sm:$0xff] }
 0x1d3   :  { %774 = vmatprep.mubr.f32.mxu1 %v388_v19  ;;  %3600 = vmatpush3.bf16.msra.mxu1 %v3597_v51  ;;  %v512_v19 = vld [vmem:[#allocation10 + $0x3d0] sm:$0xff]  ;;  %v3769_v24 = vpack.c.bf16 %v1002_v2, %v996_v47  ;;  %v3625_v51 = vpack.c.bf16 %v533_v50, %v530_v49  ;;  %v3631_v61 = vpack.c.bf16 %v867_v56, %v861_v55  ;;  %v916_v47 = vld [vmem:[#allocation13 + $0x1b8] sm:$0xff]  ;;  %v1049_v53 = vld [vmem:[#allocation13 + $0x5e0] sm:$0xff] }
 0x1d4   :  { %3602 = vmatprep.subr.bf16.mxu1 %v3601_v62  ;;  %v3613_v3 = vpack.c.bf16 %v515_v23, %v512_v19  ;;  %v3645_v57 = vpack.c.bf16 %v916_v47, %v910_v21  ;;  %v922_v19 = vld [vmem:[#allocation13 + $0x1e8] sm:$0xff]  ;;  %v964_v49 = vld [vmem:[#allocation13 + $0x338] sm:$0xff]  ;;  %v3787_v55 = vpack.c.bf16 %v1049_v53, %v1043_v52  ;;  %v993_v21 = vld [vmem:[#allocation13 + $0x420] sm:$0xff] }
 0x1d5   :  { %3760 = vmatpush1.bf16.msra.mxu0 %v3759_v1  ;;  %v879_v1 = vld [vmem:[#allocation13 + $0x90] sm:$0xff]  ;;  %v1050_v50 = vld [vmem:[#allocation13 + $0x5e8] sm:$0xff] }
 0x1d6   :  { %3762 = vmatprep.subr.bf16.mxu0 %v3761_v6  ;;  %775 = vmatmul.mubr.f32.gmra.mrb[8].mxu1 %v387_v16  ;;  %v518_v16 = vld [vmem:[#allocation10 + $0x400] sm:$0xff]  ;;  %v3635_v7 = vpack.c.bf16 %v879_v1, %v873_v63  ;;  %v999_v47 = vld [vmem:[#allocation13 + $0x450] sm:$0xff] }
 0x1d7   :  { %3604 = vmatpush3.bf16.msra.mxu1 %v3601_v62  ;;  %3402 = vmatprep.mubr.f32.mxu1 %v386_v4  ;;  %v3773_v4 = vpack.c.bf16 %v1014_v28, %v1008_v27  ;;  %v3617_v34 = vpack.c.bf16 %v521_v58, %v518_v16  ;;  %v3633_v62 = vpack.c.bf16 %v880_v60, %v874_v59  ;;  %v892_v6 = vld [vmem:[#allocation13 + $0xf8] sm:$0xff]  ;;  %v934_v27 = vld [vmem:[#allocation13 + $0x248] sm:$0xff]  ;;  %v939_v58 = vld [vmem:[#allocation13 + $0x270] sm:$0xff] }
 0x1d8   :  { %3606 = vmatprep.subr.bf16.mxu1 %v3605_v12  ;;  %v3637_v8 = vpack.c.bf16 %v892_v6, %v886_v5  ;;  %v940_v28 = vld [vmem:[#allocation13 + $0x278] sm:$0xff]  ;;  %v957_v59 = vld [vmem:[#allocation13 + $0x300] sm:$0xff]  ;;  %v963_v60 = vld [vmem:[#allocation13 + $0x330] sm:$0xff] }
 0x1d9   :  { %3764 = vmatpush1.bf16.msra.mxu0 %v3763_v14  ;;  %v3639_v14 = vpack.c.bf16 %v891_v11, %v885_v9  ;;  %v3653_v16 = vpack.c.bf16 %v940_v28, %v934_v27  ;;  %v3663_v63 = vpack.c.bf16 %v963_v60, %v957_v59  ;;  %v969_v5 = vld [vmem:[#allocation13 + $0x360] sm:$0xff]  ;;  %v975_v6 = vld [vmem:[#allocation13 + $0x390] sm:$0xff] }
 0x1da   :  { %3766 = vmatprep.subr.bf16.mxu0 %v3765_v18  ;;  %v897_v18 = vld [vmem:[#allocation13 + $0x120] sm:$0xff]  ;;  %v3667_v9 = vpack.c.bf16 %v975_v6, %v969_v5  ;;  %v1023_v28 = vld [vmem:[#allocation13 + $0x510] sm:$0xff]  ;;  %v1066_v6 = vld [vmem:[#allocation13 + $0x668] sm:$0xff] }
 0x1db   :  { %3608 = vmatpush3.bf16.msra.mxu1 %v3605_v12  ;;  %v898_v12 = vld [vmem:[#allocation13 + $0x128] sm:$0xff]  ;;  %v3643_v2 = vpack.c.bf16 %v903_v20, %v897_v18  ;;  %v1017_v27 = vld [vmem:[#allocation13 + $0x4e0] sm:$0xff] }
 0x1dc   :  { %3610 = vmatprep.subr.bf16.mxu1 %v3609_v10  ;;  %v3641_v17 = vpack.c.bf16 %v904_v13, %v898_v12  ;;  %v981_v12 = vld [vmem:[#allocation13 + $0x3c0] sm:$0xff]  ;;  %v987_v13 = vld [vmem:[#allocation13 + $0x3f0] sm:$0xff] }
 0x1dd   :  { %3768 = vmatpush1.bf16.msra.mxu0 %v3767_v22  ;;  %v928_v22 = vld [vmem:[#allocation13 + $0x218] sm:$0xff]  ;;  %v3671_v18 = vpack.c.bf16 %v987_v13, %v981_v12  ;;  %v1061_v5 = vld [vmem:[#allocation13 + $0x640] sm:$0xff]  ;;  %v1074_v13 = vld [vmem:[#allocation13 + $0x6a8] sm:$0xff] }
 0x1de   :  { %3770 = vmatprep.subr.bf16.mxu0 %v3769_v24  ;;  %v3649_v24 = vpack.c.bf16 %v928_v22, %v922_v19  ;;  %v1005_v19 = vld [vmem:[#allocation13 + $0x480] sm:$0xff]  ;;  %v1011_v22 = vld [vmem:[#allocation13 + $0x4b0] sm:$0xff]  ;;  %v1068_v12 = vld [vmem:[#allocation13 + $0x678] sm:$0xff] }
 0x1df   :  { %3612 = vmatpush3.bf16.msra.mxu1 %v3609_v10  ;;  %v915_v10 = vld [vmem:[#allocation13 + $0x1b0] sm:$0xff] }
 0x1e0   :  { %3614 = vmatprep.subr.bf16.mxu1 %v3613_v3 }
 0x1e1   :  { %3772 = vmatpush1.bf16.msra.mxu0 %v3771_v29  ;;  %v933_v29 = vld [vmem:[#allocation13 + $0x240] sm:$0xff] }
 0x1e2   :  { %3774 = vmatprep.subr.bf16.mxu0 %v3773_v4  ;;  %v1032_v4 = vld [vmem:[#allocation13 + $0x558] sm:$0xff] }
 0x1e3   :  { %3616 = vmatpush3.bf16.msra.mxu1 %v3613_v3  ;;  %v3651_v3 = vpack.c.bf16 %v927_v26, %v921_v25  ;;  %v3781_v33 = vpack.c.bf16 %v1038_v32, %v1032_v4  ;;  %v3679_v25 = vpack.c.bf16 %v1011_v22, %v1005_v19  ;;  %v1029_v4 = vld [vmem:[#allocation13 + $0x540] sm:$0xff]  ;;  %v1048_v32 = vld [vmem:[#allocation13 + $0x5d8] sm:$0xff] }
 0x1e4   :  { %3618 = vmatprep.subr.bf16.mxu1 %v3617_v34 }
 0x1e5   :  { %3776 = vmatpush1.bf16.msra.mxu0 %v3775_v39  ;;  %v3655_v39 = vpack.c.bf16 %v939_v58, %v933_v29  ;;  %v3683_v29 = vpack.c.bf16 %v1023_v28, %v1017_v27  ;;  %v1084_v28 = vld [vmem:[#allocation13 + $0x6f8] sm:$0xff] }
 0x1e6   :  { %3778 = vmatprep.subr.bf16.mxu0 %v3777_v43  ;;  %v3657_v43 = vpack.c.bf16 %v952_v31, %v946_v30  ;;  %v1035_v30 = vld [vmem:[#allocation13 + $0x570] sm:$0xff]  ;;  %v1042_v31 = vld [vmem:[#allocation13 + $0x5a8] sm:$0xff] }
 0x1e7   :  { %3620 = vmatpush3.bf16.msra.mxu1 %v3617_v34  ;;  %v1031_v34 = vld [vmem:[#allocation13 + $0x550] sm:$0xff] }
 0x1e8   :  { %3622 = vmatprep.subr.bf16.mxu1 %v3621_v46  ;;  %v3783_v42 = vpack.c.bf16 %v1037_v35, %v1031_v34  ;;  %v1056_v34 = vld [vmem:[#allocation13 + $0x618] sm:$0xff]  ;;  %v3689_v35 = vpack.c.bf16 %v1048_v32, %v1042_v31  ;;  %v1077_v31 = vld [vmem:[#allocation13 + $0x6c0] sm:$0xff]  ;;  %v1083_v32 = vld [vmem:[#allocation13 + $0x6f0] sm:$0xff] }
 0x1e9   :  { %3780 = vmatpush1.bf16.msra.mxu0 %v3779_v48  ;;  %v958_v48 = vld [vmem:[#allocation13 + $0x308] sm:$0xff] }
 0x1ea   :  { %3782 = vmatprep.subr.bf16.mxu0 %v3781_v33  ;;  %v3661_v56 = vpack.c.bf16 %v964_v49, %v958_v48  ;;  %v3687_v33 = vpack.c.bf16 %v1035_v30, %v1029_v4 }
 0x1eb   :  { %3624 = vmatpush3.bf16.msra.mxu1 %v3621_v46  ;;  %v1044_v46 = vld [vmem:[#allocation13 + $0x5b8] sm:$0xff] }
 0x1ec   :  { %3626 = vmatprep.subr.bf16.mxu1 %v3625_v51 }
 0x1ed   :  { %3784 = vmatpush1.bf16.msra.mxu0 %v3783_v42  ;;  %v1047_v42 = vld [vmem:[#allocation13 + $0x5d0] sm:$0xff] }
 0x1ef   :  { %3628 = vmatpush3.bf16.msra.mxu1 %v3625_v51  ;;  %v3785_v51 = vpack.c.bf16 %v1050_v50, %v1044_v46  ;;  %v5068_v50 = vld [vmem:[#allocation11] sm:$0x7] }
 0x1f0   :  { %3630 = vmatprep.subr.bf16.mxu1 %v3629_v54  ;;  %v3659_v54 = vpack.c.bf16 %v951_v45, %v945_v44  ;;  %v1054_v44 = vld [vmem:[#allocation13 + $0x608] sm:$0xff]  ;;  %v1060_v45 = vld [vmem:[#allocation13 + $0x638] sm:$0xff]  ;;  %v543_v52 = vrot.slane %v5068_v50, %v5024_v40 }
 0x1f1   :  { %3786 = vmatprep.subr.bf16.mxu0 %v3785_v51  ;;  %v3693_v49 = vpack.c.bf16 %v1060_v45, %v1054_v44  ;;  %v539_v51 = vrot.slane %v5068_v50, %v5021_v38  ;;  %v1092_v44 = vld [vmem:[#allocation13 + $0x738] sm:$0xff]  ;;  %v1098_v45 = vld [vmem:[#allocation13 + $0x768] sm:$0xff] }
 0x1f2   :  { %3403 = vmatmul.mubr.f32.vlgmr.msra.gmra.mrb[10].mxu1 %v389_v15  ;;  %v909_v15 = vld [vmem:[#allocation13 + $0x180] sm:$0xff]  ;;  %3788 = vmatpush1.bf16.msra.mxu0 %v3787_v55 }
 0x1f3   :  { %3632 = vmatpush1.bf16.msra.mxu1 %v3631_v61  ;;  %v3647_v23 = vpack.c.bf16 %v915_v10, %v909_v15  ;;  %v970_v61 = vld [vmem:[#allocation13 + $0x368] sm:$0xff]  ;;  %v3675_v15 = vpack.c.bf16 %v999_v47, %v993_v21 }
 0x1f4   :  { %3634 = vmatprep.subr.bf16.mxu1 %v3633_v62  ;;  %v976_v62 = vld [vmem:[#allocation13 + $0x398] sm:$0xff] }
 0x1f5   :  { %v3665_v1 = vpack.c.bf16 %v976_v62, %v970_v61  ;;  %v1053_v61 = vld [vmem:[#allocation13 + $0x600] sm:$0xff]  ;;  %v1059_v62 = vld [vmem:[#allocation13 + $0x630] sm:$0xff] }
 0x1f6   :  { %v3695_v47 = vpack.c.bf16 %v1059_v62, %v1053_v61  ;;  %v1110_v61 = vld [vmem:[#allocation13 + $0x7c8] sm:$0xff] }
 0x1f7   :  { %3636 = vmatpush1.bf16.msra.mxu1 %v3635_v7  ;;  %v982_v7 = vld [vmem:[#allocation13 + $0x3c8] sm:$0xff] }
 0x1f8   :  { %3638 = vmatprep.subr.bf16.mxu1 %v3637_v8  ;;  %v988_v8 = vld [vmem:[#allocation13 + $0x3f8] sm:$0xff] }
 0x1f9   :  { %v3669_v11 = vpack.c.bf16 %v988_v8, %v982_v7 }
 0x1fb   :  { %3640 = vmatpush1.bf16.msra.mxu1 %v3639_v14  ;;  %v994_v14 = vld [vmem:[#allocation13 + $0x428] sm:$0xff] }
 0x1fc   :  { %3642 = vmatprep.subr.bf16.mxu1 %v3641_v17  ;;  %v1000_v17 = vld [vmem:[#allocation13 + $0x458] sm:$0xff] }
 0x1fd   :  { %v3673_v20 = vpack.c.bf16 %v1000_v17, %v994_v14 }
 0x1ff   :  { %3644 = vmatpush1.bf16.msra.mxu1 %v3643_v2  ;;  %v1006_v2 = vld [vmem:[#allocation13 + $0x488] sm:$0xff] }
 0x200   :  { %3646 = vmatprep.subr.bf16.mxu1 %v3645_v57  ;;  %v1012_v57 = vld [vmem:[#allocation13 + $0x4b8] sm:$0xff] }
 0x201   :  { %v3677_v10 = vpack.c.bf16 %v1012_v57, %v1006_v2  ;;  %v1065_v57 = vld [vmem:[#allocation13 + $0x660] sm:$0xff] }
 0x203   :  { %3648 = vmatpush1.bf16.msra.mxu1 %v3647_v23  ;;  %v1018_v23 = vld [vmem:[#allocation13 + $0x4e8] sm:$0xff] }
 0x204   :  { %3650 = vmatprep.subr.bf16.mxu1 %v3649_v24  ;;  %v1024_v24 = vld [vmem:[#allocation13 + $0x518] sm:$0xff] }
 0x205   :  { %v3681_v26 = vpack.c.bf16 %v1024_v24, %v1018_v23  ;;  %v3793_v23 = vpack.c.bf16 %v1074_v13, %v1068_v12  ;;  %v1067_v24 = vld [vmem:[#allocation13 + $0x670] sm:$0xff]  ;;  %v1120_v12 = vld [vmem:[#allocation13 + $0x818] sm:$0xff] }
 0x206   :  { %v1116_v13 = vld [vmem:[#allocation13 + $0x7f8] sm:$0xff] }
 0x207   :  { %3652 = vmatpush1.bf16.msra.mxu1 %v3651_v3  ;;  %v1030_v3 = vld [vmem:[#allocation13 + $0x548] sm:$0xff] }
 0x208   :  { %3654 = vmatprep.subr.bf16.mxu1 %v3653_v16  ;;  %v1036_v16 = vld [vmem:[#allocation13 + $0x578] sm:$0xff] }
 0x209   :  { %v3685_v58 = vpack.c.bf16 %v1036_v16, %v1030_v3  ;;  %v1080_v3 = vld [vmem:[#allocation13 + $0x6d8] sm:$0xff]  ;;  %v1086_v16 = vld [vmem:[#allocation13 + $0x708] sm:$0xff] }
 0x20b   :  { %3656 = vmatpush1.bf16.msra.mxu1 %v3655_v39  ;;  %v1041_v39 = vld [vmem:[#allocation13 + $0x5a0] sm:$0xff] }
 0x20c   :  { %3658 = vmatprep.subr.bf16.mxu1 %v3657_v43  ;;  %v1062_v43 = vld [vmem:[#allocation13 + $0x648] sm:$0xff]  ;;  %v3691_v48 = vpack.c.bf16 %v1047_v42, %v1041_v39  ;;  %v1085_v39 = vld [vmem:[#allocation13 + $0x700] sm:$0xff] }
 0x20d   :  { %v3789_v46 = vpack.c.bf16 %v1062_v43, %v1056_v34  ;;  %v3797_v34 = vpack.c.bf16 %v1086_v16, %v1080_v3  ;;  %v1090_v42 = vld [vmem:[#allocation13 + $0x728] sm:$0xff]  ;;  %v1096_v43 = vld [vmem:[#allocation13 + $0x758] sm:$0xff]  ;;  %v1131_v3 = vld [vmem:[#allocation13 + $0x870] sm:$0xff] }
 0x20f   :  { %3660 = vmatpush1.bf16.msra.mxu1 %v3659_v54  ;;  %3790 = vmatprep.subr.bf16.mxu0 %v3789_v46  ;;  %v3703_v46 = vpack.c.bf16 %v1083_v32, %v1077_v31  ;;  %v1133_v31 = vld [vmem:[#allocation13 + $0x880] sm:$0xff]  ;;  %v1138_v32 = vld [vmem:[#allocation13 + $0x8a8] sm:$0xff] }
 0x210   :  { %3662 = vmatprep.subr.bf16.mxu1 %v3661_v56 }
 0x213   :  { %3664 = vmatpush1.bf16.msra.mxu1 %v3663_v63 }
 0x214   :  { %3666 = vmatprep.subr.bf16.mxu1 %v3665_v1  ;;  %v1055_v1 = vld [vmem:[#allocation13 + $0x610] sm:$0xff] }
 0x215   :  { %v3791_v2 = vpack.c.bf16 %v1061_v5, %v1055_v1  ;;  %v1101_v1 = vld [vmem:[#allocation13 + $0x780] sm:$0xff]  ;;  %v1107_v5 = vld [vmem:[#allocation13 + $0x7b0] sm:$0xff] }
 0x217   :  { %3668 = vmatpush1.bf16.msra.mxu1 %v3667_v9 }
 0x218   :  { %3670 = vmatprep.subr.bf16.mxu1 %v3669_v11  ;;  %v1072_v11 = vld [vmem:[#allocation13 + $0x698] sm:$0xff] }
 0x219   :  { %v3697_v22 = vpack.c.bf16 %v1072_v11, %v1066_v6  ;;  %v1114_v11 = vld [vmem:[#allocation13 + $0x7e8] sm:$0xff] }
 0x21b   :  { %3672 = vmatpush1.bf16.msra.mxu1 %v3671_v18 }
 0x21c   :  { %3674 = vmatprep.subr.bf16.mxu1 %v3673_v20 }
 0x21f   :  { %3676 = vmatpush1.bf16.msra.mxu1 %v3675_v15  ;;  %v1071_v15 = vld [vmem:[#allocation13 + $0x690] sm:$0xff] }
 0x220   :  { %3678 = vmatprep.subr.bf16.mxu1 %v3677_v10  ;;  %v3699_v4 = vpack.c.bf16 %v1071_v15, %v1065_v57  ;;  %v1115_v15 = vld [vmem:[#allocation13 + $0x7f0] sm:$0xff] }
 0x223   :  { %3680 = vmatpush1.bf16.msra.mxu1 %v3679_v25  ;;  %v1073_v25 = vld [vmem:[#allocation13 + $0x6a0] sm:$0xff] }
 0x224   :  { %3682 = vmatprep.subr.bf16.mxu1 %v3681_v26  ;;  %v1078_v26 = vld [vmem:[#allocation13 + $0x6c8] sm:$0xff]  ;;  %v3795_v30 = vpack.c.bf16 %v1073_v25, %v1067_v24  ;;  %v1128_v24 = vld [vmem:[#allocation13 + $0x858] sm:$0xff] }
 0x225   :  { %v1134_v25 = vld [vmem:[#allocation13 + $0x888] sm:$0xff] }
 0x227   :  { %3684 = vmatpush1.bf16.msra.mxu1 %v3683_v29 }
 0x228   :  { %3686 = vmatprep.subr.bf16.mxu1 %v3685_v58 }
 0x22b   :  { %3688 = vmatpush1.bf16.msra.mxu1 %v3687_v33  ;;  %v3701_v33 = vpack.c.bf16 %v1084_v28, %v1078_v26  ;;  %v1125_v28 = vld [vmem:[#allocation13 + $0x840] sm:$0xff] }
 0x22c   :  { %3690 = vmatprep.subr.bf16.mxu1 %v3689_v35  ;;  %v1079_v35 = vld [vmem:[#allocation13 + $0x6d0] sm:$0xff] }
 0x22f   :  { %3692 = vmatpush1.bf16.msra.mxu1 %v3691_v48  ;;  %v3799_v48 = vpack.c.bf16 %v1085_v39, %v1079_v35  ;;  %v1146_v35 = vld [vmem:[#allocation13 + $0x8e8] sm:$0xff]  ;;  %v3719_v39 = vpack.c.bf16 %v1131_v3, %v1125_v28  ;;  %v877_v28 = vld [vmem:[#allocation13 + $0x80] sm:$0xff] }
 0x230   :  { %3694 = vmatprep.subr.bf16.mxu1 %v3693_v49  ;;  %v1089_v49 = vld [vmem:[#allocation13 + $0x720] sm:$0xff] }
 0x285   :  { %v617_v53 = vpop.f32.mrb[2].mxu1 }
 0x286   :  { %v694_v54 = vpop.f32.mrb[4].mxu0  ;;  %v618_v55 = vadd.f32 %v617_v53, %v539_v51  ;;  %v619_v56 = vpop.f32.mrb[3].mxu1  ;;  %v3801_v53 = vpack.c.bf16 %v1098_v45, %v1092_v44  ;;  %v1143_v44 = vld [vmem:[#allocation13 + $0x8d0] sm:$0xff] }
 0x287   :  { %v696_v59 = vpop.f32.mrb[5].mxu0  ;;  %v620_v60 = vadd.f32 %v619_v56, %v543_v52  ;;  %v1102_v56 = vld [vmem:[#allocation13 + $0x788] sm:$0xff] }
 0x288   :  { %v695_v63 = vadd.f32 %v694_v54, %v618_v55  ;;  %v1091_v54 = vld [vmem:[#allocation13 + $0x730] sm:$0xff]  ;;  %v1097_v55 = vld [vmem:[#allocation13 + $0x760] sm:$0xff] }
 0x289   :  { %v697_v7 = vadd.f32 %v696_v59, %v620_v60  ;;  %v623_v8 = vpop.f32.mrb[4].mxu1  ;;  %v1108_v59 = vld [vmem:[#allocation13 + $0x7b8] sm:$0xff] }
 0x28a   :  { %v700_v9 = vpop.f32.mrb[6].mxu0  ;;  %v624_v14 = vadd.f32 %v623_v8, %v539_v51  ;;  %v625_v17 = vpop.f32.mrb[5].mxu1  ;;  %v5076_v10 = vmax.f32 %v695_v63, 0.0  ;;  %v1095_v51 = vld [vmem:[#allocation13 + $0x750] sm:$0xff]  ;;  %v1104_v60 = vld [vmem:[#allocation13 + $0x798] sm:$0xff]  ;;  %v3803_v63 = vpack.c.bf16 %v1097_v55, %v1091_v54  ;;  %v3709_v6 = vpack.c.bf16 %v1108_v59, %v1102_v56 }
 0x28b   :  { %v702_v18 = vpop.f32.mrb[7].mxu0  ;;  %v5074_v20 = vmax.f32 %v697_v7, 0.0  ;;  %v626_v21 = vadd.f32 %v625_v17, %v543_v52  ;;  %v3705_v52 = vpack.c.bf16 %v1096_v43, %v1090_v42  ;;  %v3707_v62 = vpack.c.bf16 %v1095_v51, %v1089_v49  ;;  %v1103_v8 = vld [vmem:[#allocation13 + $0x790] sm:$0xff]  ;;  %v1137_v43 = vld [vmem:[#allocation13 + $0x8a0] sm:$0xff]  ;;  %v866_v51 = vld [vmem:[#allocation13 + $0x28] sm:$0xff] }
 0x28c   :  { %v701_v19 = vadd.f32 %v700_v9, %v624_v14  ;;  %v3805_v7 = vpack.c.bf16 %v1110_v61, %v1104_v60  ;;  %v1109_v9 = vld [vmem:[#allocation13 + $0x7c0] sm:$0xff]  ;;  %v1122_v14 = vld [vmem:[#allocation13 + $0x828] sm:$0xff]  ;;  %v3711_v17 = vpack.c.bf16 %v1107_v5, %v1101_v1  ;;  %v3723_v60 = vpack.c.bf16 %v1143_v44, %v1137_v43 }
 0x28d   :  { %1245 = vmatprep.mubr.f32.mxu1 %v5074_v20  ;;  %1399 = vmatprep.mubr.f32.mxu0 %v5074_v20  ;;  %v703_v27 = vadd.f32 %v702_v18, %v626_v21  ;;  %v3807_v18 = vpack.c.bf16 %v1109_v9, %v1103_v8  ;;  %v1113_v21 = vld [vmem:[#allocation13 + $0x7e0] sm:$0xff]  ;;  %v3809_v57 = vpack.c.bf16 %v1122_v14, %v1116_v13  ;;  %v1688_v54 = vld [vmem:[#allocation16 + $0x8] sm:$0xff] }
 0x28e   :  { %1246 = vmatmul.mubr.f32.vlgmr.msra.gmra.mrb[12].mxu1 %v5076_v10  ;;  %1400 = vmatmul.mubr.f32.vlgmr.msra.gmra.mrb[8].mxu0 %v5076_v10  ;;  %v5082_v29 = vmax.f32 %v701_v19, 0.0  ;;  %v1121_v19 = vld [vmem:[#allocation13 + $0x820] sm:$0xff]  ;;  %v547_v9 = vrot.slane %v5068_v50, %v5027_v41 }
 0x28f   :  { %v5084_v58 = vmax.f32 %v703_v27, 0.0  ;;  %3696 = vmatpush1.bf16.msra.mxu1 %v3695_v47  ;;  %3792 = vmatpush1.bf16.msra.mxu0 %v3791_v2  ;;  %v1119_v47 = vld [vmem:[#allocation13 + $0x810] sm:$0xff]  ;;  %v3713_v2 = vpack.c.bf16 %v1120_v12, %v1114_v11  ;;  %v3811_v27 = vpack.c.bf16 %v1121_v19, %v1115_v15  ;;  %v1145_v49 = vld [vmem:[#allocation13 + $0x8e0] sm:$0xff]  ;;  %v878_v15 = vld [vmem:[#allocation13 + $0x88] sm:$0xff] }
 0x290   :  { %3698 = vmatprep.subr.bf16.mxu1 %v3697_v22  ;;  %3794 = vmatprep.subr.bf16.mxu0 %v3793_v23  ;;  %v1126_v22 = vld [vmem:[#allocation13 + $0x848] sm:$0xff]  ;;  %v1132_v23 = vld [vmem:[#allocation13 + $0x878] sm:$0xff]  ;;  %v3715_v26 = vpack.c.bf16 %v1119_v47, %v1113_v21  ;;  %v865_v13 = vld [vmem:[#allocation13 + $0x20] sm:$0xff] }
 0x291   :  { %1251 = vmatprep.mubr.f32.mxu1 %v5084_v58  ;;  %1405 = vmatprep.mubr.f32.mxu0 %v5084_v58  ;;  %v3717_v16 = vpack.c.bf16 %v1132_v23, %v1126_v22  ;;  %v1694_v55 = vld [vmem:[#allocation16 + $0x38] sm:$0xff]  ;;  %v1687_v21 = vld [vmem:[#allocation16] sm:$0xff]  ;;  %v1693_v47 = vld [vmem:[#allocation16 + $0x30] sm:$0xff] }
 0x292   :  { %1252 = vmatmul.mubr.f32.gmra.mrb[14].mxu1 %v5082_v29  ;;  %1406 = vmatmul.mubr.f32.gmra.mrb[10].mxu0 %v5082_v29  ;;  %v884_v19 = vld [vmem:[#allocation13 + $0xb8] sm:$0xff] }
 0x293   :  { %3700 = vmatpush1.bf16.msra.mxu1 %v3699_v4  ;;  %3796 = vmatpush1.bf16.msra.mxu0 %v3795_v30  ;;  %v3813_v4 = vpack.c.bf16 %v1134_v25, %v1128_v24  ;;  %v1127_v30 = vld [vmem:[#allocation13 + $0x850] sm:$0xff]  ;;  %v1706_v25 = vld [vmem:[#allocation16 + $0x98] sm:$0xff] }
 0x294   :  { %3702 = vmatprep.subr.bf16.mxu1 %v3701_v33  ;;  %3798 = vmatprep.subr.bf16.mxu0 %v3797_v34  ;;  %v1144_v33 = vld [vmem:[#allocation13 + $0x8d8] sm:$0xff]  ;;  %v3815_v42 = vpack.c.bf16 %v1133_v31, %v1127_v30  ;;  %v1700_v24 = vld [vmem:[#allocation16 + $0x68] sm:$0xff]  ;;  %v3825_v31 = vpack.c.bf16 %v884_v19, %v878_v15 }
 0x295   :  { %1322 = vmatprep.mubr.f32.mxu1 %v4825_v0  ;;  %1476 = vmatprep.mubr.f32.mxu0 %v4825_v0  ;;  %v1140_v34 = vld [vmem:[#allocation13 + $0x8b8] sm:$0xff]  ;;  %v3721_v45 = vpack.c.bf16 %v1144_v33, %v1138_v32  ;;  %v3921_v32 = vpack.c.bf16 %v1706_v25, %v1700_v24  ;;  %v890_v33 = vld [vmem:[#allocation13 + $0xe8] sm:$0xff] }
 0x296   :  { %v1705_v30 = vld [vmem:[#allocation16 + $0x90] sm:$0xff]  ;;  %v926_v15 = vld [vmem:[#allocation13 + $0x208] sm:$0xff]  ;;  %v1754_v24 = vld [vmem:[#allocation16 + $0x218] sm:$0xff] }
 0x297   :  { %3704 = vmatpush1.bf16.msra.mxu1 %v3703_v46  ;;  %3800 = vmatpush1.bf16.msra.mxu0 %v3799_v48  ;;  %v3817_v46 = vpack.c.bf16 %v1146_v35, %v1140_v34  ;;  %v1139_v48 = vld [vmem:[#allocation13 + $0x8b0] sm:$0xff]  ;;  %v896_v34 = vld [vmem:[#allocation13 + $0x118] sm:$0xff] }
 0x298   :  { %3706 = vmatprep.subr.bf16.mxu1 %v3705_v52  ;;  %3802 = vmatprep.subr.bf16.mxu0 %v3801_v53  ;;  %v872_v53 = vld [vmem:[#allocation13 + $0x58] sm:$0xff]  ;;  %v3819_v61 = vpack.c.bf16 %v1145_v49, %v1139_v48  ;;  %v3829_v49 = vpack.c.bf16 %v896_v34, %v890_v33  ;;  %v1760_v34 = vld [vmem:[#allocation16 + $0x248] sm:$0xff] }
 0x299   :  { %v932_v19 = vld [vmem:[#allocation13 + $0x238] sm:$0xff] }
 0x29a   :  { %v944_v33 = vld [vmem:[#allocation13 + $0x298] sm:$0xff] }
 0x29b   :  { %3708 = vmatpush1.bf16.msra.mxu1 %v3707_v62  ;;  %3804 = vmatpush1.bf16.msra.mxu0 %v3803_v63  ;;  %v3821_v62 = vpack.c.bf16 %v872_v53, %v866_v51  ;;  %v3917_v63 = vpack.c.bf16 %v1694_v55, %v1688_v54  ;;  %v1711_v51 = vld [vmem:[#allocation16 + $0xc0] sm:$0xff]  ;;  %v908_v55 = vld [vmem:[#allocation13 + $0x178] sm:$0xff] }
 0x29c   :  { %3710 = vmatprep.subr.bf16.mxu1 %v3709_v6  ;;  %3806 = vmatprep.subr.bf16.mxu0 %v3805_v7  ;;  %v4826_v7 = vmov 1983009808   ;;  %v902_v53 = vld [vmem:[#allocation13 + $0x148] sm:$0xff] }
 0x29d   :  { %v2299_v8 = vunpack.c.l.s4 %v4826_v7  ;;  %v1723_v7 = vld [vmem:[#allocation16 + $0x120] sm:$0xff] }
 0x29f   :  { %3712 = vmatpush1.bf16.msra.mxu1 %v3711_v17  ;;  %3808 = vmatpush1.bf16.msra.mxu0 %v3807_v18  ;;  %v2300_v11 = vunpack.c.0.s8 %v2299_v8  ;;  %v871_v18 = vld [vmem:[#allocation13 + $0x50] sm:$0xff] }
 0x2a0   :  { %3714 = vmatprep.subr.bf16.mxu1 %v3713_v2  ;;  %3810 = vmatprep.subr.bf16.mxu0 %v3809_v57  ;;  %v3823_v50 = vpack.c.bf16 %v871_v18, %v865_v13  ;;  %v1729_v8 = vld [vmem:[#allocation16 + $0x150] sm:$0xff]  ;;  %v1742_v13 = vld [vmem:[#allocation16 + $0x1b8] sm:$0xff] }
 0x2a1   :  { %v5095_v22 = vsub.s32 %v2300_v11, %v5018_v37  ;;  %v920_v11 = vld [vmem:[#allocation13 + $0x1d8] sm:$0xff]  ;;  %v913_v18 = vld [vmem:[#allocation13 + $0x1a0] sm:$0xff] }
 0x2a3   :  { %3716 = vmatpush1.bf16.msra.mxu1 %v3715_v26  ;;  %3812 = vmatpush1.bf16.msra.mxu0 %v3811_v27  ;;  %v5097_v26 = vld [vmem:[#allocation5] sm:$0xff]  ;;  %v3919_v27 = vpack.c.bf16 %v1693_v47, %v1687_v21 }
 0x2a4   :  { %3718 = vmatprep.subr.bf16.mxu1 %v3717_v16  ;;  %3814 = vmatprep.subr.bf16.mxu0 %v3813_v4  ;;  %v883_v16 = vld [vmem:[#allocation13 + $0xb0] sm:$0xff]  ;;  %v1699_v4 = vld [vmem:[#allocation16 + $0x60] sm:$0xff]  ;;  %v5103_v35 = vrot.slane %v5097_v26, %v5095_v22 }
 0x2a5   :  { %v3311_v52 = vpop.f32.mrb[6].mxu1  ;;  %v3827_v43 = vpack.c.bf16 %v883_v16, %v877_v28  ;;  %v3923_v44 = vpack.c.bf16 %v1705_v30, %v1699_v4  ;;  %v919_v21 = vld [vmem:[#allocation13 + $0x1d0] sm:$0xff]  ;;  %v3841_v16 = vpack.c.bf16 %v932_v19, %v926_v15  ;;  %v1747_v30 = vld [vmem:[#allocation16 + $0x1e0] sm:$0xff]  ;;  %v980_v15 = vld [vmem:[#allocation13 + $0x3b8] sm:$0xff] }
 0x2a6   :  { %v3312_v56 = vpop.f32.mrb[7].mxu1  ;;  %v3839_v25 = vpack.c.bf16 %v919_v21, %v913_v18  ;;  %v931_v28 = vld [vmem:[#allocation13 + $0x230] sm:$0xff] }
 0x2a7   :  { %v3313_v59 = vadd.f32 %v3312_v56, %v3311_v52  ;;  %3720 = vmatpush1.bf16.msra.mxu1 %v3719_v39  ;;  %3816 = vmatpush1.bf16.msra.mxu0 %v3815_v42  ;;  %v1712_v39 = vld [vmem:[#allocation16 + $0xc8] sm:$0xff]  ;;  %v1718_v42 = vld [vmem:[#allocation16 + $0xf8] sm:$0xff]  ;;  %v1717_v52 = vld [vmem:[#allocation16 + $0xf0] sm:$0xff] }
 0x2a8   :  { %3722 = vmatprep.subr.bf16.mxu1 %v3721_v45  ;;  %3818 = vmatprep.subr.bf16.mxu0 %v3817_v46  ;;  %v889_v45 = vld [vmem:[#allocation13 + $0xe0] sm:$0xff]  ;;  %v895_v46 = vld [vmem:[#allocation13 + $0x110] sm:$0xff]  ;;  %v3925_v54 = vpack.c.bf16 %v1718_v42, %v1712_v39 }
 0x2a9   :  { %v3314_v1 = vpop.f32.mrb[8].mxu1  ;;  %v772_v17 = vadd.f32 %v3313_v59, %v547_v9  ;;  %v1724_v56 = vld [vmem:[#allocation16 + $0x128] sm:$0xff]  ;;  %v1730_v59 = vld [vmem:[#allocation16 + $0x158] sm:$0xff] }
 0x2aa   :  { %v3315_v5 = vpop.f32.mrb[9].mxu1  ;;  %v1766_v39 = vld [vmem:[#allocation16 + $0x278] sm:$0xff]  ;;  %v967_v18 = vld [vmem:[#allocation13 + $0x350] sm:$0xff] }
 0x2ab   :  { %v3316_v6 = vadd.f32 %v3315_v5, %v3314_v1  ;;  %3724 = vmatpush1.bf16.msra.mxu1 %v3723_v60  ;;  %3820 = vmatpush1.bf16.msra.mxu0 %v3819_v61  ;;  %v5113_v60 = vcombine.high %v5103_v35, %v5103_v35  ;;  %v3831_v61 = vpack.c.bf16 %v895_v46, %v889_v45  ;;  %v907_v1 = vld [vmem:[#allocation13 + $0x170] sm:$0xff] }
 0x2ac   :  { %3822 = vmatprep.subr.bf16.mxu1 %v3821_v62  ;;  %3918 = vmatprep.subr.bf16.mxu0 %v3917_v63  ;;  %v3927_v62 = vpack.c.bf16 %v1717_v52, %v1711_v51  ;;  %v901_v63 = vld [vmem:[#allocation13 + $0x140] sm:$0xff]  ;;  %v3833_v5 = vpack.c.bf16 %v908_v55, %v902_v53  ;;  %v943_v45 = vld [vmem:[#allocation13 + $0x290] sm:$0xff]  ;;  %v950_v53 = vld [vmem:[#allocation13 + $0x2c8] sm:$0xff] }
 0x2ad   :  { %v777_v12 = vadd.f32 %v3316_v6, %v547_v9  ;;  %v3929_v6 = vpack.c.bf16 %v1730_v59, %v1724_v56  ;;  %v914_v9 = vld [vmem:[#allocation13 + $0x1a8] sm:$0xff]  ;;  %v1765_v52 = vld [vmem:[#allocation16 + $0x270] sm:$0xff]  ;;  %v1778_v56 = vld [vmem:[#allocation16 + $0x2d8] sm:$0xff] }
 0x2ae   :  { %v1759_v51 = vld [vmem:[#allocation16 + $0x240] sm:$0xff]  ;;  %v1772_v55 = vld [vmem:[#allocation16 + $0x2a8] sm:$0xff] }
 0x2af   :  { %v1796_v19 = vld [vmem:[#allocation16 + $0x368] sm:$0xff] }
 0x2c5   :  { %v3404_v14 = vpop.f32.mrb[10].mxu1 }
 0x2c6   :  { %v852_v2 = vadd.f32 %v3404_v14, %v777_v12  ;;  %v846_v57 = vpop.f32.mrb[11].mxu1  ;;  %v1736_v12 = vld [vmem:[#allocation16 + $0x188] sm:$0xff]  ;;  %v3835_v14 = vpack.c.bf16 %v907_v1, %v901_v63 }
 0x2c7   :  { %v847_v23 = vadd.f32 %v846_v57, %v772_v17  ;;  %v3931_v17 = vpack.c.bf16 %v1729_v8, %v1723_v7  ;;  %v3933_v47 = vpack.c.bf16 %v1742_v13, %v1736_v12  ;;  %v1741_v57 = vld [vmem:[#allocation16 + $0x1b0] sm:$0xff]  ;;  %v962_v8 = vld [vmem:[#allocation13 + $0x328] sm:$0xff]  ;;  %v1790_v12 = vld [vmem:[#allocation16 + $0x338] sm:$0xff] }
 0x2c8   :  { %v5107_v48 = vmax.f32 %v852_v2, 0.0  ;;  %v1735_v2 = vld [vmem:[#allocation16 + $0x180] sm:$0xff]  ;;  %v955_v63 = vld [vmem:[#allocation13 + $0x2f0] sm:$0xff] }
 0x2c9   :  { %v5099_v3 = vmax.f32 %v847_v23, 0.0  ;;  %v1748_v23 = vld [vmem:[#allocation16 + $0x1e8] sm:$0xff]  ;;  %v1777_v7 = vld [vmem:[#allocation16 + $0x2d0] sm:$0xff] }
 0x2ca   :  { %v3937_v4 = vpack.c.bf16 %v1754_v24, %v1748_v23  ;;  %v1802_v23 = vld [vmem:[#allocation16 + $0x398] sm:$0xff] }
 0x2cb   :  { %1323 = vmatmul.mubr.f32.vlgmr.msra.gmra.mrb[12].mxu1 %v5099_v3  ;;  %1477 = vmatmul.mubr.f32.vlgmr.msra.gmra.mrb[8].mxu0 %v5099_v3 }
 0x2cc   :  { %3824 = vmatpush1.bf16.msra.mxu1 %v3823_v50  ;;  %3920 = vmatpush1.bf16.msra.mxu0 %v3919_v27  ;;  %v3935_v50 = vpack.c.bf16 %v1741_v57, %v1735_v2  ;;  %v925_v27 = vld [vmem:[#allocation13 + $0x200] sm:$0xff]  ;;  %v1789_v2 = vld [vmem:[#allocation16 + $0x330] sm:$0xff]  ;;  %v974_v57 = vld [vmem:[#allocation13 + $0x388] sm:$0xff] }
 0x2cd   :  { %1328 = vmatprep.mubr.f32.mxu1 %v4825_v0  ;;  %1482 = vmatprep.mubr.f32.mxu0 %v4825_v0  ;;  %v3843_v42 = vpack.c.bf16 %v931_v28, %v925_v27  ;;  %v979_v27 = vld [vmem:[#allocation13 + $0x3b0] sm:$0xff]  ;;  %v3857_v28 = vpack.c.bf16 %v980_v15, %v974_v57  ;;  %v1028_v57 = vld [vmem:[#allocation13 + $0x538] sm:$0xff] }
 0x2ce   :  { %3826 = vmatprep.subr.bf16.mxu1 %v3825_v31  ;;  %3922 = vmatprep.subr.bf16.mxu0 %v3921_v32  ;;  %v1753_v31 = vld [vmem:[#allocation16 + $0x210] sm:$0xff]  ;;  %v938_v32 = vld [vmem:[#allocation13 + $0x268] sm:$0xff] }
 0x2cf   :  { %1329 = vmatmul.mubr.f32.gmra.mrb[14].mxu1 %v5107_v48  ;;  %1483 = vmatmul.mubr.f32.gmra.mrb[10].mxu0 %v5107_v48  ;;  %v3845_v46 = vpack.c.bf16 %v944_v33, %v938_v32  ;;  %v992_v32 = vld [vmem:[#allocation13 + $0x418] sm:$0xff]  ;;  %v1808_v33 = vld [vmem:[#allocation16 + $0x3c8] sm:$0xff] }
 0x2d0   :  { %3828 = vmatpush1.bf16.msra.mxu1 %v3827_v43  ;;  %3924 = vmatpush1.bf16.msra.mxu0 %v3923_v44  ;;  %v3939_v43 = vpack.c.bf16 %v1753_v31, %v1747_v30  ;;  %v937_v44 = vld [vmem:[#allocation13 + $0x260] sm:$0xff]  ;;  %v1801_v30 = vld [vmem:[#allocation16 + $0x390] sm:$0xff]  ;;  %v986_v31 = vld [vmem:[#allocation13 + $0x3e8] sm:$0xff] }
 0x2d1   :  { %1553 = vmatprep.mubr.f32.mxu1 %v5074_v20  ;;  %3830 = vmatprep.subr.bf16.mxu1 %v3829_v49  ;;  %v3837_v20 = vpack.c.bf16 %v920_v11, %v914_v9  ;;  %v3941_v49 = vpack.c.bf16 %v1766_v39, %v1760_v34  ;;  %v3847_v59 = vpack.c.bf16 %v943_v45, %v937_v44  ;;  %v968_v9 = vld [vmem:[#allocation13 + $0x358] sm:$0xff]  ;;  %v1784_v11 = vld [vmem:[#allocation16 + $0x308] sm:$0xff] }
 0x2d2   :  { %3926 = vmatprep.subr.bf16.mxu0 %v3925_v54  ;;  %2392 = vmatprep.mubr.f32.mxu0 %v5113_v60  ;;  %v956_v54 = vld [vmem:[#allocation13 + $0x2f8] sm:$0xff]  ;;  %v3853_v21 = vpack.c.bf16 %v968_v9, %v962_v8  ;;  %v991_v44 = vld [vmem:[#allocation13 + $0x410] sm:$0xff]  ;;  %v3861_v45 = vpack.c.bf16 %v992_v32, %v986_v31 }
 0x2d3   :  { %v3849_v1 = vpack.c.bf16 %v956_v54, %v950_v53  ;;  %v1814_v34 = vld [vmem:[#allocation16 + $0x3f8] sm:$0xff]  ;;  %v1820_v54 = vld [vmem:[#allocation16 + $0x428] sm:$0xff] }
 0x2d4   :  { %3832 = vmatpush1.bf16.msra.mxu1 %v3831_v61  ;;  %3928 = vmatpush1.bf16.msra.mxu0 %v3927_v62  ;;  %v3943_v61 = vpack.c.bf16 %v1765_v52, %v1759_v51  ;;  %v949_v62 = vld [vmem:[#allocation13 + $0x2c0] sm:$0xff]  ;;  %v1813_v51 = vld [vmem:[#allocation16 + $0x3f0] sm:$0xff]  ;;  %v998_v52 = vld [vmem:[#allocation13 + $0x448] sm:$0xff] }
 0x2d5   :  { %3834 = vmatprep.subr.bf16.mxu1 %v3833_v5  ;;  %3930 = vmatprep.subr.bf16.mxu0 %v3929_v6  ;;  %v3945_v5 = vpack.c.bf16 %v1778_v56, %v1772_v55  ;;  %v1771_v6 = vld [vmem:[#allocation16 + $0x2a0] sm:$0xff]  ;;  %v3851_v13 = vpack.c.bf16 %v955_v63, %v949_v62  ;;  %v1004_v53 = vld [vmem:[#allocation13 + $0x478] sm:$0xff]  ;;  %v1003_v62 = vld [vmem:[#allocation13 + $0x470] sm:$0xff] }
 0x2d6   :  { %v1826_v55 = vld [vmem:[#allocation16 + $0x458] sm:$0xff]  ;;  %v3865_v63 = vpack.c.bf16 %v1004_v53, %v998_v52  ;;  %v1832_v9 = vld [vmem:[#allocation16 + $0x488] sm:$0xff] }
 0x2d7   :  { %v1016_v8 = vld [vmem:[#allocation13 + $0x4d8] sm:$0xff]  ;;  %v1844_v15 = vld [vmem:[#allocation16 + $0x4e8] sm:$0xff] }
 0x2d8   :  { %3836 = vmatpush1.bf16.msra.mxu1 %v3835_v14  ;;  %3932 = vmatpush1.bf16.msra.mxu0 %v3931_v17  ;;  %v3947_v14 = vpack.c.bf16 %v1777_v7, %v1771_v6  ;;  %v961_v17 = vld [vmem:[#allocation13 + $0x320] sm:$0xff]  ;;  %v1825_v6 = vld [vmem:[#allocation16 + $0x450] sm:$0xff]  ;;  %v1010_v7 = vld [vmem:[#allocation13 + $0x4a8] sm:$0xff] }
 0x2d9   :  { %3838 = vmatprep.subr.bf16.mxu1 %v3837_v20  ;;  %3934 = vmatprep.subr.bf16.mxu0 %v3933_v47  ;;  %v3949_v20 = vpack.c.bf16 %v1790_v12, %v1784_v11  ;;  %v1783_v47 = vld [vmem:[#allocation16 + $0x300] sm:$0xff]  ;;  %v3855_v24 = vpack.c.bf16 %v967_v18, %v961_v17  ;;  %v1838_v11 = vld [vmem:[#allocation16 + $0x4b8] sm:$0xff]  ;;  %v1015_v17 = vld [vmem:[#allocation13 + $0x4d0] sm:$0xff]  ;;  %v3869_v18 = vpack.c.bf16 %v1016_v8, %v1010_v7 }
 0x2da   :  { %v1040_v31 = vld [vmem:[#allocation13 + $0x598] sm:$0xff]  ;;  %v1856_v32 = vld [vmem:[#allocation16 + $0x548] sm:$0xff] }
 0x2db   :  { %v1052_v52 = vld [vmem:[#allocation13 + $0x5f8] sm:$0xff]  ;;  %v1868_v53 = vld [vmem:[#allocation16 + $0x5a8] sm:$0xff] }
 0x2dc   :  { %3840 = vmatpush1.bf16.msra.mxu1 %v3839_v25  ;;  %3936 = vmatpush1.bf16.msra.mxu0 %v3935_v50  ;;  %v3951_v25 = vpack.c.bf16 %v1789_v2, %v1783_v47  ;;  %v973_v50 = vld [vmem:[#allocation13 + $0x380] sm:$0xff]  ;;  %v1837_v47 = vld [vmem:[#allocation16 + $0x4b0] sm:$0xff]  ;;  %v1022_v2 = vld [vmem:[#allocation13 + $0x508] sm:$0xff] }
 0x2dd   :  { %3842 = vmatprep.subr.bf16.mxu1 %v3841_v16  ;;  %3938 = vmatprep.subr.bf16.mxu0 %v3937_v4  ;;  %v3953_v16 = vpack.c.bf16 %v1802_v23, %v1796_v19  ;;  %v1795_v4 = vld [vmem:[#allocation16 + $0x360] sm:$0xff]  ;;  %v3859_v39 = vpack.c.bf16 %v979_v27, %v973_v50  ;;  %v1850_v19 = vld [vmem:[#allocation16 + $0x518] sm:$0xff]  ;;  %v1027_v50 = vld [vmem:[#allocation13 + $0x530] sm:$0xff]  ;;  %v3873_v27 = vpack.c.bf16 %v1028_v57, %v1022_v2 }
 0x2de   :  { %v1064_v7 = vld [vmem:[#allocation13 + $0x658] sm:$0xff]  ;;  %v1880_v8 = vld [vmem:[#allocation16 + $0x608] sm:$0xff] }
 0x2df   :  { %v1070_v2 = vld [vmem:[#allocation13 + $0x688] sm:$0xff]  ;;  %v1076_v57 = vld [vmem:[#allocation13 + $0x6b8] sm:$0xff] }
 0x2e0   :  { %3844 = vmatpush1.bf16.msra.mxu1 %v3843_v42  ;;  %3940 = vmatpush1.bf16.msra.mxu0 %v3939_v43  ;;  %v3955_v42 = vpack.c.bf16 %v1801_v30, %v1795_v4  ;;  %v985_v43 = vld [vmem:[#allocation13 + $0x3e0] sm:$0xff]  ;;  %v1849_v4 = vld [vmem:[#allocation16 + $0x510] sm:$0xff]  ;;  %v1034_v30 = vld [vmem:[#allocation13 + $0x568] sm:$0xff] }
 0x2e1   :  { %3846 = vmatprep.subr.bf16.mxu1 %v3845_v46  ;;  %3942 = vmatprep.subr.bf16.mxu0 %v3941_v49  ;;  %v3957_v46 = vpack.c.bf16 %v1814_v34, %v1808_v33  ;;  %v1807_v49 = vld [vmem:[#allocation16 + $0x3c0] sm:$0xff]  ;;  %v3863_v56 = vpack.c.bf16 %v991_v44, %v985_v43  ;;  %v1862_v33 = vld [vmem:[#allocation16 + $0x578] sm:$0xff]  ;;  %v1039_v43 = vld [vmem:[#allocation13 + $0x590] sm:$0xff]  ;;  %v3877_v44 = vpack.c.bf16 %v1040_v31, %v1034_v30 }
 0x2e2   :  { %v1082_v30 = vld [vmem:[#allocation13 + $0x6e8] sm:$0xff]  ;;  %v1088_v31 = vld [vmem:[#allocation13 + $0x718] sm:$0xff] }
 0x2e4   :  { %3848 = vmatpush1.bf16.msra.mxu1 %v3847_v59  ;;  %3944 = vmatpush1.bf16.msra.mxu0 %v3943_v61  ;;  %v3959_v59 = vpack.c.bf16 %v1813_v51, %v1807_v49  ;;  %v997_v61 = vld [vmem:[#allocation13 + $0x440] sm:$0xff]  ;;  %v1861_v49 = vld [vmem:[#allocation16 + $0x570] sm:$0xff]  ;;  %v1046_v51 = vld [vmem:[#allocation13 + $0x5c8] sm:$0xff] }
 0x2e5   :  { %3850 = vmatprep.subr.bf16.mxu1 %v3849_v1  ;;  %3946 = vmatprep.subr.bf16.mxu0 %v3945_v5  ;;  %v3961_v1 = vpack.c.bf16 %v1826_v55, %v1820_v54  ;;  %v1819_v5 = vld [vmem:[#allocation16 + $0x420] sm:$0xff]  ;;  %v3867_v12 = vpack.c.bf16 %v1003_v62, %v997_v61  ;;  %v1874_v54 = vld [vmem:[#allocation16 + $0x5d8] sm:$0xff]  ;;  %v1051_v61 = vld [vmem:[#allocation13 + $0x5f0] sm:$0xff]  ;;  %v3881_v62 = vpack.c.bf16 %v1052_v52, %v1046_v51 }
 0x2e6   :  { %v1094_v51 = vld [vmem:[#allocation13 + $0x748] sm:$0xff] }
 0x2e7   :  { %v1916_v52 = vld [vmem:[#allocation16 + $0x728] sm:$0xff] }
 0x2e8   :  { %3852 = vmatpush1.bf16.msra.mxu1 %v3851_v13  ;;  %3948 = vmatpush1.bf16.msra.mxu0 %v3947_v14  ;;  %v3963_v13 = vpack.c.bf16 %v1825_v6, %v1819_v5  ;;  %v1009_v14 = vld [vmem:[#allocation13 + $0x4a0] sm:$0xff]  ;;  %v1873_v5 = vld [vmem:[#allocation16 + $0x5d0] sm:$0xff]  ;;  %v1058_v6 = vld [vmem:[#allocation13 + $0x628] sm:$0xff] }
 0x2e9   :  { %3854 = vmatprep.subr.bf16.mxu1 %v3853_v21  ;;  %3950 = vmatprep.subr.bf16.mxu0 %v3949_v20  ;;  %v3965_v21 = vpack.c.bf16 %v1838_v11, %v1832_v9  ;;  %v1831_v20 = vld [vmem:[#allocation16 + $0x480] sm:$0xff]  ;;  %v3871_v23 = vpack.c.bf16 %v1015_v17, %v1009_v14  ;;  %v1886_v9 = vld [vmem:[#allocation16 + $0x638] sm:$0xff]  ;;  %v2297_v11 = vcombine.high %v5097_v26, %v5097_v26 }
 0x2ea   :  { %v3885_v14 = vpack.c.bf16 %v1064_v7, %v1058_v6  ;;  %v3981_v17 = vpack.c.bf16 %v1886_v9, %v1880_v8  ;;  %v1928_v6 = vld [vmem:[#allocation16 + $0x788] sm:$0xff] }
 0x2ec   :  { %3856 = vmatpush1.bf16.msra.mxu1 %v3855_v24  ;;  %3952 = vmatpush1.bf16.msra.mxu0 %v3951_v25  ;;  %v3967_v24 = vpack.c.bf16 %v1837_v47, %v1831_v20  ;;  %v1021_v25 = vld [vmem:[#allocation13 + $0x500] sm:$0xff]  ;;  %v1885_v47 = vld [vmem:[#allocation16 + $0x630] sm:$0xff] }
 0x2ed   :  { %3858 = vmatprep.subr.bf16.mxu1 %v3857_v28  ;;  %3954 = vmatprep.subr.bf16.mxu0 %v3953_v16  ;;  %v3969_v28 = vpack.c.bf16 %v1850_v19, %v1844_v15  ;;  %v1843_v16 = vld [vmem:[#allocation16 + $0x4e0] sm:$0xff]  ;;  %v3875_v34 = vpack.c.bf16 %v1027_v50, %v1021_v25  ;;  %v5122_v15 = vrot.slane %v2297_v11, %v5095_v22  ;;  %v1892_v19 = vld [vmem:[#allocation16 + $0x668] sm:$0xff] }
 0x2ee   :  { %v1879_v20 = vld [vmem:[#allocation16 + $0x600] sm:$0xff]  ;;  %v3889_v25 = vpack.c.bf16 %v1076_v57, %v1070_v2 }
 0x2ef   :  { %v1069_v50 = vld [vmem:[#allocation13 + $0x680] sm:$0xff]  ;;  %v5126_v22 = vcombine.high %v5122_v15, %v5122_v15 }
 0x2f0   :  { %3860 = vmatpush1.bf16.msra.mxu1 %v3859_v39  ;;  %3956 = vmatpush1.bf16.msra.mxu0 %v3955_v42  ;;  %v3971_v39 = vpack.c.bf16 %v1849_v4, %v1843_v16  ;;  %v1033_v42 = vld [vmem:[#allocation13 + $0x560] sm:$0xff]  ;;  %v1897_v4 = vld [vmem:[#allocation16 + $0x690] sm:$0xff] }
 0x2f1   :  { %3862 = vmatprep.subr.bf16.mxu1 %v3861_v45  ;;  %3958 = vmatprep.subr.bf16.mxu0 %v3957_v46  ;;  %v3973_v45 = vpack.c.bf16 %v1862_v33, %v1856_v32  ;;  %v1855_v46 = vld [vmem:[#allocation16 + $0x540] sm:$0xff]  ;;  %v3879_v55 = vpack.c.bf16 %v1039_v43, %v1033_v42  ;;  %v1904_v32 = vld [vmem:[#allocation16 + $0x6c8] sm:$0xff]  ;;  %v1910_v33 = vld [vmem:[#allocation16 + $0x6f8] sm:$0xff]  ;;  %v3893_v42 = vpack.c.bf16 %v1088_v31, %v1082_v30 }
 0x2f2   :  { %v1081_v43 = vld [vmem:[#allocation13 + $0x6e0] sm:$0xff] }
 0x2f3   :  { %v1105_v11 = vld [vmem:[#allocation13 + $0x7a0] sm:$0xff] }
 0x2f4   :  { %3864 = vmatpush1.bf16.msra.mxu1 %v3863_v56  ;;  %3960 = vmatpush1.bf16.msra.mxu0 %v3959_v59  ;;  %v3975_v56 = vpack.c.bf16 %v1861_v49, %v1855_v46  ;;  %v1045_v59 = vld [vmem:[#allocation13 + $0x5c0] sm:$0xff]  ;;  %v3989_v46 = vpack.c.bf16 %v1910_v33, %v1904_v32  ;;  %v1909_v49 = vld [vmem:[#allocation16 + $0x6f0] sm:$0xff] }
 0x2f5   :  { %3866 = vmatprep.subr.bf16.mxu1 %v3865_v63  ;;  %3962 = vmatprep.subr.bf16.mxu0 %v3961_v1  ;;  %v3977_v63 = vpack.c.bf16 %v1874_v54, %v1868_v53  ;;  %v1867_v1 = vld [vmem:[#allocation16 + $0x5a0] sm:$0xff] }
 0x2f6   :  { %v1129_v33 = vld [vmem:[#allocation13 + $0x860] sm:$0xff] }
 0x2f8   :  { %3868 = vmatpush1.bf16.msra.mxu1 %v3867_v12  ;;  %3964 = vmatpush1.bf16.msra.mxu0 %v3963_v13  ;;  %v3883_v12 = vpack.c.bf16 %v1051_v61, %v1045_v59  ;;  %v3979_v13 = vpack.c.bf16 %v1873_v5, %v1867_v1  ;;  %v1099_v59 = vld [vmem:[#allocation13 + $0x770] sm:$0xff]  ;;  %v1915_v61 = vld [vmem:[#allocation16 + $0x720] sm:$0xff]  ;;  %v1112_v5 = vld [vmem:[#allocation13 + $0x7d8] sm:$0xff] }
 0x2f9   :  { %3870 = vmatprep.subr.bf16.mxu1 %v3869_v18  ;;  %3966 = vmatprep.subr.bf16.mxu0 %v3965_v21  ;;  %v1057_v18 = vld [vmem:[#allocation13 + $0x620] sm:$0xff]  ;;  %v1063_v21 = vld [vmem:[#allocation13 + $0x650] sm:$0xff]  ;;  %v1106_v1 = vld [vmem:[#allocation13 + $0x7a8] sm:$0xff] }
 0x2fa   :  { %v3887_v26 = vpack.c.bf16 %v1063_v21, %v1057_v18  ;;  %v3901_v9 = vpack.c.bf16 %v1112_v5, %v1106_v1  ;;  %v1118_v18 = vld [vmem:[#allocation13 + $0x808] sm:$0xff]  ;;  %v1124_v21 = vld [vmem:[#allocation13 + $0x838] sm:$0xff] }
 0x2fc   :  { %3872 = vmatpush1.bf16.msra.mxu1 %v3871_v23  ;;  %3968 = vmatpush1.bf16.msra.mxu0 %v3967_v24  ;;  %v1898_v23 = vld [vmem:[#allocation16 + $0x698] sm:$0xff]  ;;  %v3983_v24 = vpack.c.bf16 %v1885_v47, %v1879_v20  ;;  %v1940_v20 = vld [vmem:[#allocation16 + $0x7e8] sm:$0xff] }
 0x2fd   :  { %3874 = vmatprep.subr.bf16.mxu1 %v3873_v27  ;;  %3970 = vmatprep.subr.bf16.mxu0 %v3969_v28  ;;  %v1075_v27 = vld [vmem:[#allocation13 + $0x6b0] sm:$0xff]  ;;  %v1891_v28 = vld [vmem:[#allocation16 + $0x660] sm:$0xff]  ;;  %v3985_v16 = vpack.c.bf16 %v1898_v23, %v1892_v19  ;;  %v1946_v47 = vld [vmem:[#allocation16 + $0x818] sm:$0xff]  ;;  %v3905_v19 = vpack.c.bf16 %v1124_v21, %v1118_v18 }
 0x2fe   :  { %v1117_v23 = vld [vmem:[#allocation13 + $0x800] sm:$0xff] }
 0x300   :  { %3876 = vmatpush1.bf16.msra.mxu1 %v3875_v34  ;;  %3972 = vmatpush1.bf16.msra.mxu0 %v3971_v39  ;;  %v3891_v34 = vpack.c.bf16 %v1075_v27, %v1069_v50  ;;  %v3987_v39 = vpack.c.bf16 %v1897_v4, %v1891_v28  ;;  %v1945_v50 = vld [vmem:[#allocation16 + $0x810] sm:$0xff]  ;;  %v1130_v27 = vld [vmem:[#allocation13 + $0x868] sm:$0xff]  ;;  %v1958_v4 = vld [vmem:[#allocation16 + $0x878] sm:$0xff] }
 0x301   :  { %3878 = vmatprep.subr.bf16.mxu1 %v3877_v44  ;;  %3974 = vmatprep.subr.bf16.mxu0 %v3973_v45  ;;  %v1087_v44 = vld [vmem:[#allocation13 + $0x710] sm:$0xff]  ;;  %v1903_v45 = vld [vmem:[#allocation16 + $0x6c0] sm:$0xff]  ;;  %v1136_v28 = vld [vmem:[#allocation13 + $0x898] sm:$0xff] }
 0x302   :  { %v3895_v53 = vpack.c.bf16 %v1087_v44, %v1081_v43  ;;  %v3991_v54 = vpack.c.bf16 %v1909_v49, %v1903_v45  ;;  %v3909_v32 = vpack.c.bf16 %v1136_v28, %v1130_v27  ;;  %v1957_v43 = vld [vmem:[#allocation16 + $0x870] sm:$0xff]  ;;  %v1142_v44 = vld [vmem:[#allocation13 + $0x8c8] sm:$0xff]  ;;  %v1970_v49 = vld [vmem:[#allocation16 + $0x8d8] sm:$0xff] }
 0x303   :  { %v1148_v45 = vld [vmem:[#allocation13 + $0x8f8] sm:$0xff] }
 0x304   :  { %3880 = vmatpush1.bf16.msra.mxu1 %v3879_v55  ;;  %3976 = vmatpush1.bf16.msra.mxu0 %v3975_v56  ;;  %v1093_v56 = vld [vmem:[#allocation13 + $0x740] sm:$0xff] }
 0x305   :  { %3882 = vmatprep.subr.bf16.mxu1 %v3881_v62  ;;  %3978 = vmatprep.subr.bf16.mxu0 %v3977_v63  ;;  %v1921_v63 = vld [vmem:[#allocation16 + $0x750] sm:$0xff]  ;;  %v3899_v7 = vpack.c.bf16 %v1099_v59, %v1093_v56  ;;  %v1690_v59 = vld [vmem:[#allocation16 + $0x18] sm:$0xff] }
 0x306   :  { %v3995_v8 = vpack.c.bf16 %v1921_v63, %v1915_v61  ;;  %v1969_v56 = vld [vmem:[#allocation16 + $0x8d0] sm:$0xff]  ;;  %v1696_v61 = vld [vmem:[#allocation16 + $0x48] sm:$0xff]  ;;  %v1982_v63 = vld [vmem:[#allocation16 + $0x938] sm:$0xff] }
 0x308   :  { %3884 = vmatpush1.bf16.msra.mxu1 %v3883_v12  ;;  %3980 = vmatpush1.bf16.msra.mxu0 %v3979_v13  ;;  %v1111_v12 = vld [vmem:[#allocation13 + $0x7d0] sm:$0xff]  ;;  %v1927_v13 = vld [vmem:[#allocation16 + $0x780] sm:$0xff] }
 0x309   :  { %3886 = vmatprep.subr.bf16.mxu1 %v3885_v14  ;;  %3982 = vmatprep.subr.bf16.mxu0 %v3981_v17  ;;  %v1933_v17 = vld [vmem:[#allocation16 + $0x7b0] sm:$0xff]  ;;  %v3903_v2 = vpack.c.bf16 %v1111_v12, %v1105_v11  ;;  %v1702_v12 = vld [vmem:[#allocation16 + $0x78] sm:$0xff] }
 0x30a   :  { %v3999_v57 = vpack.c.bf16 %v1933_v17, %v1927_v13  ;;  %v1981_v11 = vld [vmem:[#allocation16 + $0x930] sm:$0xff]  ;;  %v1708_v13 = vld [vmem:[#allocation16 + $0xa8] sm:$0xff]  ;;  %v1994_v17 = vld [vmem:[#allocation16 + $0x998] sm:$0xff] }
 0x30b   :  { %1554 = vmatmul.mubr.f32.vlgmr.msra.gmra.mrb[16].mxu1 %v5076_v10  ;;  %2393 = vmatmul.mubr.f32.vlgmr.msra.gmra.mrb[12].mxu0 %v5103_v35  ;;  %v1100_v10 = vld [vmem:[#allocation13 + $0x778] sm:$0xff] }
 0x30c   :  { %1559 = vmatprep.mubr.f32.mxu1 %v5084_v58  ;;  %3888 = vmatpush1.bf16.msra.mxu1 %v3887_v26  ;;  %v1922_v58 = vld [vmem:[#allocation16 + $0x758] sm:$0xff]  ;;  %v3897_v55 = vpack.c.bf16 %v1100_v10, %v1094_v51  ;;  %v1123_v26 = vld [vmem:[#allocation13 + $0x830] sm:$0xff] }
 0x30d   :  { %3984 = vmatpush1.bf16.msra.mxu0 %v3983_v24  ;;  %3890 = vmatprep.subr.bf16.mxu1 %v3889_v25  ;;  %v3993_v62 = vpack.c.bf16 %v1922_v58, %v1916_v52  ;;  %v1939_v24 = vld [vmem:[#allocation16 + $0x7e0] sm:$0xff]  ;;  %v4001_v25 = vpack.c.bf16 %v1946_v47, %v1940_v20  ;;  %v3907_v30 = vpack.c.bf16 %v1123_v26, %v1117_v23  ;;  %v1993_v23 = vld [vmem:[#allocation16 + $0x990] sm:$0xff]  ;;  %v1714_v26 = vld [vmem:[#allocation16 + $0xd8] sm:$0xff] }
 0x30e   :  { %3986 = vmatprep.subr.bf16.mxu0 %v3985_v16  ;;  %2463 = vmatprep.mubr.f32.mxu0 %v5126_v22  ;;  %v1952_v16 = vld [vmem:[#allocation16 + $0x848] sm:$0xff]  ;;  %v4003_v31 = vpack.c.bf16 %v1945_v50, %v1939_v24  ;;  %v3913_v52 = vpack.c.bf16 %v1148_v45, %v1142_v44  ;;  %v1141_v58 = vld [vmem:[#allocation13 + $0x8c0] sm:$0xff]  ;;  %v4113_v20 = vpack.c.bf16 %v1708_v13, %v1702_v12  ;;  %v1749_v13 = vld [vmem:[#allocation16 + $0x1f0] sm:$0xff] }
 0x30f   :  { %1560 = vmatmul.mubr.f32.gmra.mrb[18].mxu1 %v5082_v29  ;;  %v1934_v29 = vld [vmem:[#allocation16 + $0x7b8] sm:$0xff]  ;;  %v1987_v47 = vld [vmem:[#allocation16 + $0x960] sm:$0xff]  ;;  %v1720_v24 = vld [vmem:[#allocation16 + $0x108] sm:$0xff] }
 0x310   :  { %3892 = vmatpush1.bf16.msra.mxu1 %v3891_v34  ;;  %1630 = vmatprep.mubr.f32.mxu1 %v4825_v0  ;;  %v3997_v14 = vpack.c.bf16 %v1934_v29, %v1928_v6  ;;  %v1135_v34 = vld [vmem:[#allocation13 + $0x890] sm:$0xff]  ;;  %v4109_v6 = vpack.c.bf16 %v1696_v61, %v1690_v59  ;;  %v1975_v29 = vld [vmem:[#allocation16 + $0x900] sm:$0xff]  ;;  %v2006_v50 = vld [vmem:[#allocation16 + $0x9f8] sm:$0xff]  ;;  %v4019_v28 = vpack.c.bf16 %v1993_v23, %v1987_v47 }
 0x311   :  { %3988 = vmatpush1.bf16.msra.mxu0 %v3987_v39  ;;  %3894 = vmatprep.subr.bf16.mxu1 %v3893_v42  ;;  %v1951_v39 = vld [vmem:[#allocation16 + $0x840] sm:$0xff]  ;;  %v4005_v42 = vpack.c.bf16 %v1958_v4, %v1952_v16  ;;  %v3911_v51 = vpack.c.bf16 %v1135_v34, %v1129_v33  ;;  %v4015_v21 = vpack.c.bf16 %v1981_v11, %v1975_v29  ;;  %v2005_v33 = vld [vmem:[#allocation16 + $0x9f0] sm:$0xff]  ;;  %v1726_v34 = vld [vmem:[#allocation16 + $0x138] sm:$0xff] }
 0x312   :  { %3990 = vmatprep.subr.bf16.mxu0 %v3989_v46  ;;  %v1964_v46 = vld [vmem:[#allocation16 + $0x8a8] sm:$0xff]  ;;  %v4007_v10 = vpack.c.bf16 %v1957_v43, %v1951_v39  ;;  %v4117_v16 = vpack.c.bf16 %v1720_v24, %v1714_v26  ;;  %v1999_v4 = vld [vmem:[#allocation16 + $0x9c0] sm:$0xff]  ;;  %v1737_v61 = vld [vmem:[#allocation16 + $0x190] sm:$0xff] }
 0x313   :  { %v1732_v39 = vld [vmem:[#allocation16 + $0x168] sm:$0xff]  ;;  %v2011_v45 = vld [vmem:[#allocation16 + $0xa20] sm:$0xff]  ;;  %v1761_v24 = vld [vmem:[#allocation16 + $0x250] sm:$0xff] }
 0x314   :  { %3896 = vmatpush1.bf16.msra.mxu1 %v3895_v53  ;;  %v1147_v53 = vld [vmem:[#allocation13 + $0x8f0] sm:$0xff]  ;;  %v4121_v44 = vpack.c.bf16 %v1732_v39, %v1726_v34  ;;  %v2023_v59 = vld [vmem:[#allocation16 + $0xa80] sm:$0xff] }
 0x315   :  { %3992 = vmatpush1.bf16.msra.mxu0 %v3991_v54  ;;  %3898 = vmatprep.subr.bf16.mxu1 %v3897_v55  ;;  %v1963_v54 = vld [vmem:[#allocation16 + $0x8a0] sm:$0xff]  ;;  %v4009_v55 = vpack.c.bf16 %v1970_v49, %v1964_v46  ;;  %v3915_v1 = vpack.c.bf16 %v1147_v53, %v1141_v58  ;;  %v1725_v46 = vld [vmem:[#allocation16 + $0x130] sm:$0xff]  ;;  %v1744_v58 = vld [vmem:[#allocation16 + $0x1c8] sm:$0xff] }
 0x316   :  { %3994 = vmatprep.subr.bf16.mxu0 %v3993_v62  ;;  %v1976_v62 = vld [vmem:[#allocation16 + $0x908] sm:$0xff]  ;;  %v4011_v5 = vpack.c.bf16 %v1969_v56, %v1963_v54  ;;  %v1731_v49 = vld [vmem:[#allocation16 + $0x160] sm:$0xff]  ;;  %v1773_v39 = vld [vmem:[#allocation16 + $0x2b0] sm:$0xff] }
 0x317   :  { %v2024_v53 = vld [vmem:[#allocation16 + $0xa88] sm:$0xff]  ;;  %v4123_v54 = vpack.c.bf16 %v1731_v49, %v1725_v46  ;;  %v2035_v12 = vld [vmem:[#allocation16 + $0xae0] sm:$0xff]  ;;  %v2078_v46 = vld [vmem:[#allocation16 + $0xc38] sm:$0xff] }
 0x318   :  { %3900 = vmatpush1.bf16.msra.mxu1 %v3899_v7  ;;  %v1689_v7 = vld [vmem:[#allocation16 + $0x10] sm:$0xff]  ;;  %v2036_v29 = vld [vmem:[#allocation16 + $0xae8] sm:$0xff]  ;;  %v2047_v26 = vld [vmem:[#allocation16 + $0xb40] sm:$0xff] }
 0x319   :  { %3996 = vmatpush1.bf16.msra.mxu0 %v3995_v8  ;;  %3902 = vmatprep.subr.bf16.mxu1 %v3901_v9  ;;  %v1695_v8 = vld [vmem:[#allocation16 + $0x40] sm:$0xff]  ;;  %v4013_v9 = vpack.c.bf16 %v1982_v63, %v1976_v62  ;;  %v2048_v47 = vld [vmem:[#allocation16 + $0xb48] sm:$0xff] }
 0x31a   :  { %3998 = vmatprep.subr.bf16.mxu0 %v3997_v14  ;;  %v1988_v14 = vld [vmem:[#allocation16 + $0x968] sm:$0xff]  ;;  %v4111_v18 = vpack.c.bf16 %v1695_v8, %v1689_v7  ;;  %v1743_v62 = vld [vmem:[#allocation16 + $0x1c0] sm:$0xff]  ;;  %v2042_v7 = vld [vmem:[#allocation16 + $0xb18] sm:$0xff] }
 0x31b   :  { %v4127_v8 = vpack.c.bf16 %v1743_v62, %v1737_v61  ;;  %v2059_v34 = vld [vmem:[#allocation16 + $0xba0] sm:$0xff]  ;;  %v2090_v61 = vld [vmem:[#allocation16 + $0xc98] sm:$0xff]  ;;  %v5138_v62 = vld.sshfl [vmem:[#allocation5 + $0x8] sm:$0x33 pattern:$0x76325410] }
 0x31c   :  { %3904 = vmatpush1.bf16.msra.mxu1 %v3903_v2  ;;  %v1701_v2 = vld [vmem:[#allocation16 + $0x70] sm:$0xff] }
 0x31d   :  { %4000 = vmatpush1.bf16.msra.mxu0 %v3999_v57  ;;  %3906 = vmatprep.subr.bf16.mxu1 %v3905_v19  ;;  %v1707_v57 = vld [vmem:[#allocation16 + $0xa0] sm:$0xff]  ;;  %v4017_v19 = vpack.c.bf16 %v1994_v17, %v1988_v14  ;;  %v4033_v17 = vpack.c.bf16 %v2042_v7, %v2036_v29  ;;  %v1797_v29 = vld [vmem:[#allocation16 + $0x370] sm:$0xff] }
 0x31e   :  { %4002 = vmatprep.subr.bf16.mxu0 %v4001_v25  ;;  %v2000_v25 = vld [vmem:[#allocation16 + $0x9c8] sm:$0xff]  ;;  %v4115_v27 = vpack.c.bf16 %v1707_v57, %v1701_v2  ;;  %v1755_v14 = vld [vmem:[#allocation16 + $0x220] sm:$0xff]  ;;  %v2054_v2 = vld [vmem:[#allocation16 + $0xb78] sm:$0xff] }
 0x31f   :  { %v4131_v57 = vpack.c.bf16 %v1755_v14, %v1749_v13  ;;  %v1803_v7 = vld [vmem:[#allocation16 + $0x3a0] sm:$0xff]  ;;  %v5142_v13 = vcombine.high %v5138_v62, %v5138_v62  ;;  %v2096_v14 = vld [vmem:[#allocation16 + $0xcc8] sm:$0xff] }
 0x320   :  { %3908 = vmatpush1.bf16.msra.mxu1 %v3907_v30  ;;  %v1713_v30 = vld [vmem:[#allocation16 + $0xd0] sm:$0xff] }
 0x321   :  { %4004 = vmatpush1.bf16.msra.mxu0 %v4003_v31  ;;  %3910 = vmatprep.subr.bf16.mxu1 %v3909_v32  ;;  %v1719_v31 = vld [vmem:[#allocation16 + $0x100] sm:$0xff]  ;;  %v4021_v32 = vpack.c.bf16 %v2006_v50, %v2000_v25  ;;  %v4037_v50 = vpack.c.bf16 %v2054_v2, %v2048_v47  ;;  %v1809_v2 = vld [vmem:[#allocation16 + $0x3d0] sm:$0xff] }
 0x322   :  { %4006 = vmatprep.subr.bf16.mxu0 %v4005_v42  ;;  %v2018_v42 = vld [vmem:[#allocation16 + $0xa58] sm:$0xff]  ;;  %v4119_v43 = vpack.c.bf16 %v1719_v31, %v1713_v30  ;;  %v1767_v25 = vld [vmem:[#allocation16 + $0x280] sm:$0xff] }
 0x323   :  { %v2066_v30 = vld [vmem:[#allocation16 + $0xbd8] sm:$0xff]  ;;  %v4135_v31 = vpack.c.bf16 %v1767_v25, %v1761_v24  ;;  %v2095_v47 = vld [vmem:[#allocation16 + $0xcc0] sm:$0xff]  ;;  %v1828_v24 = vld [vmem:[#allocation16 + $0x468] sm:$0xff] }
 0x324   :  { %3912 = vmatpush1.bf16.msra.mxu1 %v3911_v51  ;;  %v2108_v25 = vld [vmem:[#allocation16 + $0xd28] sm:$0xff] }
 0x325   :  { %4008 = vmatpush1.bf16.msra.mxu0 %v4007_v10  ;;  %3914 = vmatprep.subr.bf16.mxu1 %v3913_v52  ;;  %v2017_v10 = vld [vmem:[#allocation16 + $0xa50] sm:$0xff]  ;;  %v1738_v52 = vld [vmem:[#allocation16 + $0x198] sm:$0xff] }
 0x326   :  { %4010 = vmatprep.subr.bf16.mxu0 %v4009_v55  ;;  %v4027_v55 = vpack.c.bf16 %v2017_v10, %v2011_v45  ;;  %v4125_v56 = vpack.c.bf16 %v1744_v58, %v1738_v52  ;;  %v2072_v45 = vld [vmem:[#allocation16 + $0xc08] sm:$0xff]  ;;  %v2071_v52 = vld [vmem:[#allocation16 + $0xc00] sm:$0xff]  ;;  %v1785_v58 = vld [vmem:[#allocation16 + $0x310] sm:$0xff] }
 0x328   :  { %3916 = vmatpush1.bf16.msra.mxu1 %v3915_v1  ;;  %v2029_v1 = vld [vmem:[#allocation16 + $0xab0] sm:$0xff] }
 0x329   :  { %4012 = vmatpush1.bf16.msra.mxu0 %v4011_v5  ;;  %4110 = vmatprep.subr.bf16.mxu1 %v4109_v6  ;;  %v1750_v5 = vld [vmem:[#allocation16 + $0x1f8] sm:$0xff]  ;;  %v1756_v6 = vld [vmem:[#allocation16 + $0x228] sm:$0xff] }
 0x32a   :  { %4014 = vmatprep.subr.bf16.mxu0 %v4013_v9  ;;  %v4031_v9 = vpack.c.bf16 %v2029_v1, %v2023_v59  ;;  %v4129_v11 = vpack.c.bf16 %v1756_v6, %v1750_v5  ;;  %v2084_v59 = vld [vmem:[#allocation16 + $0xc68] sm:$0xff]  ;;  %v2083_v6 = vld [vmem:[#allocation16 + $0xc60] sm:$0xff] }
 0x32b   :  { %1631 = vmatmul.mubr.f32.vlgmr.msra.gmra.mrb[16].mxu1 %v5099_v3  ;;  %v2012_v3 = vld [vmem:[#allocation16 + $0xa28] sm:$0xff] }
 0x32c   :  { %4112 = vmatpush1.bf16.msra.mxu1 %v4111_v18  ;;  %1636 = vmatprep.mubr.f32.mxu1 %v4825_v0  ;;  %v4023_v0 = vpack.c.bf16 %v2005_v33, %v1999_v4  ;;  %v4025_v51 = vpack.c.bf16 %v2018_v42, %v2012_v3  ;;  %v2041_v18 = vld [vmem:[#allocation16 + $0xb10] sm:$0xff]  ;;  %v2060_v4 = vld [vmem:[#allocation16 + $0xba8] sm:$0xff]  ;;  %v1779_v3 = vld [vmem:[#allocation16 + $0x2e0] sm:$0xff] }
 0x32d   :  { %4016 = vmatpush1.bf16.msra.mxu0 %v4015_v21  ;;  %4114 = vmatprep.subr.bf16.mxu1 %v4113_v20  ;;  %v1762_v21 = vld [vmem:[#allocation16 + $0x258] sm:$0xff]  ;;  %v1768_v20 = vld [vmem:[#allocation16 + $0x288] sm:$0xff]  ;;  %v4041_v42 = vpack.c.bf16 %v2066_v30, %v2060_v4  ;;  %v4139_v49 = vpack.c.bf16 %v1779_v3, %v1773_v39  ;;  %v2107_v4 = vld [vmem:[#allocation16 + $0xd20] sm:$0xff] }
 0x32e   :  { %4018 = vmatprep.subr.bf16.mxu0 %v4017_v19  ;;  %v4035_v19 = vpack.c.bf16 %v2041_v18, %v2035_v12  ;;  %v4133_v23 = vpack.c.bf16 %v1768_v20, %v1762_v21  ;;  %v1816_v12 = vld [vmem:[#allocation16 + $0x408] sm:$0xff]  ;;  %v4147_v18 = vpack.c.bf16 %v1803_v7, %v1797_v29  ;;  %v1821_v30 = vld [vmem:[#allocation16 + $0x430] sm:$0xff] }
 0x32f   :  { %1637 = vmatmul.mubr.f32.gmra.mrb[18].mxu1 %v5107_v48  ;;  %v2030_v48 = vld [vmem:[#allocation16 + $0xab8] sm:$0xff]  ;;  %v1840_v39 = vld [vmem:[#allocation16 + $0x4c8] sm:$0xff] }
 0x330   :  { %4116 = vmatpush1.bf16.msra.mxu1 %v4115_v27  ;;  %2605 = vmatprep.mubr.f32.mxu1 %v5113_v60  ;;  %v4029_v63 = vpack.c.bf16 %v2030_v48, %v2024_v53  ;;  %v2053_v27 = vld [vmem:[#allocation16 + $0xb70] sm:$0xff]  ;;  %v1791_v53 = vld [vmem:[#allocation16 + $0x340] sm:$0xff]  ;;  %v4045_v48 = vpack.c.bf16 %v2078_v46, %v2072_v45  ;;  %v2120_v3 = vld [vmem:[#allocation16 + $0xd88] sm:$0xff] }
 0x331   :  { %4020 = vmatpush1.bf16.msra.mxu0 %v4019_v28  ;;  %4118 = vmatprep.subr.bf16.mxu1 %v4117_v16  ;;  %v1774_v28 = vld [vmem:[#allocation16 + $0x2b8] sm:$0xff]  ;;  %v1780_v16 = vld [vmem:[#allocation16 + $0x2e8] sm:$0xff]  ;;  %v2119_v45 = vld [vmem:[#allocation16 + $0xd80] sm:$0xff] }
 0x332   :  { %4022 = vmatprep.subr.bf16.mxu0 %v4021_v32  ;;  %v4039_v32 = vpack.c.bf16 %v2053_v27, %v2047_v26  ;;  %v4137_v33 = vpack.c.bf16 %v1780_v16, %v1774_v28  ;;  %v1822_v26 = vld [vmem:[#allocation16 + $0x438] sm:$0xff]  ;;  %v1833_v46 = vld [vmem:[#allocation16 + $0x490] sm:$0xff]  ;;  %v1864_v29 = vld [vmem:[#allocation16 + $0x588] sm:$0xff] }
 0x333   :  { %v4153_v16 = vpack.c.bf16 %v1828_v24, %v1822_v26  ;;  %v2144_v7 = vld [vmem:[#allocation16 + $0xe48] sm:$0xff] }
 0x334   :  { %4120 = vmatpush1.bf16.msra.mxu1 %v4119_v43  ;;  %v2065_v43 = vld [vmem:[#allocation16 + $0xbd0] sm:$0xff] }
 0x335   :  { %4024 = vmatpush1.bf16.msra.mxu0 %v4023_v0  ;;  %4122 = vmatprep.subr.bf16.mxu1 %v4121_v44  ;;  %v1786_v0 = vld [vmem:[#allocation16 + $0x318] sm:$0xff]  ;;  %v1792_v44 = vld [vmem:[#allocation16 + $0x348] sm:$0xff] }
 0x336   :  { %4026 = vmatprep.subr.bf16.mxu0 %v4025_v51  ;;  %v4043_v51 = vpack.c.bf16 %v2065_v43, %v2059_v34  ;;  %v4141_v10 = vpack.c.bf16 %v1792_v44, %v1786_v0  ;;  %v1834_v34 = vld [vmem:[#allocation16 + $0x498] sm:$0xff] }
 0x337   :  { %v4157_v44 = vpack.c.bf16 %v1840_v39, %v1834_v34 }
 0x338   :  { %4124 = vmatpush1.bf16.msra.mxu1 %v4123_v54  ;;  %v2077_v54 = vld [vmem:[#allocation16 + $0xc30] sm:$0xff] }
 0x339   :  { %4028 = vmatpush1.bf16.msra.mxu0 %v4027_v55  ;;  %4126 = vmatprep.subr.bf16.mxu1 %v4125_v56  ;;  %v1798_v55 = vld [vmem:[#allocation16 + $0x378] sm:$0xff]  ;;  %v1804_v56 = vld [vmem:[#allocation16 + $0x3a8] sm:$0xff]  ;;  %v4047_v1 = vpack.c.bf16 %v2077_v54, %v2071_v52 }
 0x33a   :  { %4030 = vmatprep.subr.bf16.mxu0 %v4029_v63  ;;  %v4143_v63 = vpack.c.bf16 %v1791_v53, %v1785_v58  ;;  %v4145_v5 = vpack.c.bf16 %v1804_v56, %v1798_v55  ;;  %v1846_v52 = vld [vmem:[#allocation16 + $0x4f8] sm:$0xff]  ;;  %v1852_v58 = vld [vmem:[#allocation16 + $0x528] sm:$0xff] }
 0x33b   :  { %v2132_v53 = vld [vmem:[#allocation16 + $0xde8] sm:$0xff]  ;;  %v4161_v56 = vpack.c.bf16 %v1852_v58, %v1846_v52 }
 0x33c   :  { %4128 = vmatpush1.bf16.msra.mxu1 %v4127_v8  ;;  %v4049_v8 = vpack.c.bf16 %v2090_v61, %v2084_v59  ;;  %v2131_v59 = vld [vmem:[#allocation16 + $0xde0] sm:$0xff]  ;;  %v1845_v61 = vld [vmem:[#allocation16 + $0x4f0] sm:$0xff] }
 0x33d   :  { %4032 = vmatpush1.bf16.msra.mxu0 %v4031_v9  ;;  %4130 = vmatprep.subr.bf16.mxu1 %v4129_v11  ;;  %v2089_v9 = vld [vmem:[#allocation16 + $0xc90] sm:$0xff]  ;;  %v1810_v11 = vld [vmem:[#allocation16 + $0x3d8] sm:$0xff] }
 0x33e   :  { %4034 = vmatprep.subr.bf16.mxu0 %v4033_v17  ;;  %v2102_v17 = vld [vmem:[#allocation16 + $0xcf8] sm:$0xff]  ;;  %v4051_v21 = vpack.c.bf16 %v2089_v9, %v2083_v6  ;;  %v4149_v20 = vpack.c.bf16 %v1816_v12, %v1810_v11 }
 0x33f   :  { %v1858_v6 = vld [vmem:[#allocation16 + $0x558] sm:$0xff] }
 0x340   :  { %4132 = vmatpush1.bf16.msra.mxu1 %v4131_v57  ;;  %v1815_v57 = vld [vmem:[#allocation16 + $0x400] sm:$0xff]  ;;  %v4165_v12 = vpack.c.bf16 %v1864_v29, %v1858_v6 }
 0x341   :  { %4036 = vmatpush1.bf16.msra.mxu0 %v4035_v19  ;;  %4134 = vmatprep.subr.bf16.mxu1 %v4133_v23  ;;  %v4053_v19 = vpack.c.bf16 %v2102_v17, %v2096_v14  ;;  %v2101_v23 = vld [vmem:[#allocation16 + $0xcf0] sm:$0xff]  ;;  %v4151_v27 = vpack.c.bf16 %v1815_v57, %v1809_v2  ;;  %v2143_v14 = vld [vmem:[#allocation16 + $0xe40] sm:$0xff]  ;;  %v1876_v2 = vld [vmem:[#allocation16 + $0x5e8] sm:$0xff] }
 0x342   :  { %4038 = vmatprep.subr.bf16.mxu0 %v4037_v50  ;;  %v2114_v50 = vld [vmem:[#allocation16 + $0xd58] sm:$0xff]  ;;  %v4055_v28 = vpack.c.bf16 %v2101_v23, %v2095_v47  ;;  %v1857_v17 = vld [vmem:[#allocation16 + $0x550] sm:$0xff]  ;;  %v2156_v57 = vld [vmem:[#allocation16 + $0xea8] sm:$0xff] }
 0x343   :  { %v1870_v47 = vld [vmem:[#allocation16 + $0x5b8] sm:$0xff] }
 0x344   :  { %4136 = vmatpush1.bf16.msra.mxu1 %v4135_v31  ;;  %v1827_v31 = vld [vmem:[#allocation16 + $0x460] sm:$0xff]  ;;  %v4169_v24 = vpack.c.bf16 %v1876_v2, %v1870_v47 }
 0x345   :  { %4040 = vmatpush1.bf16.msra.mxu0 %v4039_v32  ;;  %4138 = vmatprep.subr.bf16.mxu1 %v4137_v33  ;;  %v4057_v32 = vpack.c.bf16 %v2114_v50, %v2108_v25  ;;  %v2113_v33 = vld [vmem:[#allocation16 + $0xd50] sm:$0xff]  ;;  %v4155_v43 = vpack.c.bf16 %v1827_v31, %v1821_v30  ;;  %v2155_v25 = vld [vmem:[#allocation16 + $0xea0] sm:$0xff]  ;;  %v1888_v30 = vld [vmem:[#allocation16 + $0x648] sm:$0xff] }
 0x346   :  { %4042 = vmatprep.subr.bf16.mxu0 %v4041_v42  ;;  %v2126_v42 = vld [vmem:[#allocation16 + $0xdb8] sm:$0xff]  ;;  %v4059_v0 = vpack.c.bf16 %v2113_v33, %v2107_v4  ;;  %v1869_v50 = vld [vmem:[#allocation16 + $0x5b0] sm:$0xff]  ;;  %v2168_v31 = vld [vmem:[#allocation16 + $0xf08] sm:$0xff] }
 0x347   :  { %v1882_v4 = vld [vmem:[#allocation16 + $0x618] sm:$0xff] }
 0x348   :  { %4140 = vmatpush1.bf16.msra.mxu1 %v4139_v49  ;;  %v1839_v49 = vld [vmem:[#allocation16 + $0x4c0] sm:$0xff]  ;;  %v4173_v39 = vpack.c.bf16 %v1888_v30, %v1882_v4 }
 0x349   :  { %4044 = vmatpush1.bf16.msra.mxu0 %v4043_v51  ;;  %4142 = vmatprep.subr.bf16.mxu1 %v4141_v10  ;;  %v4061_v51 = vpack.c.bf16 %v2126_v42, %v2120_v3  ;;  %v2125_v10 = vld [vmem:[#allocation16 + $0xdb0] sm:$0xff]  ;;  %v4159_v54 = vpack.c.bf16 %v1839_v49, %v1833_v46  ;;  %v2167_v3 = vld [vmem:[#allocation16 + $0xf00] sm:$0xff]  ;;  %v1900_v46 = vld [vmem:[#allocation16 + $0x6a8] sm:$0xff] }
 0x34a   :  { %4046 = vmatprep.subr.bf16.mxu0 %v4045_v48  ;;  %v2138_v48 = vld [vmem:[#allocation16 + $0xe18] sm:$0xff]  ;;  %v4063_v55 = vpack.c.bf16 %v2125_v10, %v2119_v45  ;;  %v1881_v42 = vld [vmem:[#allocation16 + $0x610] sm:$0xff]  ;;  %v2180_v49 = vld [vmem:[#allocation16 + $0xf68] sm:$0xff] }
 0x34b   :  { %v1894_v45 = vld [vmem:[#allocation16 + $0x678] sm:$0xff] }
 0x34c   :  { %2464 = vmatmul.mubr.f32.vlgmr.msra.gmra.mrb[12].mxu0 %v5122_v15  ;;  %4144 = vmatpush1.bf16.msra.mxu1 %v4143_v63  ;;  %v1851_v63 = vld [vmem:[#allocation16 + $0x520] sm:$0xff]  ;;  %v4177_v58 = vpack.c.bf16 %v1900_v46, %v1894_v45 }
 0x34d   :  { %4048 = vmatpush1.bf16.msra.mxu0 %v4047_v1  ;;  %4146 = vmatprep.subr.bf16.mxu1 %v4145_v5  ;;  %v4065_v1 = vpack.c.bf16 %v2138_v48, %v2132_v53  ;;  %v2137_v5 = vld [vmem:[#allocation16 + $0xe10] sm:$0xff]  ;;  %v4163_v9 = vpack.c.bf16 %v1851_v63, %v1845_v61  ;;  %v2179_v53 = vld [vmem:[#allocation16 + $0xf60] sm:$0xff]  ;;  %v1912_v61 = vld [vmem:[#allocation16 + $0x708] sm:$0xff] }
 0x34e   :  { %4050 = vmatprep.subr.bf16.mxu0 %v4049_v8  ;;  %2534 = vmatprep.mubr.f32.mxu0 %v5142_v13  ;;  %v2150_v8 = vld [vmem:[#allocation16 + $0xe78] sm:$0xff]  ;;  %v4067_v11 = vpack.c.bf16 %v2137_v5, %v2131_v59  ;;  %v1893_v48 = vld [vmem:[#allocation16 + $0x670] sm:$0xff]  ;;  %v2192_v63 = vld [vmem:[#allocation16 + $0xfc8] sm:$0xff] }
 0x34f   :  { %v1906_v59 = vld [vmem:[#allocation16 + $0x6d8] sm:$0xff] }
 0x350   :  { %4148 = vmatpush1.bf16.msra.mxu1 %v4147_v18  ;;  %v1863_v18 = vld [vmem:[#allocation16 + $0x580] sm:$0xff]  ;;  %v4181_v29 = vpack.c.bf16 %v1912_v61, %v1906_v59 }
 0x351   :  { %4052 = vmatpush1.bf16.msra.mxu0 %v4051_v21  ;;  %4150 = vmatprep.subr.bf16.mxu1 %v4149_v20  ;;  %v4069_v21 = vpack.c.bf16 %v2150_v8, %v2144_v7  ;;  %v2149_v20 = vld [vmem:[#allocation16 + $0xe70] sm:$0xff]  ;;  %v4167_v23 = vpack.c.bf16 %v1863_v18, %v1857_v17  ;;  %v2191_v7 = vld [vmem:[#allocation16 + $0xfc0] sm:$0xff]  ;;  %v1924_v17 = vld [vmem:[#allocation16 + $0x768] sm:$0xff] }
 0x352   :  { %4054 = vmatprep.subr.bf16.mxu0 %v4053_v19  ;;  %v2162_v19 = vld [vmem:[#allocation16 + $0xed8] sm:$0xff]  ;;  %v4071_v26 = vpack.c.bf16 %v2149_v20, %v2143_v14  ;;  %v1905_v8 = vld [vmem:[#allocation16 + $0x6d0] sm:$0xff]  ;;  %v2204_v18 = vld [vmem:[#allocation16 + $0x1028] sm:$0xff] }
 0x353   :  { %v1918_v14 = vld [vmem:[#allocation16 + $0x738] sm:$0xff] }
 0x354   :  { %4152 = vmatpush1.bf16.msra.mxu1 %v4151_v27  ;;  %v1875_v27 = vld [vmem:[#allocation16 + $0x5e0] sm:$0xff]  ;;  %v4185_v2 = vpack.c.bf16 %v1924_v17, %v1918_v14 }
 0x355   :  { %4056 = vmatpush1.bf16.msra.mxu0 %v4055_v28  ;;  %4154 = vmatprep.subr.bf16.mxu1 %v4153_v16  ;;  %v4073_v28 = vpack.c.bf16 %v2162_v19, %v2156_v57  ;;  %v2161_v16 = vld [vmem:[#allocation16 + $0xed0] sm:$0xff]  ;;  %v4171_v33 = vpack.c.bf16 %v1875_v27, %v1869_v50  ;;  %v2203_v57 = vld [vmem:[#allocation16 + $0x1020] sm:$0xff]  ;;  %v1936_v50 = vld [vmem:[#allocation16 + $0x7c8] sm:$0xff] }
 0x356   :  { %4058 = vmatprep.subr.bf16.mxu0 %v4057_v32  ;;  %v2174_v32 = vld [vmem:[#allocation16 + $0xf38] sm:$0xff]  ;;  %v4075_v34 = vpack.c.bf16 %v2161_v16, %v2155_v25  ;;  %v1917_v19 = vld [vmem:[#allocation16 + $0x730] sm:$0xff]  ;;  %v2216_v27 = vld [vmem:[#allocation16 + $0x1088] sm:$0xff] }
 0x357   :  { %v1930_v25 = vld [vmem:[#allocation16 + $0x798] sm:$0xff] }
 0x358   :  { %4156 = vmatpush1.bf16.msra.mxu1 %v4155_v43  ;;  %v1887_v43 = vld [vmem:[#allocation16 + $0x640] sm:$0xff]  ;;  %v4189_v30 = vpack.c.bf16 %v1936_v50, %v1930_v25 }
 0x359   :  { %4060 = vmatpush1.bf16.msra.mxu0 %v4059_v0  ;;  %4158 = vmatprep.subr.bf16.mxu1 %v4157_v44  ;;  %v4077_v0 = vpack.c.bf16 %v2174_v32, %v2168_v31  ;;  %v2173_v44 = vld [vmem:[#allocation16 + $0xf30] sm:$0xff]  ;;  %v4175_v10 = vpack.c.bf16 %v1887_v43, %v1881_v42  ;;  %v2215_v31 = vld [vmem:[#allocation16 + $0x1080] sm:$0xff]  ;;  %v1948_v42 = vld [vmem:[#allocation16 + $0x828] sm:$0xff] }
 0x35a   :  { %4062 = vmatprep.subr.bf16.mxu0 %v4061_v51  ;;  %v2186_v51 = vld [vmem:[#allocation16 + $0xf98] sm:$0xff]  ;;  %v4079_v52 = vpack.c.bf16 %v2173_v44, %v2167_v3  ;;  %v1929_v32 = vld [vmem:[#allocation16 + $0x790] sm:$0xff]  ;;  %v2228_v43 = vld [vmem:[#allocation16 + $0x10e8] sm:$0xff] }
 0x35b   :  { %v1942_v3 = vld [vmem:[#allocation16 + $0x7f8] sm:$0xff] }
 0x35c   :  { %4160 = vmatpush1.bf16.msra.mxu1 %v4159_v54  ;;  %v1899_v54 = vld [vmem:[#allocation16 + $0x6a0] sm:$0xff]  ;;  %v4193_v46 = vpack.c.bf16 %v1948_v42, %v1942_v3 }
 0x35d   :  { %4064 = vmatpush1.bf16.msra.mxu0 %v4063_v55  ;;  %4162 = vmatprep.subr.bf16.mxu1 %v4161_v56  ;;  %v4081_v55 = vpack.c.bf16 %v2186_v51, %v2180_v49  ;;  %v2185_v56 = vld [vmem:[#allocation16 + $0xf90] sm:$0xff]  ;;  %v4179_v5 = vpack.c.bf16 %v1899_v54, %v1893_v48  ;;  %v2227_v49 = vld [vmem:[#allocation16 + $0x10e0] sm:$0xff]  ;;  %v1960_v48 = vld [vmem:[#allocation16 + $0x888] sm:$0xff] }
 0x35e   :  { %4066 = vmatprep.subr.bf16.mxu0 %v4065_v1  ;;  %v2198_v1 = vld [vmem:[#allocation16 + $0xff8] sm:$0xff]  ;;  %v4083_v6 = vpack.c.bf16 %v2185_v56, %v2179_v53  ;;  %v1941_v51 = vld [vmem:[#allocation16 + $0x7f0] sm:$0xff]  ;;  %v2240_v54 = vld [vmem:[#allocation16 + $0x1148] sm:$0xff] }
 0x35f   :  { %v1954_v53 = vld [vmem:[#allocation16 + $0x858] sm:$0xff] }
 0x360   :  { %4164 = vmatpush1.bf16.msra.mxu1 %v4163_v9  ;;  %v1911_v9 = vld [vmem:[#allocation16 + $0x700] sm:$0xff]  ;;  %v4197_v61 = vpack.c.bf16 %v1960_v48, %v1954_v53 }
 0x361   :  { %4068 = vmatpush1.bf16.msra.mxu0 %v4067_v11  ;;  %4166 = vmatprep.subr.bf16.mxu1 %v4165_v12  ;;  %v4085_v11 = vpack.c.bf16 %v2198_v1, %v2192_v63  ;;  %v2197_v12 = vld [vmem:[#allocation16 + $0xff0] sm:$0xff]  ;;  %v4183_v20 = vpack.c.bf16 %v1911_v9, %v1905_v8  ;;  %v2239_v63 = vld [vmem:[#allocation16 + $0x1140] sm:$0xff]  ;;  %v1972_v8 = vld [vmem:[#allocation16 + $0x8e8] sm:$0xff] }
 0x362   :  { %4070 = vmatprep.subr.bf16.mxu0 %v4069_v21  ;;  %v2210_v21 = vld [vmem:[#allocation16 + $0x1058] sm:$0xff]  ;;  %v4087_v47 = vpack.c.bf16 %v2197_v12, %v2191_v7  ;;  %v1953_v1 = vld [vmem:[#allocation16 + $0x850] sm:$0xff]  ;;  %v2252_v9 = vld [vmem:[#allocation16 + $0x11a8] sm:$0xff] }
 0x363   :  { %v1966_v7 = vld [vmem:[#allocation16 + $0x8b8] sm:$0xff] }
 0x364   :  { %4168 = vmatpush1.bf16.msra.mxu1 %v4167_v23  ;;  %v1923_v23 = vld [vmem:[#allocation16 + $0x760] sm:$0xff]  ;;  %v4201_v17 = vpack.c.bf16 %v1972_v8, %v1966_v7  ;;  %v2013_v8 = vld [vmem:[#allocation16 + $0xa30] sm:$0xff] }
 0x365   :  { %4072 = vmatpush1.bf16.msra.mxu0 %v4071_v26  ;;  %4170 = vmatprep.subr.bf16.mxu1 %v4169_v24  ;;  %v4089_v26 = vpack.c.bf16 %v2210_v21, %v2204_v18  ;;  %v2209_v24 = vld [vmem:[#allocation16 + $0x1050] sm:$0xff]  ;;  %v4187_v16 = vpack.c.bf16 %v1923_v23, %v1917_v19  ;;  %v2251_v18 = vld [vmem:[#allocation16 + $0x11a0] sm:$0xff]  ;;  %v1984_v19 = vld [vmem:[#allocation16 + $0x948] sm:$0xff] }
 0x366   :  { %4074 = vmatprep.subr.bf16.mxu0 %v4073_v28  ;;  %v2222_v28 = vld [vmem:[#allocation16 + $0x10b8] sm:$0xff]  ;;  %v4091_v4 = vpack.c.bf16 %v2209_v24, %v2203_v57  ;;  %v1965_v21 = vld [vmem:[#allocation16 + $0x8b0] sm:$0xff]  ;;  %v1692_v23 = vld [vmem:[#allocation16 + $0x28] sm:$0xff] }
 0x367   :  { %v1978_v57 = vld [vmem:[#allocation16 + $0x918] sm:$0xff] }
 0x368   :  { %4172 = vmatpush1.bf16.msra.mxu1 %v4171_v33  ;;  %v1935_v33 = vld [vmem:[#allocation16 + $0x7c0] sm:$0xff]  ;;  %v4205_v50 = vpack.c.bf16 %v1984_v19, %v1978_v57  ;;  %v2025_v57 = vld [vmem:[#allocation16 + $0xa90] sm:$0xff] }
 0x369   :  { %4076 = vmatpush1.bf16.msra.mxu0 %v4075_v34  ;;  %4174 = vmatprep.subr.bf16.mxu1 %v4173_v39  ;;  %v4093_v34 = vpack.c.bf16 %v2222_v28, %v2216_v27  ;;  %v2221_v39 = vld [vmem:[#allocation16 + $0x10b0] sm:$0xff]  ;;  %v4191_v44 = vpack.c.bf16 %v1935_v33, %v1929_v32  ;;  %v1983_v28 = vld [vmem:[#allocation16 + $0x940] sm:$0xff]  ;;  %v1996_v32 = vld [vmem:[#allocation16 + $0x9a8] sm:$0xff] }
 0x36a   :  { %4078 = vmatprep.subr.bf16.mxu0 %v4077_v0  ;;  %v2234_v0 = vld [vmem:[#allocation16 + $0x1118] sm:$0xff]  ;;  %v4095_v45 = vpack.c.bf16 %v2221_v39, %v2215_v31  ;;  %v1977_v27 = vld [vmem:[#allocation16 + $0x910] sm:$0xff]  ;;  %v1704_v33 = vld [vmem:[#allocation16 + $0x88] sm:$0xff] }
 0x36b   :  { %2606 = vmatmul.mubr.f32.vlgmr.msra.gmra.mrb[20].mxu1 %v5103_v35  ;;  %v1990_v31 = vld [vmem:[#allocation16 + $0x978] sm:$0xff]  ;;  %v4207_v39 = vpack.c.bf16 %v1983_v28, %v1977_v27  ;;  %v2031_v19 = vld [vmem:[#allocation16 + $0xac0] sm:$0xff]  ;;  %v1752_v27 = vld [vmem:[#allocation16 + $0x208] sm:$0xff] }
 0x36c   :  { %4176 = vmatpush1.bf16.msra.mxu1 %v4175_v10  ;;  %2676 = vmatprep.mubr.f32.mxu1 %v5126_v22  ;;  %v1947_v10 = vld [vmem:[#allocation16 + $0x820] sm:$0xff]  ;;  %v4209_v42 = vpack.c.bf16 %v1996_v32, %v1990_v31  ;;  %v1758_v28 = vld [vmem:[#allocation16 + $0x238] sm:$0xff] }
 0x36d   :  { %4080 = vmatpush1.bf16.msra.mxu0 %v4079_v52  ;;  %4178 = vmatprep.subr.bf16.mxu1 %v4177_v58  ;;  %v4097_v52 = vpack.c.bf16 %v2234_v0, %v2228_v43  ;;  %v2233_v58 = vld [vmem:[#allocation16 + $0x1110] sm:$0xff]  ;;  %v4195_v56 = vpack.c.bf16 %v1947_v10, %v1941_v51  ;;  %v1995_v0 = vld [vmem:[#allocation16 + $0x9a0] sm:$0xff]  ;;  %v2008_v51 = vld [vmem:[#allocation16 + $0xa08] sm:$0xff] }
 0x36e   :  { %4082 = vmatprep.subr.bf16.mxu0 %v4081_v55  ;;  %v2246_v55 = vld [vmem:[#allocation16 + $0x1178] sm:$0xff]  ;;  %v4099_v59 = vpack.c.bf16 %v2233_v58, %v2227_v49  ;;  %v1989_v43 = vld [vmem:[#allocation16 + $0x970] sm:$0xff]  ;;  %v1716_v10 = vld [vmem:[#allocation16 + $0xe8] sm:$0xff] }
 0x36f   :  { %v2002_v49 = vld [vmem:[#allocation16 + $0x9d8] sm:$0xff]  ;;  %v4211_v58 = vpack.c.bf16 %v1995_v0, %v1989_v43  ;;  %v2056_v0 = vld [vmem:[#allocation16 + $0xb88] sm:$0xff] }
 0x370   :  { %4180 = vmatpush1.bf16.msra.mxu1 %v4179_v5  ;;  %v1959_v5 = vld [vmem:[#allocation16 + $0x880] sm:$0xff]  ;;  %v4213_v48 = vpack.c.bf16 %v2008_v51, %v2002_v49  ;;  %v2050_v43 = vld [vmem:[#allocation16 + $0xb58] sm:$0xff] }
 0x371   :  { %4084 = vmatpush1.bf16.msra.mxu0 %v4083_v6  ;;  %4182 = vmatprep.subr.bf16.mxu1 %v4181_v29  ;;  %v4101_v6 = vpack.c.bf16 %v2246_v55, %v2240_v54  ;;  %v2245_v29 = vld [vmem:[#allocation16 + $0x1170] sm:$0xff]  ;;  %v4199_v12 = vpack.c.bf16 %v1959_v5, %v1953_v1  ;;  %v2007_v55 = vld [vmem:[#allocation16 + $0xa00] sm:$0xff]  ;;  %v2020_v1 = vld [vmem:[#allocation16 + $0xa68] sm:$0xff] }
 0x372   :  { %4086 = vmatprep.subr.bf16.mxu0 %v4085_v11  ;;  %v2258_v11 = vld [vmem:[#allocation16 + $0x11d8] sm:$0xff]  ;;  %v4103_v14 = vpack.c.bf16 %v2245_v29, %v2239_v63  ;;  %v2001_v54 = vld [vmem:[#allocation16 + $0x9d0] sm:$0xff]  ;;  %v1728_v5 = vld [vmem:[#allocation16 + $0x148] sm:$0xff] }
 0x373   :  { %v2014_v63 = vld [vmem:[#allocation16 + $0xa38] sm:$0xff] }
 0x374   :  { %4184 = vmatpush1.bf16.msra.mxu1 %v4183_v20  ;;  %v1971_v20 = vld [vmem:[#allocation16 + $0x8e0] sm:$0xff]  ;;  %v4217_v7 = vpack.c.bf16 %v2020_v1, %v2014_v63  ;;  %v1770_v49 = vld [vmem:[#allocation16 + $0x298] sm:$0xff]  ;;  %v1769_v63 = vld [vmem:[#allocation16 + $0x290] sm:$0xff] }
 0x375   :  { %4088 = vmatpush1.bf16.msra.mxu0 %v4087_v47  ;;  %4186 = vmatprep.subr.bf16.mxu1 %v4185_v2  ;;  %v4105_v47 = vpack.c.bf16 %v2258_v11, %v2252_v9  ;;  %v2257_v2 = vld [vmem:[#allocation16 + $0x11d0] sm:$0xff]  ;;  %v4203_v24 = vpack.c.bf16 %v1971_v20, %v1965_v21  ;;  %v2019_v9 = vld [vmem:[#allocation16 + $0xa60] sm:$0xff]  ;;  %v1740_v21 = vld [vmem:[#allocation16 + $0x1a8] sm:$0xff] }
 0x376   :  { %4090 = vmatprep.subr.bf16.mxu0 %v4089_v26  ;;  %v1698_v26 = vld [vmem:[#allocation16 + $0x58] sm:$0xff]  ;;  %v4107_v25 = vpack.c.bf16 %v2257_v2, %v2251_v18  ;;  %v1727_v11 = vld [vmem:[#allocation16 + $0x140] sm:$0xff]  ;;  %v2032_v18 = vld [vmem:[#allocation16 + $0xac8] sm:$0xff] }
 0x377   :  { %v1746_v20 = vld [vmem:[#allocation16 + $0x1d8] sm:$0xff] }
 0x378   :  { %4188 = vmatpush1.bf16.msra.mxu1 %v4187_v16  ;;  %v1691_v16 = vld [vmem:[#allocation16 + $0x20] sm:$0xff]  ;;  %v2062_v1 = vld [vmem:[#allocation16 + $0xbb8] sm:$0xff] }
 0x379   :  { %4092 = vmatpush1.bf16.msra.mxu0 %v4091_v4  ;;  %4190 = vmatprep.subr.bf16.mxu1 %v4189_v30  ;;  %v4301_v4 = vpack.c.bf16 %v1698_v26, %v1692_v23  ;;  %v1697_v30 = vld [vmem:[#allocation16 + $0x50] sm:$0xff]  ;;  %v1739_v23 = vld [vmem:[#allocation16 + $0x1a0] sm:$0xff]  ;;  %v4317_v26 = vpack.c.bf16 %v1746_v20, %v1740_v21 }
 0x37a   :  { %4094 = vmatprep.subr.bf16.mxu0 %v4093_v34  ;;  %v1710_v34 = vld [vmem:[#allocation16 + $0xb8] sm:$0xff]  ;;  %v4303_v3 = vpack.c.bf16 %v1697_v30, %v1691_v16  ;;  %v4223_v16 = vpack.c.bf16 %v2031_v19, %v2025_v57  ;;  %v1165_v30 = vsub.s32 3, %v5018_v37  ;;  %v2061_v21 = vld [vmem:[#allocation16 + $0xbb0] sm:$0xff]  ;;  %v2067_v20 = vld [vmem:[#allocation16 + $0xbe0] sm:$0xff] }
 0x37b   :  { %v1781_v19 = vld [vmem:[#allocation16 + $0x2f0] sm:$0xff] }
 0x37c   :  { %4192 = vmatpush1.bf16.msra.mxu1 %v4191_v44  ;;  %v1703_v44 = vld [vmem:[#allocation16 + $0x80] sm:$0xff] }
 0x37d   :  { %4096 = vmatpush1.bf16.msra.mxu0 %v4095_v45  ;;  %4194 = vmatprep.subr.bf16.mxu1 %v4193_v46  ;;  %v4305_v45 = vpack.c.bf16 %v1710_v34, %v1704_v33  ;;  %v1709_v46 = vld [vmem:[#allocation16 + $0xb0] sm:$0xff]  ;;  %v2043_v34 = vld [vmem:[#allocation16 + $0xb20] sm:$0xff] }
 0x37e   :  { %4098 = vmatprep.subr.bf16.mxu0 %v4097_v52  ;;  %v1722_v52 = vld [vmem:[#allocation16 + $0x118] sm:$0xff]  ;;  %v4307_v53 = vpack.c.bf16 %v1709_v46, %v1703_v44  ;;  %v2037_v33 = vld [vmem:[#allocation16 + $0xaf0] sm:$0xff]  ;;  %v1764_v46 = vld [vmem:[#allocation16 + $0x268] sm:$0xff] }
 0x380   :  { %4196 = vmatpush1.bf16.msra.mxu1 %v4195_v56  ;;  %v1715_v56 = vld [vmem:[#allocation16 + $0xe0] sm:$0xff] }
 0x381   :  { %4100 = vmatpush1.bf16.msra.mxu0 %v4099_v59  ;;  %4198 = vmatprep.subr.bf16.mxu1 %v4197_v61  ;;  %v4309_v59 = vpack.c.bf16 %v1722_v52, %v1716_v10  ;;  %v1721_v61 = vld [vmem:[#allocation16 + $0x110] sm:$0xff]  ;;  %v4227_v52 = vpack.c.bf16 %v2043_v34, %v2037_v33  ;;  %v2079_v33 = vld [vmem:[#allocation16 + $0xc40] sm:$0xff] }
 0x382   :  { %4102 = vmatprep.subr.bf16.mxu0 %v4101_v6  ;;  %v1734_v6 = vld [vmem:[#allocation16 + $0x178] sm:$0xff]  ;;  %v4311_v29 = vpack.c.bf16 %v1721_v61, %v1715_v56  ;;  %v4325_v61 = vpack.c.bf16 %v1770_v49, %v1764_v46  ;;  %v1787_v34 = vld [vmem:[#allocation16 + $0x320] sm:$0xff] }
 0x383   :  { %v1806_v46 = vld [vmem:[#allocation16 + $0x3b8] sm:$0xff] }
 0x384   :  { %4200 = vmatpush1.bf16.msra.mxu1 %v4199_v12  ;;  %v4313_v12 = vpack.c.bf16 %v1734_v6, %v1728_v5  ;;  %v2068_v5 = vld [vmem:[#allocation16 + $0xbe8] sm:$0xff] }
 0x385   :  { %4104 = vmatpush1.bf16.msra.mxu0 %v4103_v14  ;;  %4202 = vmatprep.subr.bf16.mxu1 %v4201_v17  ;;  %v1733_v14 = vld [vmem:[#allocation16 + $0x170] sm:$0xff]  ;;  %v2026_v17 = vld [vmem:[#allocation16 + $0xa98] sm:$0xff] }
 0x386   :  { %4106 = vmatprep.subr.bf16.mxu0 %v4105_v47  ;;  %v4315_v47 = vpack.c.bf16 %v1733_v14, %v1727_v11  ;;  %v4221_v2 = vpack.c.bf16 %v2032_v18, %v2026_v17  ;;  %v4233_v18 = vpack.c.bf16 %v2068_v5, %v2062_v1  ;;  %v1818_v1 = vld [vmem:[#allocation16 + $0x418] sm:$0xff] }
 0x388   :  { %4204 = vmatpush1.bf16.msra.mxu1 %v4203_v24  ;;  %v1745_v24 = vld [vmem:[#allocation16 + $0x1d0] sm:$0xff] }
 0x389   :  { %4108 = vmatpush1.bf16.msra.mxu0 %v4107_v25  ;;  %4206 = vmatprep.subr.bf16.mxu1 %v4205_v50  ;;  %v2038_v25 = vld [vmem:[#allocation16 + $0xaf8] sm:$0xff]  ;;  %v2044_v50 = vld [vmem:[#allocation16 + $0xb28] sm:$0xff]  ;;  %v4319_v31 = vpack.c.bf16 %v1745_v24, %v1739_v23 }
 0x38a   :  { %4302 = vmatprep.subr.bf16.mxu0 %v4301_v4  ;;  %v5150_v4 = vld [vmem:[#allocation14] sm:$0x3f]  ;;  %v4225_v32 = vpack.c.bf16 %v2044_v50, %v2038_v25  ;;  %v1788_v50 = vld [vmem:[#allocation16 + $0x328] sm:$0xff] }
 0x38b   :  { %v5155_v44 = vrot.slane %v5150_v4, %v5021_v38  ;;  %v5163_v51 = vrot.slane %v5150_v4, %v5024_v40  ;;  %v5168_v10 = vrot.slane %v5150_v4, %v1165_v30  ;;  %v2074_v23 = vld [vmem:[#allocation16 + $0xc18] sm:$0xff] }
 0x38c   :  { %2535 = vmatmul.mubr.f32.vlgmr.msra.gmra.mrb[12].mxu0 %v5138_v62  ;;  %4208 = vmatpush1.bf16.msra.mxu1 %v4207_v39  ;;  %v4215_v62 = vpack.c.bf16 %v2007_v55, %v2001_v54  ;;  %v1751_v39 = vld [vmem:[#allocation16 + $0x200] sm:$0xff] }
 0x38d   :  { %4304 = vmatpush1.bf16.msra.mxu0 %v4303_v3  ;;  %4210 = vmatprep.subr.bf16.mxu1 %v4209_v42  ;;  %v4321_v3 = vpack.c.bf16 %v1758_v28, %v1752_v27  ;;  %v1757_v42 = vld [vmem:[#allocation16 + $0x230] sm:$0xff]  ;;  %v2055_v54 = vld [vmem:[#allocation16 + $0xb80] sm:$0xff]  ;;  %v1794_v27 = vld [vmem:[#allocation16 + $0x358] sm:$0xff]  ;;  %v4235_v28 = vpack.c.bf16 %v2067_v20, %v2061_v21 }
 0x38e   :  { %4306 = vmatprep.subr.bf16.mxu0 %v4305_v45  ;;  %2818 = vmatprep.mubr.f32.mxu0 %v5113_v60  ;;  %v4219_v60 = vpack.c.bf16 %v2019_v9, %v2013_v8  ;;  %v5159_v45 = vrot.slane %v5150_v4, %v5027_v41  ;;  %v1763_v55 = vld [vmem:[#allocation16 + $0x260] sm:$0xff]  ;;  %v1776_v8 = vld [vmem:[#allocation16 + $0x2c8] sm:$0xff]  ;;  %v1782_v9 = vld [vmem:[#allocation16 + $0x2f8] sm:$0xff] }
 0x38f   :  { %v4327_v17 = vpack.c.bf16 %v1769_v63, %v1763_v55  ;;  %v4329_v57 = vpack.c.bf16 %v1782_v9, %v1776_v8  ;;  %v1812_v63 = vld [vmem:[#allocation16 + $0x3e8] sm:$0xff]  ;;  %v2097_v8 = vld [vmem:[#allocation16 + $0xcd0] sm:$0xff]  ;;  %v2103_v9 = vld [vmem:[#allocation16 + $0xd00] sm:$0xff] }
 0x390   :  { %4212 = vmatpush1.bf16.msra.mxu1 %v4211_v58  ;;  %v4323_v58 = vpack.c.bf16 %v1757_v42, %v1751_v39  ;;  %v4333_v39 = vpack.c.bf16 %v1794_v27, %v1788_v50  ;;  %v2086_v42 = vld [vmem:[#allocation16 + $0xc78] sm:$0xff]  ;;  %v2116_v20 = vld [vmem:[#allocation16 + $0xd68] sm:$0xff]  ;;  %v2109_v50 = vld [vmem:[#allocation16 + $0xd30] sm:$0xff] }
 0x391   :  { %4308 = vmatpush1.bf16.msra.mxu0 %v4307_v53  ;;  %4214 = vmatprep.subr.bf16.mxu1 %v4213_v48  ;;  %v4229_v53 = vpack.c.bf16 %v2056_v0, %v2050_v43  ;;  %v2049_v48 = vld [vmem:[#allocation16 + $0xb50] sm:$0xff]  ;;  %v2092_v43 = vld [vmem:[#allocation16 + $0xca8] sm:$0xff]  ;;  %v2110_v21 = vld [vmem:[#allocation16 + $0xd38] sm:$0xff] }
 0x392   :  { %4310 = vmatprep.subr.bf16.mxu0 %v4309_v59  ;;  %v4231_v14 = vpack.c.bf16 %v2055_v54, %v2049_v48  ;;  %v1800_v0 = vld [vmem:[#allocation16 + $0x388] sm:$0xff]  ;;  %v2091_v48 = vld [vmem:[#allocation16 + $0xca0] sm:$0xff] }
 0x393   :  { %v1799_v54 = vld [vmem:[#allocation16 + $0x380] sm:$0xff]  ;;  %v4337_v55 = vpack.c.bf16 %v1806_v46, %v1800_v0  ;;  %v2121_v0 = vld [vmem:[#allocation16 + $0xd90] sm:$0xff] }
 0x394   :  { %4216 = vmatpush1.bf16.msra.mxu1 %v4215_v62  ;;  %v2115_v27 = vld [vmem:[#allocation16 + $0xd60] sm:$0xff] }
 0x395   :  { %4312 = vmatpush1.bf16.msra.mxu0 %v4311_v29  ;;  %4218 = vmatprep.subr.bf16.mxu1 %v4217_v7  ;;  %v2127_v46 = vld [vmem:[#allocation16 + $0xdc0] sm:$0xff] }
 0x396   :  { %4314 = vmatprep.subr.bf16.mxu0 %v4313_v12 }
 0x398   :  { %4220 = vmatpush1.bf16.msra.mxu1 %v4219_v60  ;;  %v1775_v60 = vld [vmem:[#allocation16 + $0x2c0] sm:$0xff] }
 0x399   :  { %4316 = vmatpush1.bf16.msra.mxu0 %v4315_v47  ;;  %4222 = vmatprep.subr.bf16.mxu1 %v4221_v2 }
 0x39a   :  { %4318 = vmatprep.subr.bf16.mxu0 %v4317_v26  ;;  %v2080_v26 = vld [vmem:[#allocation16 + $0xc48] sm:$0xff] }
 0x39c   :  { %4224 = vmatpush1.bf16.msra.mxu1 %v4223_v16  ;;  %v4331_v16 = vpack.c.bf16 %v1781_v19, %v1775_v60  ;;  %v1824_v60 = vld [vmem:[#allocation16 + $0x448] sm:$0xff]  ;;  %v4247_v19 = vpack.c.bf16 %v2103_v9, %v2097_v8  ;;  %v2146_v8 = vld [vmem:[#allocation16 + $0xe58] sm:$0xff] }
 0x39d   :  { %4320 = vmatpush1.bf16.msra.mxu0 %v4319_v31  ;;  %4226 = vmatprep.subr.bf16.mxu1 %v4225_v32  ;;  %v4237_v31 = vpack.c.bf16 %v2080_v26, %v2074_v23  ;;  %v2073_v32 = vld [vmem:[#allocation16 + $0xc10] sm:$0xff]  ;;  %v4249_v26 = vpack.c.bf16 %v2116_v20, %v2110_v21  ;;  %v2152_v9 = vld [vmem:[#allocation16 + $0xe88] sm:$0xff] }
 0x39e   :  { %v1324_v56 = vpop.f32.mrb[12].mxu1  ;;  %v1478_v59 = vpop.f32.mrb[8].mxu0  ;;  %4322 = vmatprep.subr.bf16.mxu0 %v4321_v3  ;;  %v1793_v3 = vld [vmem:[#allocation16 + $0x350] sm:$0xff]  ;;  %v4239_v49 = vpack.c.bf16 %v2079_v33, %v2073_v32  ;;  %v2122_v32 = vld [vmem:[#allocation16 + $0xd98] sm:$0xff]  ;;  %v2128_v33 = vld [vmem:[#allocation16 + $0xdc8] sm:$0xff]  ;;  %v4261_v20 = vpack.c.bf16 %v2152_v9, %v2146_v8 }
 0x39f   :  { %v5171_v6 = vadd.f32 %v1324_v56, %v5155_v44  ;;  %v5174_v62 = vadd.f32 %v1478_v59, %v5159_v45  ;;  %v1326_v29 = vpop.f32.mrb[13].mxu1  ;;  %v1480_v7 = vpop.f32.mrb[9].mxu0  ;;  %v1805_v56 = vld [vmem:[#allocation16 + $0x3b0] sm:$0xff]  ;;  %v2098_v59 = vld [vmem:[#allocation16 + $0xcd8] sm:$0xff] }
 0x3a0   :  { %v5177_v11 = vadd.f32 %v1326_v29, %v5163_v51  ;;  %v5180_v12 = vadd.f32 %v1480_v7, %v5168_v10  ;;  %4228 = vmatpush1.bf16.msra.mxu1 %v4227_v52  ;;  %v4335_v52 = vpack.c.bf16 %v1793_v3, %v1787_v34  ;;  %v4339_v29 = vpack.c.bf16 %v1805_v56, %v1799_v54  ;;  %v1836_v34 = vld [vmem:[#allocation16 + $0x4a8] sm:$0xff] }
 0x3a1   :  { %4324 = vmatpush1.bf16.msra.mxu0 %v4323_v58  ;;  %4230 = vmatprep.subr.bf16.mxu1 %v4229_v53  ;;  %v4241_v58 = vpack.c.bf16 %v2092_v43, %v2086_v42  ;;  %v2085_v53 = vld [vmem:[#allocation16 + $0xc70] sm:$0xff]  ;;  %v4251_v3 = vpack.c.bf16 %v2115_v27, %v2109_v50  ;;  %v4253_v43 = vpack.c.bf16 %v2128_v33, %v2122_v32  ;;  %v1848_v54 = vld [vmem:[#allocation16 + $0x508] sm:$0xff]  ;;  %v2158_v50 = vld [vmem:[#allocation16 + $0xeb8] sm:$0xff] }
 0x3a2   :  { %v5182_v47 = vpop.f32.mrb[14].mxu1  ;;  %v5184_v2 = vpop.f32.mrb[10].mxu0  ;;  %4326 = vmatprep.subr.bf16.mxu0 %v4325_v61  ;;  %v2104_v61 = vld [vmem:[#allocation16 + $0xd08] sm:$0xff]  ;;  %v4243_v5 = vpack.c.bf16 %v2091_v48, %v2085_v53  ;;  %v2134_v53 = vld [vmem:[#allocation16 + $0xdf8] sm:$0xff]  ;;  %v4255_v56 = vpack.c.bf16 %v2127_v46, %v2121_v0 }
 0x3a3   :  { %v5186_v24 = vpop.f32.mrb[15].mxu1  ;;  %v5188_v25 = vpop.f32.mrb[11].mxu0  ;;  %v4245_v7 = vpack.c.bf16 %v2104_v61, %v2098_v59  ;;  %v2140_v48 = vld [vmem:[#allocation16 + $0xe28] sm:$0xff]  ;;  %v2170_v0 = vld [vmem:[#allocation16 + $0xf18] sm:$0xff] }
 0x3a4   :  { %4232 = vmatpush1.bf16.msra.mxu1 %v4231_v14  ;;  %v1811_v14 = vld [vmem:[#allocation16 + $0x3e0] sm:$0xff]  ;;  %v4257_v61 = vpack.c.bf16 %v2140_v48, %v2134_v53  ;;  %v2164_v27 = vld [vmem:[#allocation16 + $0xee8] sm:$0xff] }
 0x3a5   :  { %4328 = vmatpush1.bf16.msra.mxu0 %v4327_v17  ;;  %4234 = vmatprep.subr.bf16.mxu1 %v4233_v18  ;;  %v4341_v17 = vpack.c.bf16 %v1818_v1, %v1812_v63  ;;  %v1817_v18 = vld [vmem:[#allocation16 + $0x410] sm:$0xff]  ;;  %v2139_v1 = vld [vmem:[#allocation16 + $0xe20] sm:$0xff]  ;;  %v4265_v33 = vpack.c.bf16 %v2164_v27, %v2158_v50  ;;  %v2176_v46 = vld [vmem:[#allocation16 + $0xf48] sm:$0xff] }
 0x3a6   :  { %4330 = vmatprep.subr.bf16.mxu0 %v4329_v57  ;;  %v1830_v57 = vld [vmem:[#allocation16 + $0x478] sm:$0xff]  ;;  %v4343_v23 = vpack.c.bf16 %v1817_v18, %v1811_v14  ;;  %v2133_v63 = vld [vmem:[#allocation16 + $0xdf0] sm:$0xff]  ;;  %v1860_v14 = vld [vmem:[#allocation16 + $0x568] sm:$0xff]  ;;  %v4269_v48 = vpack.c.bf16 %v2176_v46, %v2170_v0 }
 0x3a7   :  { %v4259_v18 = vpack.c.bf16 %v2139_v1, %v2133_v63  ;;  %v2182_v63 = vld [vmem:[#allocation16 + $0xf78] sm:$0xff]  ;;  %v2188_v1 = vld [vmem:[#allocation16 + $0xfa8] sm:$0xff]  ;;  %v2205_v46 = vld [vmem:[#allocation16 + $0x1030] sm:$0xff] }
 0x3a8   :  { %4236 = vmatpush1.bf16.msra.mxu1 %v4235_v28  ;;  %v1823_v28 = vld [vmem:[#allocation16 + $0x440] sm:$0xff]  ;;  %v4273_v9 = vpack.c.bf16 %v2188_v1, %v2182_v63  ;;  %v2217_v63 = vld [vmem:[#allocation16 + $0x1090] sm:$0xff] }
 0x3a9   :  { %4332 = vmatpush1.bf16.msra.mxu0 %v4331_v16  ;;  %4238 = vmatprep.subr.bf16.mxu1 %v4237_v31  ;;  %v4345_v16 = vpack.c.bf16 %v1830_v57, %v1824_v60  ;;  %v1829_v31 = vld [vmem:[#allocation16 + $0x470] sm:$0xff]  ;;  %v2151_v57 = vld [vmem:[#allocation16 + $0xe80] sm:$0xff] }
 0x3aa   :  { %4334 = vmatprep.subr.bf16.mxu0 %v4333_v39  ;;  %v1842_v39 = vld [vmem:[#allocation16 + $0x4d8] sm:$0xff]  ;;  %v4347_v42 = vpack.c.bf16 %v1829_v31, %v1823_v28  ;;  %v2145_v60 = vld [vmem:[#allocation16 + $0xe50] sm:$0xff]  ;;  %v1872_v28 = vld [vmem:[#allocation16 + $0x5c8] sm:$0xff] }
 0x3ab   :  { %2677 = vmatmul.mubr.f32.vlgmr.msra.gmra.mrb[20].mxu1 %v5122_v15  ;;  %v4263_v31 = vpack.c.bf16 %v2151_v57, %v2145_v60  ;;  %v2194_v60 = vld [vmem:[#allocation16 + $0xfd8] sm:$0xff]  ;;  %v2200_v57 = vld [vmem:[#allocation16 + $0x1008] sm:$0xff]  ;;  %v2223_v1 = vld [vmem:[#allocation16 + $0x10c0] sm:$0xff] }
 0x3ac   :  { %4240 = vmatpush1.bf16.msra.mxu1 %v4239_v49  ;;  %2747 = vmatprep.mubr.f32.mxu1 %v5142_v13  ;;  %v1835_v49 = vld [vmem:[#allocation16 + $0x4a0] sm:$0xff]  ;;  %v4277_v27 = vpack.c.bf16 %v2200_v57, %v2194_v60  ;;  %v2229_v60 = vld [vmem:[#allocation16 + $0x10f0] sm:$0xff] }
 0x3ad   :  { %4336 = vmatpush1.bf16.msra.mxu0 %v4335_v52  ;;  %4242 = vmatprep.subr.bf16.mxu1 %v4241_v58  ;;  %v4349_v52 = vpack.c.bf16 %v1842_v39, %v1836_v34  ;;  %v1841_v58 = vld [vmem:[#allocation16 + $0x4d0] sm:$0xff]  ;;  %v2163_v39 = vld [vmem:[#allocation16 + $0xee0] sm:$0xff] }
 0x3ae   :  { %4338 = vmatprep.subr.bf16.mxu0 %v4337_v55  ;;  %v1854_v55 = vld [vmem:[#allocation16 + $0x538] sm:$0xff]  ;;  %v4351_v59 = vpack.c.bf16 %v1841_v58, %v1835_v49  ;;  %v2157_v34 = vld [vmem:[#allocation16 + $0xeb0] sm:$0xff]  ;;  %v1884_v49 = vld [vmem:[#allocation16 + $0x628] sm:$0xff] }
 0x3af   :  { %v4267_v58 = vpack.c.bf16 %v2163_v39, %v2157_v34  ;;  %v2206_v34 = vld [vmem:[#allocation16 + $0x1038] sm:$0xff]  ;;  %v2212_v39 = vld [vmem:[#allocation16 + $0x1068] sm:$0xff]  ;;  %v2235_v57 = vld [vmem:[#allocation16 + $0x1120] sm:$0xff] }
 0x3b0   :  { %4244 = vmatpush1.bf16.msra.mxu1 %v4243_v5  ;;  %v1847_v5 = vld [vmem:[#allocation16 + $0x500] sm:$0xff]  ;;  %v4281_v0 = vpack.c.bf16 %v2212_v39, %v2206_v34  ;;  %v2241_v34 = vld [vmem:[#allocation16 + $0x1150] sm:$0xff] }
 0x3b1   :  { %4340 = vmatpush1.bf16.msra.mxu0 %v4339_v29  ;;  %4246 = vmatprep.subr.bf16.mxu1 %v4245_v7  ;;  %v4353_v29 = vpack.c.bf16 %v1854_v55, %v1848_v54  ;;  %v1853_v7 = vld [vmem:[#allocation16 + $0x530] sm:$0xff]  ;;  %v2175_v55 = vld [vmem:[#allocation16 + $0xf40] sm:$0xff] }
 0x3b2   :  { %4342 = vmatprep.subr.bf16.mxu0 %v4341_v17  ;;  %v1866_v17 = vld [vmem:[#allocation16 + $0x598] sm:$0xff]  ;;  %v4355_v21 = vpack.c.bf16 %v1853_v7, %v1847_v5  ;;  %v2169_v54 = vld [vmem:[#allocation16 + $0xf10] sm:$0xff]  ;;  %v1896_v5 = vld [vmem:[#allocation16 + $0x688] sm:$0xff] }
 0x3b3   :  { %v4271_v7 = vpack.c.bf16 %v2175_v55, %v2169_v54  ;;  %v2224_v54 = vld [vmem:[#allocation16 + $0x10c8] sm:$0xff]  ;;  %v2247_v39 = vld [vmem:[#allocation16 + $0x1180] sm:$0xff] }
 0x3b4   :  { %4248 = vmatpush1.bf16.msra.mxu1 %v4247_v19  ;;  %v1859_v19 = vld [vmem:[#allocation16 + $0x560] sm:$0xff]  ;;  %v1932_v55 = vld [vmem:[#allocation16 + $0x7a8] sm:$0xff] }
 0x3b5   :  { %4344 = vmatpush1.bf16.msra.mxu0 %v4343_v23  ;;  %4250 = vmatprep.subr.bf16.mxu1 %v4249_v26  ;;  %v4357_v23 = vpack.c.bf16 %v1866_v17, %v1860_v14  ;;  %v1865_v26 = vld [vmem:[#allocation16 + $0x590] sm:$0xff]  ;;  %v2187_v17 = vld [vmem:[#allocation16 + $0xfa0] sm:$0xff] }
 0x3b6   :  { %4346 = vmatprep.subr.bf16.mxu0 %v4345_v16  ;;  %v1878_v16 = vld [vmem:[#allocation16 + $0x5f8] sm:$0xff]  ;;  %v4359_v32 = vpack.c.bf16 %v1865_v26, %v1859_v19  ;;  %v2181_v14 = vld [vmem:[#allocation16 + $0xf70] sm:$0xff]  ;;  %v1908_v19 = vld [vmem:[#allocation16 + $0x6e8] sm:$0xff] }
 0x3b7   :  { %v4275_v26 = vpack.c.bf16 %v2187_v17, %v2181_v14  ;;  %v1944_v14 = vld [vmem:[#allocation16 + $0x808] sm:$0xff]  ;;  %v1950_v17 = vld [vmem:[#allocation16 + $0x838] sm:$0xff] }
 0x3b8   :  { %4252 = vmatpush1.bf16.msra.mxu1 %v4251_v3  ;;  %v1871_v3 = vld [vmem:[#allocation16 + $0x5c0] sm:$0xff] }
 0x3b9   :  { %4348 = vmatpush1.bf16.msra.mxu0 %v4347_v42  ;;  %4254 = vmatprep.subr.bf16.mxu1 %v4253_v43  ;;  %v4361_v42 = vpack.c.bf16 %v1878_v16, %v1872_v28  ;;  %v1877_v43 = vld [vmem:[#allocation16 + $0x5f0] sm:$0xff]  ;;  %v2199_v16 = vld [vmem:[#allocation16 + $0x1000] sm:$0xff] }
 0x3ba   :  { %4350 = vmatprep.subr.bf16.mxu0 %v4349_v52  ;;  %v1890_v52 = vld [vmem:[#allocation16 + $0x658] sm:$0xff]  ;;  %v4363_v53 = vpack.c.bf16 %v1877_v43, %v1871_v3  ;;  %v2193_v28 = vld [vmem:[#allocation16 + $0xfd0] sm:$0xff]  ;;  %v1920_v3 = vld [vmem:[#allocation16 + $0x748] sm:$0xff] }
 0x3bb   :  { %v4279_v43 = vpack.c.bf16 %v2199_v16, %v2193_v28  ;;  %v1956_v28 = vld [vmem:[#allocation16 + $0x868] sm:$0xff]  ;;  %v1962_v16 = vld [vmem:[#allocation16 + $0x898] sm:$0xff] }
 0x3bc   :  { %4256 = vmatpush1.bf16.msra.mxu1 %v4255_v56  ;;  %v1883_v56 = vld [vmem:[#allocation16 + $0x620] sm:$0xff] }
 0x3bd   :  { %4352 = vmatpush1.bf16.msra.mxu0 %v4351_v59  ;;  %4258 = vmatprep.subr.bf16.mxu1 %v4257_v61  ;;  %v4365_v59 = vpack.c.bf16 %v1890_v52, %v1884_v49  ;;  %v1889_v61 = vld [vmem:[#allocation16 + $0x650] sm:$0xff]  ;;  %v2211_v49 = vld [vmem:[#allocation16 + $0x1060] sm:$0xff] }
 0x3be   :  { %4354 = vmatprep.subr.bf16.mxu0 %v4353_v29  ;;  %v1902_v29 = vld [vmem:[#allocation16 + $0x6b8] sm:$0xff]  ;;  %v4367_v8 = vpack.c.bf16 %v1889_v61, %v1883_v56  ;;  %v1919_v52 = vld [vmem:[#allocation16 + $0x740] sm:$0xff] }
 0x3bf   :  { %v1938_v56 = vld [vmem:[#allocation16 + $0x7d8] sm:$0xff] }
 0x3c0   :  { %4260 = vmatpush1.bf16.msra.mxu1 %v4259_v18  ;;  %v1895_v18 = vld [vmem:[#allocation16 + $0x680] sm:$0xff] }
 0x3c1   :  { %4356 = vmatpush1.bf16.msra.mxu0 %v4355_v21  ;;  %4262 = vmatprep.subr.bf16.mxu1 %v4261_v20  ;;  %v4369_v21 = vpack.c.bf16 %v1902_v29, %v1896_v5  ;;  %v1901_v20 = vld [vmem:[#allocation16 + $0x6b0] sm:$0xff]  ;;  %v1931_v5 = vld [vmem:[#allocation16 + $0x7a0] sm:$0xff]  ;;  %v4381_v29 = vpack.c.bf16 %v1938_v56, %v1932_v55 }
 0x3c2   :  { %4358 = vmatprep.subr.bf16.mxu0 %v4357_v23  ;;  %v1914_v23 = vld [vmem:[#allocation16 + $0x718] sm:$0xff]  ;;  %v4371_v50 = vpack.c.bf16 %v1901_v20, %v1895_v18  ;;  %v4287_v18 = vpack.c.bf16 %v2223_v1, %v2217_v63  ;;  %v1967_v56 = vld [vmem:[#allocation16 + $0x8c0] sm:$0xff] }
 0x3c4   :  { %4264 = vmatpush1.bf16.msra.mxu1 %v4263_v31  ;;  %v1907_v31 = vld [vmem:[#allocation16 + $0x6e0] sm:$0xff] }
 0x3c5   :  { %4360 = vmatpush1.bf16.msra.mxu0 %v4359_v32  ;;  %4266 = vmatprep.subr.bf16.mxu1 %v4265_v33  ;;  %v4373_v32 = vpack.c.bf16 %v1914_v23, %v1908_v19  ;;  %v1913_v33 = vld [vmem:[#allocation16 + $0x710] sm:$0xff]  ;;  %v1943_v19 = vld [vmem:[#allocation16 + $0x800] sm:$0xff]  ;;  %v4385_v23 = vpack.c.bf16 %v1950_v17, %v1944_v14 }
 0x3c6   :  { %4362 = vmatprep.subr.bf16.mxu0 %v4361_v42  ;;  %v1926_v42 = vld [vmem:[#allocation16 + $0x778] sm:$0xff] }
 0x3c8   :  { %4268 = vmatpush1.bf16.msra.mxu1 %v4267_v58  ;;  %v4377_v58 = vpack.c.bf16 %v1926_v42, %v1920_v3  ;;  %v1955_v3 = vld [vmem:[#allocation16 + $0x860] sm:$0xff]  ;;  %v4389_v42 = vpack.c.bf16 %v1962_v16, %v1956_v28  ;;  %v2022_v28 = vld [vmem:[#allocation16 + $0xa78] sm:$0xff] }
 0x3c9   :  { %4364 = vmatpush1.bf16.msra.mxu0 %v4363_v53  ;;  %4270 = vmatprep.subr.bf16.mxu1 %v4269_v48  ;;  %v1925_v53 = vld [vmem:[#allocation16 + $0x770] sm:$0xff]  ;;  %v2218_v48 = vld [vmem:[#allocation16 + $0x1098] sm:$0xff] }
 0x3ca   :  { %4366 = vmatprep.subr.bf16.mxu0 %v4365_v59  ;;  %v4379_v59 = vpack.c.bf16 %v1925_v53, %v1919_v52  ;;  %v4285_v61 = vpack.c.bf16 %v2224_v54, %v2218_v48  ;;  %v4295_v52 = vpack.c.bf16 %v2247_v39, %v2241_v34  ;;  %v2253_v48 = vld [vmem:[#allocation16 + $0x11b0] sm:$0xff]  ;;  %v2259_v54 = vld [vmem:[#allocation16 + $0x11e0] sm:$0xff]  ;;  %v2028_v34 = vld [vmem:[#allocation16 + $0xaa8] sm:$0xff] }
 0x3cb   :  { %v4299_v63 = vpack.c.bf16 %v2259_v54, %v2253_v48  ;;  %v2034_v39 = vld [vmem:[#allocation16 + $0xad8] sm:$0xff]  ;;  %v2039_v48 = vld [vmem:[#allocation16 + $0xb00] sm:$0xff]  ;;  %v2045_v54 = vld [vmem:[#allocation16 + $0xb30] sm:$0xff] }
 0x3cc   :  { %4272 = vmatpush1.bf16.msra.mxu1 %v4271_v7  ;;  %2819 = vmatmul.mubr.f32.vlgmr.msra.gmra.mrb[14].mxu0 %v5103_v35  ;;  %v4375_v35 = vpack.c.bf16 %v1913_v33, %v1907_v31  ;;  %v1937_v7 = vld [vmem:[#allocation16 + $0x7d0] sm:$0xff]  ;;  %v4291_v31 = vpack.c.bf16 %v2235_v57, %v2229_v60  ;;  %v2004_v60 = vld [vmem:[#allocation16 + $0x9e8] sm:$0xff]  ;;  %v2010_v57 = vld [vmem:[#allocation16 + $0xa18] sm:$0xff] }
 0x3cd   :  { %4368 = vmatpush1.bf16.msra.mxu0 %v4367_v8  ;;  %4274 = vmatprep.subr.bf16.mxu1 %v4273_v9  ;;  %v2230_v8 = vld [vmem:[#allocation16 + $0x10f8] sm:$0xff]  ;;  %v2236_v9 = vld [vmem:[#allocation16 + $0x1128] sm:$0xff] }
 0x3ce   :  { %4370 = vmatprep.subr.bf16.mxu0 %v4369_v21  ;;  %2889 = vmatprep.mubr.f32.mxu0 %v5126_v22  ;;  %v4283_v22 = vpack.c.bf16 %v2211_v49, %v2205_v46  ;;  %v4383_v21 = vpack.c.bf16 %v1937_v7, %v1931_v5  ;;  %v4289_v20 = vpack.c.bf16 %v2236_v9, %v2230_v8  ;;  %v1968_v46 = vld [vmem:[#allocation16 + $0x8c8] sm:$0xff]  ;;  %v1974_v49 = vld [vmem:[#allocation16 + $0x8f8] sm:$0xff]  ;;  %v1985_v7 = vld [vmem:[#allocation16 + $0x950] sm:$0xff] }
 0x3cf   :  { %v4393_v55 = vpack.c.bf16 %v1974_v49, %v1968_v46  ;;  %v1992_v8 = vld [vmem:[#allocation16 + $0x988] sm:$0xff]  ;;  %v1998_v9 = vld [vmem:[#allocation16 + $0x9b8] sm:$0xff]  ;;  %v2033_v46 = vld [vmem:[#allocation16 + $0xad0] sm:$0xff]  ;;  %v1169_v49 = vsub.s32 4, %v5018_v37 }
 0x3d0   :  { %4276 = vmatpush1.bf16.msra.mxu1 %v4275_v26  ;;  %v1949_v26 = vld [vmem:[#allocation16 + $0x830] sm:$0xff]  ;;  %v4401_v17 = vpack.c.bf16 %v1998_v9, %v1992_v8 }
 0x3d1   :  { %4372 = vmatpush1.bf16.msra.mxu0 %v4371_v50  ;;  %4278 = vmatprep.subr.bf16.mxu1 %v4277_v27  ;;  %v2242_v50 = vld [vmem:[#allocation16 + $0x1158] sm:$0xff]  ;;  %v2248_v27 = vld [vmem:[#allocation16 + $0x1188] sm:$0xff]  ;;  %v2057_v8 = vld [vmem:[#allocation16 + $0xb90] sm:$0xff] }
 0x3d2   :  { %4374 = vmatprep.subr.bf16.mxu0 %v4373_v32  ;;  %v4387_v32 = vpack.c.bf16 %v1949_v26, %v1943_v19  ;;  %v4293_v33 = vpack.c.bf16 %v2248_v27, %v2242_v50  ;;  %v2003_v26 = vld [vmem:[#allocation16 + $0x9e0] sm:$0xff]  ;;  %v2009_v50 = vld [vmem:[#allocation16 + $0xa10] sm:$0xff]  ;;  %v2016_v27 = vld [vmem:[#allocation16 + $0xa48] sm:$0xff] }
 0x3d3   :  { %v4407_v16 = vpack.c.bf16 %v2009_v50, %v2003_v26  ;;  %v2069_v26 = vld [vmem:[#allocation16 + $0xbf0] sm:$0xff] }
 0x3d4   :  { %4280 = vmatpush1.bf16.msra.mxu1 %v4279_v43  ;;  %v1961_v43 = vld [vmem:[#allocation16 + $0x890] sm:$0xff] }
 0x3d5   :  { %4376 = vmatpush1.bf16.msra.mxu0 %v4375_v35  ;;  %4282 = vmatprep.subr.bf16.mxu1 %v4281_v0  ;;  %v2254_v35 = vld [vmem:[#allocation16 + $0x11b8] sm:$0xff]  ;;  %v2260_v0 = vld [vmem:[#allocation16 + $0x11e8] sm:$0xff] }
 0x3d6   :  { %4378 = vmatprep.subr.bf16.mxu0 %v4377_v58  ;;  %v4391_v58 = vpack.c.bf16 %v1961_v43, %v1955_v3  ;;  %v4297_v53 = vpack.c.bf16 %v2260_v0, %v2254_v35  ;;  %v5199_v3 = vadd.f32 %v5182_v47, %v5155_v44  ;;  %v4413_v35 = vpack.c.bf16 %v2034_v39, %v2028_v34  ;;  %v2027_v0 = vld [vmem:[#allocation16 + $0xaa0] sm:$0xff] }
 0x3d8   :  { %4284 = vmatpush1.bf16.msra.mxu1 %v4283_v22  ;;  %v1973_v22 = vld [vmem:[#allocation16 + $0x8f0] sm:$0xff]  ;;  %v1649_v44 = vmul.f32 %v5199_v3, %v5199_v3 }
 0x3d9   :  { %4380 = vmatpush1.bf16.msra.mxu0 %v4379_v59  ;;  %4286 = vmatprep.subr.bf16.mxu1 %v4285_v61  ;;  %v1980_v59 = vld [vmem:[#allocation16 + $0x928] sm:$0xff]  ;;  %v1986_v61 = vld [vmem:[#allocation16 + $0x958] sm:$0xff]  ;;  %v4395_v1 = vpack.c.bf16 %v1973_v22, %v1967_v56  ;;  %v1170_v56 = vrot.slane %v5150_v4, %v1169_v49 }
 0x3da   :  { %4382 = vmatprep.subr.bf16.mxu0 %v4381_v29  ;;  %v4397_v5 = vpack.c.bf16 %v1986_v61, %v1980_v59  ;;  %v1979_v29 = vld [vmem:[#allocation16 + $0x920] sm:$0xff]  ;;  %v2052_v22 = vld [vmem:[#allocation16 + $0xb68] sm:$0xff]  ;;  %v2058_v59 = vld [vmem:[#allocation16 + $0xb98] sm:$0xff] }
 0x3db   :  { %v4399_v14 = vpack.c.bf16 %v1985_v7, %v1979_v29  ;;  %v4421_v29 = vpack.c.bf16 %v2058_v59, %v2052_v22  ;;  %v2051_v7 = vld [vmem:[#allocation16 + $0xb60] sm:$0xff] }
 0x3dc   :  { %4288 = vmatpush1.bf16.msra.mxu1 %v4287_v18  ;;  %v1991_v18 = vld [vmem:[#allocation16 + $0x980] sm:$0xff] }
 0x3dd   :  { %4384 = vmatpush1.bf16.msra.mxu0 %v4383_v21  ;;  %4290 = vmatprep.subr.bf16.mxu1 %v4289_v20  ;;  %v1997_v21 = vld [vmem:[#allocation16 + $0x9b0] sm:$0xff]  ;;  %v2099_v59 = vld [vmem:[#allocation16 + $0xce0] sm:$0xff] }
 0x3de   :  { %4386 = vmatprep.subr.bf16.mxu0 %v4385_v23  ;;  %v5194_v20 = vld.sshfl [vmem:[#allocation5 + $0x8] sm:$0x33 pattern:$0x76325410]  ;;  %v4403_v19 = vpack.c.bf16 %v1997_v21, %v1991_v18  ;;  %v4405_v23 = vpack.c.bf16 %v2010_v57, %v2004_v60  ;;  %v4423_v21 = vpack.c.bf16 %v2057_v8, %v2051_v7  ;;  %v2111_v7 = vld [vmem:[#allocation16 + $0xd40] sm:$0xff] }
 0x3df   :  { %v2117_v8 = vld [vmem:[#allocation16 + $0xd70] sm:$0xff] }
 0x3e0   :  { %4292 = vmatpush1.bf16.msra.mxu1 %v4291_v31  ;;  %v4409_v31 = vpack.c.bf16 %v2022_v28, %v2016_v27  ;;  %v2076_v27 = vld [vmem:[#allocation16 + $0xc28] sm:$0xff]  ;;  %v2082_v28 = vld [vmem:[#allocation16 + $0xc58] sm:$0xff] }
 0x3e1   :  { %4388 = vmatpush1.bf16.msra.mxu0 %v4387_v32  ;;  %4294 = vmatprep.subr.bf16.mxu1 %v4293_v33  ;;  %v2015_v32 = vld [vmem:[#allocation16 + $0xa40] sm:$0xff]  ;;  %v2021_v33 = vld [vmem:[#allocation16 + $0xa70] sm:$0xff]  ;;  %v4429_v34 = vpack.c.bf16 %v2082_v28, %v2076_v27 }
 0x3e2   :  { %4390 = vmatprep.subr.bf16.mxu0 %v4389_v42  ;;  %v5203_v42 = vadd.f32 %v5186_v24, %v5163_v51  ;;  %v4411_v43 = vpack.c.bf16 %v2021_v33, %v2015_v32  ;;  %v4415_v51 = vpack.c.bf16 %v2033_v46, %v2027_v0  ;;  %v2088_v46 = vld [vmem:[#allocation16 + $0xc88] sm:$0xff] }
 0x3e4   :  { %4296 = vmatpush1.bf16.msra.mxu1 %v4295_v52  ;;  %v2040_v52 = vld [vmem:[#allocation16 + $0xb08] sm:$0xff]  ;;  %v1650_v47 = vmul.f32 %v5203_v42, %v5203_v42 }
 0x3e5   :  { %4392 = vmatpush1.bf16.msra.mxu0 %v4391_v58  ;;  %4298 = vmatprep.subr.bf16.mxu1 %v4297_v53  ;;  %v2046_v58 = vld [vmem:[#allocation16 + $0xb38] sm:$0xff]  ;;  %v1173_v53 = vsub.s32 5, %v5018_v37 }
 0x3e6   :  { %4394 = vmatprep.subr.bf16.mxu0 %v4393_v55  ;;  %v4417_v24 = vpack.c.bf16 %v2046_v58, %v2040_v52  ;;  %v5213_v55 = vadd.f32 %v5184_v2, %v5159_v45  ;;  %v5225_v2 = vadd.f32 %v5188_v25, %v5168_v10  ;;  %v2094_v52 = vld [vmem:[#allocation16 + $0xcb8] sm:$0xff] }
 0x3e7   :  { %v1174_v61 = vrot.slane %v5150_v4, %v1173_v53  ;;  %v2070_v4 = vld [vmem:[#allocation16 + $0xbf8] sm:$0xff] }
 0x3e8   :  { %4300 = vmatpush1.bf16.msra.mxu1 %v4299_v63  ;;  %v1662_v63 = vadd.f32 %v1650_v47, %v1649_v44  ;;  %v1651_v45 = vmul.f32 %v5213_v55, %v5213_v55  ;;  %v1652_v50 = vmul.f32 %v5225_v2, %v5225_v2  ;;  %v4433_v47 = vpack.c.bf16 %v2094_v52, %v2088_v46  ;;  %v2172_v46 = vld [vmem:[#allocation16 + $0xf28] sm:$0xff]  ;;  %v2178_v52 = vld [vmem:[#allocation16 + $0xf58] sm:$0xff] }
 0x3e9   :  { %4396 = vmatpush1.bf16.msra.mxu0 %v4395_v1  ;;  %v4419_v1 = vpack.c.bf16 %v2045_v54, %v2039_v48  ;;  %v2100_v48 = vld [vmem:[#allocation16 + $0xce8] sm:$0xff]  ;;  %v2106_v54 = vld [vmem:[#allocation16 + $0xd18] sm:$0xff] }
 0x3ea   :  { %4398 = vmatprep.subr.bf16.mxu0 %v4397_v5  ;;  %v1663_v60 = vadd.f32 %v1662_v63, %v1651_v45  ;;  %v4437_v22 = vpack.c.bf16 %v2106_v54, %v2100_v48  ;;  %v2112_v63 = vld [vmem:[#allocation16 + $0xd48] sm:$0xff]  ;;  %v2190_v48 = vld [vmem:[#allocation16 + $0xfb8] sm:$0xff] }
 0x3eb   :  { %2748 = vmatmul.mubr.f32.vlgmr.msra.gmra.mrb[20].mxu1 %v5194_v20  ;;  %v2124_v45 = vld [vmem:[#allocation16 + $0xda8] sm:$0xff] }
 0x3ec   :  { %v1664_v33 = vadd.f32 %v1663_v60, %v1652_v50  ;;  %v2142_v60 = vld [vmem:[#allocation16 + $0xe38] sm:$0xff]  ;;  %v2148_v50 = vld [vmem:[#allocation16 + $0xe68] sm:$0xff] }
 0x3ed   :  { %4400 = vmatpush1.bf16.msra.mxu0 %v4399_v14 }
 0x3ee   :  { %4402 = vmatprep.subr.bf16.mxu0 %v4401_v17  ;;  %v2064_v17 = vld [vmem:[#allocation16 + $0xbc8] sm:$0xff] }
 0x3f1   :  { %4404 = vmatpush1.bf16.msra.mxu0 %v4403_v19  ;;  %v4425_v19 = vpack.c.bf16 %v2070_v4, %v2064_v17  ;;  %v2123_v4 = vld [vmem:[#allocation16 + $0xda0] sm:$0xff] }
 0x3f2   :  { %4406 = vmatprep.subr.bf16.mxu0 %v4405_v23  ;;  %v2063_v23 = vld [vmem:[#allocation16 + $0xbc0] sm:$0xff] }
 0x3f3   :  { %v4427_v32 = vpack.c.bf16 %v2069_v26, %v2063_v23  ;;  %v2135_v23 = vld [vmem:[#allocation16 + $0xe00] sm:$0xff]  ;;  %v2141_v26 = vld [vmem:[#allocation16 + $0xe30] sm:$0xff] }
 0x3f4   :  { %v4451_v27 = vpack.c.bf16 %v2141_v26, %v2135_v23  ;;  %v2225_v23 = vld [vmem:[#allocation16 + $0x10d0] sm:$0xff]  ;;  %v2232_v26 = vld [vmem:[#allocation16 + $0x1108] sm:$0xff] }
 0x3f5   :  { %4408 = vmatpush1.bf16.msra.mxu0 %v4407_v16 }
 0x3f6   :  { %4410 = vmatprep.subr.bf16.mxu0 %v4409_v31 }
 0x3f9   :  { %4412 = vmatpush1.bf16.msra.mxu0 %v4411_v43  ;;  %v2075_v43 = vld [vmem:[#allocation16 + $0xc20] sm:$0xff] }
 0x3fa   :  { %4414 = vmatprep.subr.bf16.mxu0 %v4413_v35  ;;  %v2081_v35 = vld [vmem:[#allocation16 + $0xc50] sm:$0xff] }
 0x3fb   :  { %v4431_v44 = vpack.c.bf16 %v2081_v35, %v2075_v43  ;;  %v2159_v35 = vld [vmem:[#allocation16 + $0xec0] sm:$0xff] }
 0x3fd   :  { %4416 = vmatpush1.bf16.msra.mxu0 %v4415_v51  ;;  %v2087_v51 = vld [vmem:[#allocation16 + $0xc80] sm:$0xff] }
 0x3fe   :  { %v1632_v5 = vpop.f32.mrb[16].mxu1  ;;  %4418 = vmatprep.subr.bf16.mxu0 %v4417_v24  ;;  %v2093_v24 = vld [vmem:[#allocation16 + $0xcb0] sm:$0xff] }
 0x3ff   :  { %v5227_v9 = vadd.f32 %v1632_v5, %v1170_v56  ;;  %v1634_v14 = vpop.f32.mrb[17].mxu1 }
 0x400   :  { %v5229_v18 = vadd.f32 %v1634_v14, %v1174_v61  ;;  %v2130_v14 = vld [vmem:[#allocation16 + $0xdd8] sm:$0xff] }
 0x401   :  { %4420 = vmatpush1.bf16.msra.mxu0 %v4419_v1  ;;  %v2118_v1 = vld [vmem:[#allocation16 + $0xd78] sm:$0xff]  ;;  %v4445_v17 = vpack.c.bf16 %v2130_v14, %v2124_v45 }
 0x402   :  { %v1638_v57 = vpop.f32.mrb[18].mxu1  ;;  %4422 = vmatprep.subr.bf16.mxu0 %v4421_v29  ;;  %v4441_v29 = vpack.c.bf16 %v2118_v1, %v2112_v63  ;;  %v2202_v63 = vld [vmem:[#allocation16 + $0x1018] sm:$0xff] }
 0x403   :  { %v5233_v10 = vadd.f32 %v1638_v57, %v1170_v56  ;;  %v1640_v25 = vpop.f32.mrb[19].mxu1  ;;  %v4435_v56 = vpack.c.bf16 %v2093_v24, %v2087_v51  ;;  %v2177_v51 = vld [vmem:[#allocation16 + $0xf50] sm:$0xff]  ;;  %v2184_v24 = vld [vmem:[#allocation16 + $0xf88] sm:$0xff]  ;;  %v2214_v45 = vld [vmem:[#allocation16 + $0x1078] sm:$0xff] }
 0x404   :  { %v5235_v16 = vadd.f32 %v1640_v25, %v1174_v61  ;;  %v2105_v61 = vld [vmem:[#allocation16 + $0xd10] sm:$0xff]  ;;  %v2154_v25 = vld [vmem:[#allocation16 + $0xe98] sm:$0xff] }
 0x405   :  { %v1653_v31 = vmul.f32 %v5233_v10, %v5233_v10  ;;  %4424 = vmatpush1.bf16.msra.mxu0 %v4423_v21  ;;  %v4439_v5 = vpack.c.bf16 %v2105_v61, %v2099_v59  ;;  %v2136_v21 = vld [vmem:[#allocation16 + $0xe08] sm:$0xff]  ;;  %v4453_v28 = vpack.c.bf16 %v2154_v25, %v2148_v50  ;;  %v2189_v59 = vld [vmem:[#allocation16 + $0xfb0] sm:$0xff]  ;;  %v2238_v50 = vld [vmem:[#allocation16 + $0x1138] sm:$0xff] }
 0x406   :  { %4426 = vmatprep.subr.bf16.mxu0 %v4425_v19  ;;  %v1654_v39 = vmul.f32 %v5235_v16, %v5235_v16  ;;  %v4449_v19 = vpack.c.bf16 %v2142_v60, %v2136_v21  ;;  %v2196_v61 = vld [vmem:[#allocation16 + $0xfe8] sm:$0xff]  ;;  %v2226_v21 = vld [vmem:[#allocation16 + $0x10d8] sm:$0xff] }
 0x407   :  { %v1665_v0 = vadd.f32 %v1664_v33, %v1653_v31  ;;  %v2147_v31 = vld [vmem:[#allocation16 + $0xe60] sm:$0xff]  ;;  %v2160_v33 = vld [vmem:[#allocation16 + $0xec8] sm:$0xff] }
 0x409   :  { %4428 = vmatpush1.bf16.msra.mxu0 %v4427_v32  ;;  %v1666_v58 = vadd.f32 %v1665_v0, %v1654_v39  ;;  %v2153_v32 = vld [vmem:[#allocation16 + $0xe90] sm:$0xff] }
 0x40a   :  { %4430 = vmatprep.subr.bf16.mxu0 %v4429_v34  ;;  %v2166_v34 = vld [vmem:[#allocation16 + $0xef8] sm:$0xff]  ;;  %v4455_v39 = vpack.c.bf16 %v2153_v32, %v2147_v31  ;;  %v2165_v0 = vld [vmem:[#allocation16 + $0xef0] sm:$0xff]  ;;  %v2244_v32 = vld [vmem:[#allocation16 + $0x1168] sm:$0xff] }
 0x40b   :  { %1667 = vadd.xlane.f32.xlu1 %v1666_v58  ;;  %v4457_v43 = vpack.c.bf16 %v2166_v34, %v2160_v33  ;;  %v4459_v58 = vpack.c.bf16 %v2165_v0, %v2159_v35  ;;  %v2237_v31 = vld [vmem:[#allocation16 + $0x1130] sm:$0xff]  ;;  %v2250_v33 = vld [vmem:[#allocation16 + $0x1198] sm:$0xff]  ;;  %v2256_v0 = vld [vmem:[#allocation16 + $0x11c8] sm:$0xff] }
 0x40c   :  { %2890 = vmatmul.mubr.f32.vlgmr.msra.gmra.mrb[14].mxu0 %v5122_v15  ;;  %v4443_v15 = vpack.c.bf16 %v2117_v8, %v2111_v7  ;;  %v2201_v7 = vld [vmem:[#allocation16 + $0x1010] sm:$0xff]  ;;  %v2208_v8 = vld [vmem:[#allocation16 + $0x1048] sm:$0xff] }
 0x40d   :  { %4432 = vmatpush1.bf16.msra.mxu0 %v4431_v44  ;;  %2960 = vmatprep.mubr.f32.mxu0 %v5142_v13  ;;  %v2129_v13 = vld [vmem:[#allocation16 + $0xdd0] sm:$0xff]  ;;  %v4461_v44 = vpack.c.bf16 %v2178_v52, %v2172_v46  ;;  %v2262_v46 = vld [vmem:[#allocation16 + $0x11f8] sm:$0xff] }
 0x40e   :  { %4434 = vmatprep.subr.bf16.mxu0 %v4433_v47  ;;  %v4447_v57 = vpack.c.bf16 %v2129_v13, %v2123_v4  ;;  %v2171_v47 = vld [vmem:[#allocation16 + $0xf20] sm:$0xff]  ;;  %v2213_v4 = vld [vmem:[#allocation16 + $0x1070] sm:$0xff]  ;;  %v2220_v13 = vld [vmem:[#allocation16 + $0x10a8] sm:$0xff] }
 0x40f   :  { %v4463_v54 = vpack.c.bf16 %v2177_v51, %v2171_v47  ;;  %v2249_v35 = vld [vmem:[#allocation16 + $0x1190] sm:$0xff] }
 0x410   :  { %v2261_v47 = vld [vmem:[#allocation16 + $0x11f0] sm:$0xff] }
 0x411   :  { %4436 = vmatpush1.bf16.msra.mxu0 %v4435_v56  ;;  %v4465_v56 = vpack.c.bf16 %v2190_v48, %v2184_v24 }
 0x412   :  { %4438 = vmatprep.subr.bf16.mxu0 %v4437_v22  ;;  %v2183_v22 = vld [vmem:[#allocation16 + $0xf80] sm:$0xff] }
 0x413   :  { %v4467_v1 = vpack.c.bf16 %v2189_v59, %v2183_v22 }
 0x415   :  { %4440 = vmatpush1.bf16.msra.mxu0 %v4439_v5  ;;  %v4469_v5 = vpack.c.bf16 %v2202_v63, %v2196_v61 }
 0x416   :  { %4442 = vmatprep.subr.bf16.mxu0 %v4441_v29  ;;  %v2195_v29 = vld [vmem:[#allocation16 + $0xfe0] sm:$0xff] }
 0x417   :  { %v4471_v14 = vpack.c.bf16 %v2201_v7, %v2195_v29 }
 0x419   :  { %4444 = vmatpush1.bf16.msra.mxu0 %v4443_v15  ;;  %v4473_v15 = vpack.c.bf16 %v2214_v45, %v2208_v8 }
 0x41a   :  { %4446 = vmatprep.subr.bf16.mxu0 %v4445_v17  ;;  %v2207_v17 = vld [vmem:[#allocation16 + $0x1040] sm:$0xff] }
 0x41b   :  { %v4475_v60 = vpack.c.bf16 %v2213_v4, %v2207_v17 }
 0x41d   :  { %4448 = vmatpush1.bf16.msra.mxu0 %v4447_v57  ;;  %v4477_v57 = vpack.c.bf16 %v2226_v21, %v2220_v13  ;;  %v1643_v13 = vmul.f32 %v5171_v6, %v5171_v6 }
 0x41e   :  { %4450 = vmatprep.subr.bf16.mxu0 %v4449_v19  ;;  %v2219_v19 = vld [vmem:[#allocation16 + $0x10a0] sm:$0xff] }
 0x41f   :  { %v4479_v25 = vpack.c.bf16 %v2225_v23, %v2219_v19 }
 0x421   :  { %4452 = vmatpush1.bf16.msra.mxu0 %v4451_v27  ;;  %v4481_v27 = vpack.c.bf16 %v2238_v50, %v2232_v26  ;;  %v1645_v26 = vmul.f32 %v5174_v62, %v5174_v62 }
 0x422   :  { %4454 = vmatprep.subr.bf16.mxu0 %v4453_v28  ;;  %v2231_v28 = vld [vmem:[#allocation16 + $0x1100] sm:$0xff] }
 0x423   :  { %v4483_v34 = vpack.c.bf16 %v2237_v31, %v2231_v28 }
 0x425   :  { %4456 = vmatpush1.bf16.msra.mxu0 %v4455_v39  ;;  %v4485_v39 = vpack.c.bf16 %v2250_v33, %v2244_v32 }
 0x426   :  { %4458 = vmatprep.subr.bf16.mxu0 %v4457_v43  ;;  %v2243_v43 = vld [vmem:[#allocation16 + $0x1160] sm:$0xff] }
 0x427   :  { %v4487_v52 = vpack.c.bf16 %v2249_v35, %v2243_v43 }
 0x429   :  { %4460 = vmatpush1.bf16.msra.mxu0 %v4459_v58  ;;  %v4489_v58 = vpack.c.bf16 %v2262_v46, %v2256_v0 }
 0x42a   :  { %4462 = vmatprep.subr.bf16.mxu0 %v4461_v44  ;;  %v2255_v44 = vld [vmem:[#allocation16 + $0x11c0] sm:$0xff] }
 0x42b   :  { %v4491_v51 = vpack.c.bf16 %v2261_v47, %v2255_v44 }
 0x42d   :  { %4464 = vmatpush1.bf16.msra.mxu0 %v4463_v54 }
 0x42e   :  { %4466 = vmatprep.subr.bf16.mxu0 %v4465_v56 }
 0x431   :  { %4468 = vmatpush1.bf16.msra.mxu0 %v4467_v1  ;;  %v2263_v1 = vld [vmem:[#allocation17] sm:$0x3f] }
 0x432   :  { %4470 = vmatprep.subr.bf16.mxu0 %v4469_v5  ;;  %v2268_v5 = vrot.slane %v2263_v1, %v5021_v38  ;;  %v2272_v29 = vrot.slane %v2263_v1, %v5024_v40  ;;  %v1644_v38 = vmul.f32 %v5177_v11, %v5177_v11  ;;  %v2288_v23 = vrot.slane %v2263_v1, %v1173_v53 }
 0x435   :  { %4472 = vmatpush1.bf16.msra.mxu0 %v4471_v14  ;;  %v2280_v14 = vrot.slane %v2263_v1, %v1165_v30  ;;  %v2284_v30 = vrot.slane %v2263_v1, %v1169_v49  ;;  %v1646_v49 = vmul.f32 %v5180_v12, %v5180_v12 }
 0x436   :  { %4474 = vmatprep.subr.bf16.mxu0 %v4473_v15 }
 0x439   :  { %4476 = vmatpush1.bf16.msra.mxu0 %v4475_v60 }
 0x43a   :  { %4478 = vmatprep.subr.bf16.mxu0 %v4477_v57  ;;  %v1655_v57 = vadd.f32 %v1644_v38, %v1643_v13 }
 0x43c   :  { %v1656_v32 = vadd.f32 %v1655_v57, %v1645_v26  ;;  %v3244_v26 = vstv %s5304_s0 }
 0x43d   :  { %4480 = vmatpush1.bf16.msra.mxu0 %v4479_v25 }
 0x43e   :  { %4482 = vmatprep.subr.bf16.mxu0 %v4481_v27  ;;  %v1657_v0 = vadd.f32 %v1656_v32, %v1646_v49 }
 0x441   :  { %4484 = vmatpush1.bf16.msra.mxu0 %v4483_v34 }
 0x442   :  { %4486 = vmatprep.subr.bf16.mxu0 %v4485_v39  ;;  %v1647_v39 = vmul.f32 %v5227_v9, %v5227_v9 }
 0x444   :  { %v1658_v47 = vadd.f32 %v1657_v0, %v1647_v39 }
 0x445   :  { %4488 = vmatpush1.bf16.msra.mxu0 %v4487_v52 }
 0x446   :  { %4490 = vmatprep.subr.bf16.mxu0 %v4489_v58  ;;  %v1648_v58 = vmul.f32 %v5229_v18, %v5229_v18 }
 0x449   :  { %4492 = vmatpush1.bf16.msra.mxu0 %v4491_v51  ;;  %v1659_v51 = vadd.f32 %v1658_v47, %v1648_v58 }
 0x44c   :  { %2961 = vmatmul.mubr.f32.vlgmr.msra.gmra.mrb[14].mxu0 %v5194_v20  ;;  %v2276_v20 = vrot.slane %v2263_v1, %v5027_v41 }
 0x45f   :  { %v2536_v24 = vpop.f32.mrb[12].mxu0 }
 0x460   :  { %v2538_v48 = vpop.f32.mrb[13].mxu0  ;;  %v4515_v7 = vadd.f32 %v2536_v24, %v2268_v5 }
 0x461   :  { %v4516_v8 = vadd.f32 %v2538_v48, %v2272_v29 }
 0x462   :  { %v2967_v15 = vmul.f32 %v4515_v7, %v4515_v7 }
 0x463   :  { %v2968_v17 = vmul.f32 %v4516_v8, %v4516_v8 }
 0x464   :  { %v2974_v40 = vsel %vm2973_vm0, %v2967_v15, 0.0 }
 0x465   :  { %v2975_v41 = vsel %vm2973_vm0, %v2968_v17, 0.0 }
 0x466   :  { %v2976_v19 = vadd.f32 %v2975_v41, %v2974_v40 }
 0x498   :  { %v1668_v54 = vpop.xlane.xlu1 %1667 }
 0x499   :  { %v1670_v56 = vadd.f32 1e-12, %v1668_v54 }
 0x49b   :  { %4570 = vrsqrt.f32 %v1670_v56 }
 0x4a5   :  { %v5244_v22 = vpop.eup %4570 }
 0x4a6   :  { %v1682_v59 = vmul.f32 %v5244_v22, %v5225_v2 }
 0x4a8   :  { %3139 = vmatprep.mubr.f32.mxu1 %v1682_v59 }
 0x4be   :  { %v2749_v61 = vpop.f32.mrb[20].mxu1 }
 0x4bf   :  { %v2751_v63 = vpop.f32.mrb[21].mxu1  ;;  %v4517_v45 = vadd.f32 %v2749_v61, %v2276_v20 }
 0x4c0   :  { %v4518_v4 = vadd.f32 %v2751_v63, %v2280_v14  ;;  %v1681_v14 = vmul.f32 %v5244_v22, %v5213_v55 }
 0x4c1   :  { %v2969_v2 = vmul.f32 %v4517_v45, %v4517_v45 }
 0x4c2   :  { %v2970_v60 = vmul.f32 %v4518_v4, %v4518_v4 }
 0x4c3   :  { %v2977_v21 = vsel %vm2973_vm0, %v2969_v2, 0.0 }
 0x4c4   :  { %v2978_v50 = vadd.f32 %v2977_v21, %v2976_v19  ;;  %v2979_v27 = vsel %vm2973_vm0, %v2970_v60, 0.0 }
 0x4c6   :  { %v2980_v53 = vadd.f32 %v2979_v27, %v2978_v50 }
 0x51f   :  { %v2962_v25 = vpop.f32.mrb[14].mxu0 }
 0x520   :  { %v4519_v28 = vadd.f32 %v2962_v25, %v2284_v30  ;;  %v2964_v31 = vpop.f32.mrb[15].mxu0 }
 0x521   :  { %v4520_v33 = vadd.f32 %v2964_v31, %v2288_v23 }
 0x522   :  { %v2971_v34 = vmul.f32 %v4519_v28, %v4519_v28 }
 0x523   :  { %v2972_v43 = vmul.f32 %v4520_v33, %v4520_v33 }
 0x524   :  { %v2981_v35 = vsel %vm2973_vm0, %v2971_v34, 0.0 }
 0x525   :  { %v2982_v46 = vadd.f32 %v2981_v35, %v2980_v53  ;;  %v2983_v52 = vsel %vm2973_vm0, %v2972_v43, 0.0 }
 0x527   :  { %v2984_v44 = vadd.f32 %v2983_v52, %v2982_v46 }
 0x529   :  { %2985 = vadd.xlane.f32.xlu0 %v2984_v44 }
 0x52d   :  { %1660 = vadd.xlane.f32.xlu0 %v1659_v51 }
 0x5b6   :  { %v2986_v24 = vpop.xlane.xlu0 %2985 }
 0x5b7   :  { %v2987_v48 = vadd.f32 1e-12, %v2986_v24 }
 0x5b9   :  { %4572 = vrsqrt.f32 %v2987_v48 }
 0x5ba   :  { %v1661_v54 = vpop.xlane.xlu0 %1660 }
 0x5bb   :  { %v1669_v56 = vadd.f32 1e-12, %v1661_v54 }
 0x5bd   :  { %4574 = vrsqrt.f32 %v1669_v56 }
 0x5c3   :  { %v4573_v59 = vpop.eup %4572 }
 0x5c4   :  { %v2990_v61 = vmul.f32 %v4573_v59, %v4516_v8  ;;  %v2992_v63 = vmul.f32 %v4573_v59, %v4518_v4  ;;  %v2989_v1 = vmul.f32 %v4573_v59, %v4515_v7  ;;  %v2991_v5 = vmul.f32 %v4573_v59, %v4517_v45 }
 0x5c5   :  { %v2994_v29 = vmul.f32 %v4573_v59, %v4520_v33  ;;  %v2993_v2 = vmul.f32 %v4573_v59, %v4519_v28  ;;  %v1680_v7 = vmul.f32 %v5244_v22, %v5203_v42  ;;  %v1683_v42 = vmul.f32 %v5244_v22, %v5233_v10 }
 0x5c6   :  { %2995 = vmatprep.subr.mxu0 %v2990_v61  ;;  %4493 = vmatprep.subr.mxu1 %v2992_v63 }
 0x5c7   :  { %v4575_v20 = vpop.eup %4574  ;;  %2996 = vmatpush1.xpose.msra.mxu0 %v2989_v1  ;;  %4494 = vmatpush1.xpose.msra.mxu1 %v2991_v5 }
 0x5c8   :  { %3070 = vmatprep.subr.mxu0 %v2992_v63  ;;  %3145 = vmatprep.subr.mxu1 %v2994_v29  ;;  %v1674_v15 = vmul.f32 %v4575_v20, %v5177_v11  ;;  %v1673_v17 = vmul.f32 %v4575_v20, %v5171_v6  ;;  %v1678_v8 = vmul.f32 %v4575_v20, %v5229_v18 }
 0x5c9   :  { %v1677_v55 = vmul.f32 %v4575_v20, %v5227_v9  ;;  %v1679_v11 = vmul.f32 %v5244_v22, %v5199_v3  ;;  %v1684_v6 = vmul.f32 %v5244_v22, %v5235_v16  ;;  %v1676_v18 = vmul.f32 %v4575_v20, %v5180_v12 }
 0x5ca   :  { %3059 = vmatprep.mubr.f32.mxu0 %v1674_v15  ;;  %3140 = vmatmul.mubr.f32.vlgmr.msra.gmra.mrb[22].mxu1 %v1681_v14  ;;  %v1675_v45 = vmul.f32 %v4575_v20, %v5174_v62  ;;  %v3224_v9 = vand.u32 127, %v217_v36  ;;  %v3222_v3 = vadd.s32 8, %v5018_v37 }
 0x5cb   :  { %3060 = vmatmul.mubr.f32.vlgmr.msra.gmra.mrb[16].mxu0 %v1673_v17  ;;  %3146 = vmatpush1.xpose.msra.mxu1 %v2993_v2 }
 0x5cc   :  { %3071 = vmatpush1.xpose.msra.mxu0 %v2991_v5  ;;  %3209 = vmatprep.mubr.f32.mxu1 %v1678_v8  ;;  %v3228_v4 = vadd.s32 1, %v3224_v9  ;;  %v3225_v13 = vmul.u32 8, %v3224_v9 }
 0x5cd   :  { %3064 = vmatprep.mubr.f32.mxu0 %v1680_v7 }
 0x5ce   :  { %3210 = vmatmul.mubr.f32.vlgmr.msra.gmra.mrb[24].mxu1 %v1677_v55  ;;  %v3229_v16 = vmul.u32 8, %v3228_v4  ;;  %vm3227_vm1 = vcmp.ge.s32.totalorder %v3222_v3, %v3225_v13  ;;  %vm3226_vm3 = vcmp.ge.s32.totalorder %v5018_v37, %v3225_v13 }
 0x5cf   :  { %3065 = vmatmul.mubr.f32.gmra.mrb[18].mxu0 %v1679_v11  ;;  %3214 = vmatprep.mubr.f32.mxu1 %v1684_v6 }
 0x5d0   :  { %3134 = vmatprep.mubr.f32.mxu0 %v1676_v18  ;;  %vm3231_vm2 = vcmp.lt.s32.totalorder %v3222_v3, %v3229_v16  ;;  %vm3230_vm4 = vcmp.lt.s32.totalorder %v5018_v37, %v3229_v16 }
 0x5d1   :  { %vm3233_vm5 = vmand %vm3227_vm1, %vm3231_vm2 }
 0x5d2   :  { %3215 = vmatmul.mubr.f32.gmra.mrb[22].mxu1 %v1683_v42  ;;  %vm3232_vm7 = vmand %vm3226_vm3, %vm3230_vm4 }
 0x5d3   :  { %3135 = vmatmul.mubr.f32.vlgmr.msra.gmra.mrb[16].mxu0 %v1675_v45 }
 0x6a1   :  { %v3211_v38 = vpop.f32.mrb[24].mxu1 }
 0x6a2   :  { %v3066_v40 = vpop.f32.mrb[18].mxu0  ;;  %v3213_v12 = vpop.f32.mrb[25].mxu1 }
 0x6a3   :  { %v3068_v41 = vpop.f32.mrb[19].mxu0 }
 0x6a5   :  { %v3216_v62 = vpop.f32.mrb[22].mxu1 }
 0x6a6   :  { %v4522_v10 = vadd.f32 %v3216_v62, %v3066_v40  ;;  %v3136_v22 = vpop.f32.mrb[16].mxu0  ;;  %v3218_v36 = vpop.f32.mrb[23].mxu1 }
 0x6a7   :  { %v4521_v21 = vadd.f32 %v3211_v38, %v3136_v22  ;;  %v3138_v60 = vpop.f32.mrb[17].mxu0 }
 0x6a8   :  { %v3235_v30 = vsel %vm3233_vm5, %v4522_v10, 0.0 }
 0x6a9   :  { %v3240_v57 = vsel %vm3236_vm6, %v3235_v30, 0.0  ;;  %v3234_v19 = vsel %vm3232_vm7, %v4521_v21, 0.0 }
 0x6aa   :  { %3241 = vadd.xlane.f32.xlu0 %v3240_v57  ;;  %v3237_v23 = vsel %vm3236_vm6, %v3234_v19, 0.0 }
 0x6ab   :  { %3238 = vadd.xlane.f32.xlu1 %v3237_v23 }
 0x737   :  { %v3242_v37 = vpop.xlane.xlu0 %3241 }
 0x738   :  { %v3246_v50 = vmul.f32 %v3244_v26, %v3242_v37  ;;  %v3239_v25 = vpop.xlane.xlu1 %3238 }
 0x739   :  { %v3245_v27 = vmul.f32 %v3244_v26, %v3239_v25 }
 0x73a   :  { %3249 = vst.msk [vmem:[%s5315_s11 + $0x8] sm:$0xff] %vm3247_vm8, %v3246_v50 }
 0x73b   :  { %3248 = vst.msk [vmem:[%s5315_s11] sm:$0xff] %vm3247_vm8, %v3245_v27 }
 0x73c   :  { %3254 = vsyncpa [#allocation4], 1 }
 0x73d   :  { %3255 = vsyncpa [#allocation6], 1 }
 0x73e   :  { %3256 = vsyncpa [#allocation9], 1 }
 0x73f   :  { %3257 = vsyncpa [#allocation12], 1 }
 0x740   :  { %3258 = vsyncpa [#allocation15], 1 }
 0x741   :  { %3259 = vsyncpa [#allocation18], 1 }

</bundles_post_ra>
